<compile_context>
chip_gen: v7x
topology: tpu7x:2x2x1
jax: 0.10.0
libtpu: 0.0.40
codegen_flags: <defaults>
</compile_context>

<pallas_src>
import jax
import jax.numpy as jnp
from jax.experimental import pallas as pl
from jax.experimental.pallas import tpu as pltpu

EPS = 1e-5  # nn.BatchNorm2d default eps


def _round_up(x, m):
    return -(-x // m) * m


def _padded_vmem_bytes(shape, dtype):
    """Bytes of an array once laid out in VMEM: last dim padded to 128 lanes,
    second-to-last padded to the dtype's sublane multiple (8 * 4 / itemsize)."""
    it = jnp.dtype(dtype).itemsize
    sub_mult = 8 * max(1, 4 // it)          # 8 for f32, 16 for bf16, 32 for int8
    dims = (1, 1) + tuple(int(d) for d in shape)
    lanes = _round_up(dims[-1], 128)
    subs = _round_up(dims[-2], sub_mult)
    lead = 1
    for d in dims[:-2]:
        lead *= d
    return lead * subs * lanes * it


def _bn_relu(acc, gamma, beta):
    """Training-mode BatchNorm (biased batch stats, single-pass sum/sumsq)
    folded to per-channel scale/shift, then ReLU.  acc: (M, Cout) f32."""
    m = acc.shape[0]
    inv = 1.0 / m
    mean = jnp.sum(acc, axis=0, keepdims=True) * inv            # (1, Cout)
    ex2 = jnp.sum(acc * acc, axis=0, keepdims=True) * inv       # (1, Cout)
    var = ex2 - mean * mean
    scale = gamma * jax.lax.rsqrt(var + EPS)                    # EUP rsqrt
    shift = beta - mean * scale
    return jnp.maximum(acc * scale + shift, 0.0)


def _conv3x3_im2col(pad_ref, xcol_ref, w):
    """3x3 conv (zero pad already materialized in pad_ref) as ONE im2col matmul.

    pad_ref : (N, Ho+2, Wo+2, C) bf16 VMEM scratch (halo zeroed).
    xcol_ref: (M, 9*Cmax) bf16 VMEM scratch; first 9*C lanes are (re)written.
    w       : (9*C, Cout) bf16 weights, tap-major (dh, dw, c) row ordering.
    Returns (M, Cout) f32.
    """
    n, hp2, wp2, c = pad_ref.shape
    ho, wo = hp2 - 2, wp2 - 2
    m = n * ho * wo
    t = 0
    for dh in range(3):
        for dw in range(3):
            win = pad_ref[:, dh:dh + ho, dw:dw + wo, :]         # (n,ho,wo,c) bf16
            xcol_ref[:, t * c:(t + 1) * c] = win.reshape(m, c)  # K-pack along lanes
            t += 1
    xcol = xcol_ref[:, 0:9 * c]                                 # (m, 9c) bf16
    return jnp.dot(xcol, w, preferred_element_type=jnp.float32)


def downsample_block_kernel(x_ref,
                            w1_ref, g1_ref, be1_ref,
                            w2_ref, g2_ref, be2_ref,
                            out_ref,
                            pad1, pad2, xcol, ybuf):
    N, Hp2, Wp2, Cin = pad1.shape
    Ho, Wo = Hp2 - 2, Wp2 - 2
    Cout = pad2.shape[-1]
    NHo = N * Ho

    # ---- AvgPool2d(2, 2) ----------------------------------------------------
    # x_ref is the bf16 NHWC input viewed (free contiguous reshape in the
    # wrapper) as (N*Ho, 2, Wo, 2*Cin): dim 1 selects even/odd input row, lanes
    # [0:Cin)/[Cin:2Cin) select even/odd input column.  Math in f32 (v5e has no
    # bf16 VALU), result stored to scratch as bf16.
    xa = x_ref[:, 0, :, :].astype(jnp.float32)                  # (NHo, Wo, 2Cin)
    xb = x_ref[:, 1, :, :].astype(jnp.float32)
    s = xa + xb
    pooled = 0.25 * (s[..., :Cin] + s[..., Cin:])               # (NHo, Wo, Cin) f32

    # ---- conv1: 3x3 pad=1 as a single im2col MXU matmul ---------------------
    pad1[...] = jnp.zeros(pad1.shape, pad1.dtype)               # whole-buffer memset
    pad1[:, 1:Ho + 1, 1:Wo + 1, :] = (
        pooled.reshape(N, Ho, Wo, Cin).astype(jnp.bfloat16))
    acc1 = _conv3x3_im2col(pad1, xcol, w1_ref[...])             # (M, Cout) f32
    y1 = _bn_relu(acc1, g1_ref[...], be1_ref[...])              # (M, Cout) f32

    # ---- conv2: 3x3 pad=1 as a single im2col MXU matmul ---------------------
    pad2[...] = jnp.zeros(pad2.shape, pad2.dtype)
    pad2[:, 1:Ho + 1, 1:Wo + 1, :] = (
        y1.reshape(N, Ho, Wo, Cout).astype(jnp.bfloat16))
    acc2 = _conv3x3_im2col(pad2, xcol, w2_ref[...])             # (M, Cout) f32
    y2 = _bn_relu(acc2, g2_ref[...], be2_ref[...])              # (M, Cout) f32

    # ---- lane-dense output write --------------------------------------------
    # out_ref is (N*Ho, Wo*Cout): Wo folded into lanes so that (for realistic W)
    # the output block is a large multiple of 128 lanes -> unmasked stores and a
    # much smaller lane-padded out block / writeback DMA.  Built with a plain
    # store plus documented strided-pl.ds reads (no lane-crossing reshape).
    ybuf[...] = y2
    for wo in range(Wo):
        out_ref[:, wo * Cout:(wo + 1) * Cout] = ybuf[pl.ds(wo, NHo, stride=Wo), :]


def downsample_block(x_nchw, params):
    """DownsampleBlock forward. x_nchw: (N, C, H, W) f32 -> (N, Cout, H//2, W//2)."""
    w1, b1, g1, be1, w2, b2, g2, be2 = params
    # b1/b2 are NOT passed to the kernel: a conv bias immediately followed by
    # training-mode BatchNorm cancels exactly (mean subtraction).
    del b1, b2
    N, Cin, H, W = x_nchw.shape
    Cout = w1.shape[-1]

    if H % 2 != 0 or W % 2 != 0:
        # Match F.interpolate(mode='bilinear', align_corners=False): no antialias.
        H, W = H // 2 * 2, W // 2 * 2
        x_nchw = jax.image.resize(x_nchw, (N, Cin, H, W), method="bilinear",
                                  antialias=False)

    Ho, Wo = H // 2, W // 2
    NHo = N * Ho
    M = NHo * Wo
    Cmax = max(Cin, Cout)

    # NCHW -> NHWC in bf16 (the transpose materializes a copy anyway, so the
    # cast is free and halves the kernel's input DMA), then a FREE contiguous
    # reshape exposing the 2x2 pooling window.
    x_nhwc = jnp.transpose(x_nchw, (0, 2, 3, 1)).astype(jnp.bfloat16)
    x_view = x_nhwc.reshape(NHo, 2, Wo, 2 * Cin)

    def c2(a):  # per-channel BN params as (1, Cout) f32
        return a.reshape(1, Cout).astype(jnp.float32)

    inputs = (
        x_view,
        w1.reshape(9 * Cin, Cout).astype(jnp.bfloat16),   # tap-major (dh,dw,ci)
        c2(g1), c2(be1),
        w2.reshape(9 * Cout, Cout).astype(jnp.bfloat16),
        c2(g2), c2(be2),
    )

    scratch_specs = [
        pltpu.VMEM((N, Ho + 2, Wo + 2, Cin), jnp.bfloat16),   # padded conv1 input
        pltpu.VMEM((N, Ho + 2, Wo + 2, Cout), jnp.bfloat16),  # padded conv2 input
        pltpu.VMEM((M, 9 * Cmax), jnp.bfloat16),              # shared im2col slab
        pltpu.VMEM((M, Cout), jnp.float32),                   # conv2 result buffer
    ]
    scratch_shapes_dtypes = [
        ((N, Ho + 2, Wo + 2, Cin), jnp.bfloat16),
        ((N, Ho + 2, Wo + 2, Cout), jnp.bfloat16),
        ((M, 9 * Cmax), jnp.bfloat16),
        ((M, Cout), jnp.float32),
    ]

    out_shape = jax.ShapeDtypeStruct((NHo, Wo * Cout), jnp.float32)

    # VMEM budget from lane/sublane-PADDED footprints: inputs/output are
    # double-buffered by the BlockSpec pipeline; add scratch and a headroom term
    # for in-kernel temporaries/spills.  Cap at 48 MiB so the request is always
    # v7x-safe (64 MiB physical); v5e/v6e (128 MiB) have additional headroom.
    io_bytes = sum(_padded_vmem_bytes(a.shape, a.dtype) for a in inputs)
    io_bytes += _padded_vmem_bytes(out_shape.shape, out_shape.dtype)
    scratch_bytes = sum(_padded_vmem_bytes(s, d) for s, d in scratch_shapes_dtypes)
    temp_bytes = 6 * _padded_vmem_bytes((M, 9 * Cmax), jnp.float32)
    vmem_limit = int(min(2 * io_bytes + scratch_bytes + temp_bytes + (8 << 20),
                         48 << 20))

    def spec(shape):
        nd = len(shape)
        return pl.BlockSpec(shape, lambda *_, _nd=nd: (0,) * _nd)

    out2d = pl.pallas_call(
        downsample_block_kernel,
        out_shape=out_shape,
        grid=(1,),
        in_specs=[spec(a.shape) for a in inputs],
        out_specs=spec((NHo, Wo * Cout)),
        scratch_shapes=scratch_specs,
        compiler_params=pltpu.CompilerParams(
            dimension_semantics=("arbitrary",),
            vmem_limit_bytes=vmem_limit),
    )(*inputs)

    out_nhwc = out2d.reshape(N, Ho, Wo, Cout)
    return jnp.transpose(out_nhwc, (0, 3, 1, 2))  # back to NCHW


def _reference(x_nchw, params):
    """Pure-JAX f32 reference of the same forward pass (keeps the conv bias)."""
    w1, b1, g1, be1, w2, b2, g2, be2 = params
    N, C, H, W = x_nchw.shape
    if H % 2 != 0 or W % 2 != 0:
        H, W = H // 2 * 2, W // 2 * 2
        x_nchw = jax.image.resize(x_nchw, (N, C, H, W), method="bilinear",
                                  antialias=False)
    xp = x_nchw.reshape(N, C, H // 2, 2, W // 2, 2).mean(axis=(3, 5))

    def conv_bn_relu(x, w, b, g, be):
        y = jax.lax.conv_general_dilated(
            x, w, window_strides=(1, 1), padding=((1, 1), (1, 1)),
            dimension_numbers=("NCHW", "HWIO", "NCHW"),
            precision=jax.lax.Precision.HIGHEST)
        y = y + b.reshape(1, -1, 1, 1)
        mu = y.mean(axis=(0, 2, 3), keepdims=True)
        var = ((y - mu) ** 2).mean(axis=(0, 2, 3), keepdims=True)
        y = (y - mu) * jax.lax.rsqrt(var + EPS) * g.reshape(1, -1, 1, 1) \
            + be.reshape(1, -1, 1, 1)
        return jnp.maximum(y, 0.0)

    y = conv_bn_relu(xp, w1, b1, g1, be1)
    return conv_bn_relu(y, w2, b2, g2, be2)


def init_params(key, in_channels, out_channels):
    ks = jax.random.split(key, 4)
    w1 = 0.2 * jax.random.normal(ks[0], (3, 3, in_channels, out_channels), jnp.float32)
    b1 = 0.1 * jax.random.normal(ks[1], (out_channels,), jnp.float32)
    w2 = 0.2 * jax.random.normal(ks[2], (3, 3, out_channels, out_channels), jnp.float32)
    b2 = 0.1 * jax.random.normal(ks[3], (out_channels,), jnp.float32)
    g1 = jnp.ones((out_channels,), jnp.float32)     # BatchNorm affine defaults
    be1 = jnp.zeros((out_channels,), jnp.float32)
    g2 = jnp.ones((out_channels,), jnp.float32)
    be2 = jnp.zeros((out_channels,), jnp.float32)
    return (w1, b1, g1, be1, w2, b2, g2, be2)


if __name__ == "__main__":
    key = jax.random.PRNGKey(0)
    k_x, k_p = jax.random.split(key)

    N, Cin, H, W = 2, 4, 16, 16
    Cout = 8
    x = jax.random.normal(k_x, (N, Cin, H, W), jnp.float32)
    params = init_params(k_p, Cin, Cout)

    out = jax.block_until_ready(downsample_block(x, params))
    ref = jax.block_until_ready(_reference(x, params))

    assert out.shape == (N, Cout, H // 2, W // 2), out.shape
    # Tolerance budget: the kernel uses bf16 activations/weights into the MXU
    # (f32 accumulation) and bf16 input/intermediate storage; the reference is
    # pure f32 at HIGHEST precision, so O(1e-2) per-element deviations on O(1)
    # normalized outputs are expected.
    max_err = float(jnp.max(jnp.abs(out - ref)))
    assert jnp.allclose(out, ref, atol=5e-2, rtol=5e-2), max_err

    print("KERNEL_OK")
</pallas_src>

<mosaic_0001>
module attributes {stable_mosaic.version = 11 : i64} {
  func.func @downsample_block_kernel(%arg0: i32, %arg1: memref<16x2x8x8xbf16, #tpu.memory_space<vmem>>, %arg2: memref<36x8xbf16, #tpu.memory_space<vmem>>, %arg3: memref<1x8xf32, #tpu.memory_space<vmem>>, %arg4: memref<1x8xf32, #tpu.memory_space<vmem>>, %arg5: memref<72x8xbf16, #tpu.memory_space<vmem>>, %arg6: memref<1x8xf32, #tpu.memory_space<vmem>>, %arg7: memref<1x8xf32, #tpu.memory_space<vmem>>, %arg8: memref<16x64xf32, #tpu.memory_space<vmem>>, %arg9: memref<2x10x10x4xbf16, #tpu.memory_space<vmem>>, %arg10: memref<2x10x10x8xbf16, #tpu.memory_space<vmem>>, %arg11: memref<128x72xbf16, #tpu.memory_space<vmem>>, %arg12: memref<128x8xf32, #tpu.memory_space<vmem>>) attributes {dimension_semantics = [#tpu.dimension_semantics<arbitrary>], iteration_bounds = array<i64: 1>, scalar_prefetch = 0 : i64, scratch_operands = 4 : i64, tpu.core_type = #tpu.core_type<tc>, window_params = [{pipeline_mode = #tpu.pipeline_mode<synchronous>, transform_indices = @transform_0, window_bounds = array<i64: 16, 2, 8, 8>}, {pipeline_mode = #tpu.pipeline_mode<synchronous>, transform_indices = @transform_1, window_bounds = array<i64: 36, 8>}, {pipeline_mode = #tpu.pipeline_mode<synchronous>, transform_indices = @transform_2, window_bounds = array<i64: 1, 8>}, {pipeline_mode = #tpu.pipeline_mode<synchronous>, transform_indices = @transform_3, window_bounds = array<i64: 1, 8>}, {pipeline_mode = #tpu.pipeline_mode<synchronous>, transform_indices = @transform_4, window_bounds = array<i64: 72, 8>}, {pipeline_mode = #tpu.pipeline_mode<synchronous>, transform_indices = @transform_5, window_bounds = array<i64: 1, 8>}, {pipeline_mode = #tpu.pipeline_mode<synchronous>, transform_indices = @transform_6, window_bounds = array<i64: 1, 8>}, {pipeline_mode = #tpu.pipeline_mode<synchronous>, transform_indices = @transform_7, window_bounds = array<i64: 16, 64>}]} {
    %c0 = arith.constant 0 : index
    %c0_0 = arith.constant 0 : index
    %c0_1 = arith.constant 0 : index
    %c0_2 = arith.constant 0 : index
    %0 = vector.load %arg1[%c0, %c0_0, %c0_1, %c0_2] : memref<16x2x8x8xbf16, #tpu.memory_space<vmem>>, vector<16x1x8x8xbf16>
    %1 = vector.shape_cast %0 : vector<16x1x8x8xbf16> to vector<16x8x8xbf16>
    %2 = arith.extf %1 : vector<16x8x8xbf16> to vector<16x8x8xf32>
    %c0_3 = arith.constant 0 : index
    %c1 = arith.constant 1 : index
    %c0_4 = arith.constant 0 : index
    %c0_5 = arith.constant 0 : index
    %3 = vector.load %arg1[%c0_3, %c1, %c0_4, %c0_5] : memref<16x2x8x8xbf16, #tpu.memory_space<vmem>>, vector<16x1x8x8xbf16>
    %4 = vector.shape_cast %3 : vector<16x1x8x8xbf16> to vector<16x8x8xbf16>
    %5 = arith.extf %4 : vector<16x8x8xbf16> to vector<16x8x8xf32>
    %6 = arith.addf %2, %5 : vector<16x8x8xf32>
    %7 = vector.extract_strided_slice %6 {offsets = [0, 0, 0], sizes = [16, 8, 4], strides = [1, 1, 1]} : vector<16x8x8xf32> to vector<16x8x4xf32>
    %8 = vector.extract_strided_slice %6 {offsets = [0, 0, 4], sizes = [16, 8, 4], strides = [1, 1, 1]} : vector<16x8x8xf32> to vector<16x8x4xf32>
    %9 = arith.addf %7, %8 : vector<16x8x4xf32>
    %cst = arith.constant 2.500000e-01 : f32
    %10 = vector.broadcast %cst : f32 to vector<16x8x4xf32>
    %11 = arith.mulf %10, %9 : vector<16x8x4xf32>
    %cst_6 = arith.constant 0.000000e+00 : bf16
    %12 = vector.broadcast %cst_6 : bf16 to vector<2x10x10x4xbf16>
    %c0_7 = arith.constant 0 : index
    %c0_8 = arith.constant 0 : index
    %c0_9 = arith.constant 0 : index
    %c0_10 = arith.constant 0 : index
    %13 = vector.load %arg9[%c0_7, %c0_8, %c0_9, %c0_10] : memref<2x10x10x4xbf16, #tpu.memory_space<vmem>>, vector<2x10x10x4xbf16>
    tpu.vector_store %arg9[%c0_7, %c0_8, %c0_9, %c0_10], %12 {strides = array<i32>} : memref<2x10x10x4xbf16, #tpu.memory_space<vmem>>, vector<2x10x10x4xbf16>,
    %14 = vector.shape_cast %11 : vector<16x8x4xf32> to vector<2x8x8x4xf32>
    %15 = arith.truncf %14 : vector<2x8x8x4xf32> to vector<2x8x8x4xbf16>
    %c0_11 = arith.constant 0 : index
    %c1_12 = arith.constant 1 : index
    %c1_13 = arith.constant 1 : index
    %c0_14 = arith.constant 0 : index
    %16 = vector.load %arg9[%c0_11, %c1_12, %c1_13, %c0_14] : memref<2x10x10x4xbf16, #tpu.memory_space<vmem>>, vector<2x8x8x4xbf16>
    tpu.vector_store %arg9[%c0_11, %c1_12, %c1_13, %c0_14], %15 {strides = array<i32>} : memref<2x10x10x4xbf16, #tpu.memory_space<vmem>>, vector<2x8x8x4xbf16>,
    %c0_15 = arith.constant 0 : index
    %c0_16 = arith.constant 0 : index
    %17 = vector.load %arg2[%c0_15, %c0_16] : memref<36x8xbf16, #tpu.memory_space<vmem>>, vector<36x8xbf16>
    %c0_17 = arith.constant 0 : index
    %c0_18 = arith.constant 0 : index
    %c0_19 = arith.constant 0 : index
    %c0_20 = arith.constant 0 : index
    %18 = vector.load %arg9[%c0_17, %c0_18, %c0_19, %c0_20] : memref<2x10x10x4xbf16, #tpu.memory_space<vmem>>, vector<2x8x8x4xbf16>
    %19 = vector.shape_cast %18 : vector<2x8x8x4xbf16> to vector<128x4xbf16>
    %c0_21 = arith.constant 0 : index
    %c0_22 = arith.constant 0 : index
    %20 = vector.load %arg11[%c0_21, %c0_22] : memref<128x72xbf16, #tpu.memory_space<vmem>>, vector<128x4xbf16>
    tpu.vector_store %arg11[%c0_21, %c0_22], %19 {strides = array<i32>} : memref<128x72xbf16, #tpu.memory_space<vmem>>, vector<128x4xbf16>,
    %c0_23 = arith.constant 0 : index
    %c0_24 = arith.constant 0 : index
    %c1_25 = arith.constant 1 : index
    %c0_26 = arith.constant 0 : index
    %21 = vector.load %arg9[%c0_23, %c0_24, %c1_25, %c0_26] : memref<2x10x10x4xbf16, #tpu.memory_space<vmem>>, vector<2x8x8x4xbf16>
    %22 = vector.shape_cast %21 : vector<2x8x8x4xbf16> to vector<128x4xbf16>
    %c0_27 = arith.constant 0 : index
    %c4 = arith.constant 4 : index
    %23 = vector.load %arg11[%c0_27, %c4] : memref<128x72xbf16, #tpu.memory_space<vmem>>, vector<128x4xbf16>
    tpu.vector_store %arg11[%c0_27, %c4], %22 {strides = array<i32>} : memref<128x72xbf16, #tpu.memory_space<vmem>>, vector<128x4xbf16>,
    %c0_28 = arith.constant 0 : index
    %c0_29 = arith.constant 0 : index
    %c2 = arith.constant 2 : index
    %c0_30 = arith.constant 0 : index
    %24 = vector.load %arg9[%c0_28, %c0_29, %c2, %c0_30] : memref<2x10x10x4xbf16, #tpu.memory_space<vmem>>, vector<2x8x8x4xbf16>
    %25 = vector.shape_cast %24 : vector<2x8x8x4xbf16> to vector<128x4xbf16>
    %c0_31 = arith.constant 0 : index
    %c8 = arith.constant 8 : index
    %26 = vector.load %arg11[%c0_31, %c8] : memref<128x72xbf16, #tpu.memory_space<vmem>>, vector<128x4xbf16>
    tpu.vector_store %arg11[%c0_31, %c8], %25 {strides = array<i32>} : memref<128x72xbf16, #tpu.memory_space<vmem>>, vector<128x4xbf16>,
    %c0_32 = arith.constant 0 : index
    %c1_33 = arith.constant 1 : index
    %c0_34 = arith.constant 0 : index
    %c0_35 = arith.constant 0 : index
    %27 = vector.load %arg9[%c0_32, %c1_33, %c0_34, %c0_35] : memref<2x10x10x4xbf16, #tpu.memory_space<vmem>>, vector<2x8x8x4xbf16>
    %28 = vector.shape_cast %27 : vector<2x8x8x4xbf16> to vector<128x4xbf16>
    %c0_36 = arith.constant 0 : index
    %c12 = arith.constant 12 : index
    %29 = vector.load %arg11[%c0_36, %c12] : memref<128x72xbf16, #tpu.memory_space<vmem>>, vector<128x4xbf16>
    tpu.vector_store %arg11[%c0_36, %c12], %28 {strides = array<i32>} : memref<128x72xbf16, #tpu.memory_space<vmem>>, vector<128x4xbf16>,
    %c0_37 = arith.constant 0 : index
    %c1_38 = arith.constant 1 : index
    %c1_39 = arith.constant 1 : index
    %c0_40 = arith.constant 0 : index
    %30 = vector.load %arg9[%c0_37, %c1_38, %c1_39, %c0_40] : memref<2x10x10x4xbf16, #tpu.memory_space<vmem>>, vector<2x8x8x4xbf16>
    %31 = vector.shape_cast %30 : vector<2x8x8x4xbf16> to vector<128x4xbf16>
    %c0_41 = arith.constant 0 : index
    %c16 = arith.constant 16 : index
    %32 = vector.load %arg11[%c0_41, %c16] : memref<128x72xbf16, #tpu.memory_space<vmem>>, vector<128x4xbf16>
    tpu.vector_store %arg11[%c0_41, %c16], %31 {strides = array<i32>} : memref<128x72xbf16, #tpu.memory_space<vmem>>, vector<128x4xbf16>,
    %c0_42 = arith.constant 0 : index
    %c1_43 = arith.constant 1 : index
    %c2_44 = arith.constant 2 : index
    %c0_45 = arith.constant 0 : index
    %33 = vector.load %arg9[%c0_42, %c1_43, %c2_44, %c0_45] : memref<2x10x10x4xbf16, #tpu.memory_space<vmem>>, vector<2x8x8x4xbf16>
    %34 = vector.shape_cast %33 : vector<2x8x8x4xbf16> to vector<128x4xbf16>
    %c0_46 = arith.constant 0 : index
    %c20 = arith.constant 20 : index
    %35 = vector.load %arg11[%c0_46, %c20] : memref<128x72xbf16, #tpu.memory_space<vmem>>, vector<128x4xbf16>
    tpu.vector_store %arg11[%c0_46, %c20], %34 {strides = array<i32>} : memref<128x72xbf16, #tpu.memory_space<vmem>>, vector<128x4xbf16>,
    %c0_47 = arith.constant 0 : index
    %c2_48 = arith.constant 2 : index
    %c0_49 = arith.constant 0 : index
    %c0_50 = arith.constant 0 : index
    %36 = vector.load %arg9[%c0_47, %c2_48, %c0_49, %c0_50] : memref<2x10x10x4xbf16, #tpu.memory_space<vmem>>, vector<2x8x8x4xbf16>
    %37 = vector.shape_cast %36 : vector<2x8x8x4xbf16> to vector<128x4xbf16>
    %c0_51 = arith.constant 0 : index
    %c24 = arith.constant 24 : index
    %38 = vector.load %arg11[%c0_51, %c24] : memref<128x72xbf16, #tpu.memory_space<vmem>>, vector<128x4xbf16>
    tpu.vector_store %arg11[%c0_51, %c24], %37 {strides = array<i32>} : memref<128x72xbf16, #tpu.memory_space<vmem>>, vector<128x4xbf16>,
    %c0_52 = arith.constant 0 : index
    %c2_53 = arith.constant 2 : index
    %c1_54 = arith.constant 1 : index
    %c0_55 = arith.constant 0 : index
    %39 = vector.load %arg9[%c0_52, %c2_53, %c1_54, %c0_55] : memref<2x10x10x4xbf16, #tpu.memory_space<vmem>>, vector<2x8x8x4xbf16>
    %40 = vector.shape_cast %39 : vector<2x8x8x4xbf16> to vector<128x4xbf16>
    %c0_56 = arith.constant 0 : index
    %c28 = arith.constant 28 : index
    %41 = vector.load %arg11[%c0_56, %c28] : memref<128x72xbf16, #tpu.memory_space<vmem>>, vector<128x4xbf16>
    tpu.vector_store %arg11[%c0_56, %c28], %40 {strides = array<i32>} : memref<128x72xbf16, #tpu.memory_space<vmem>>, vector<128x4xbf16>,
    %c0_57 = arith.constant 0 : index
    %c2_58 = arith.constant 2 : index
    %c2_59 = arith.constant 2 : index
    %c0_60 = arith.constant 0 : index
    %42 = vector.load %arg9[%c0_57, %c2_58, %c2_59, %c0_60] : memref<2x10x10x4xbf16, #tpu.memory_space<vmem>>, vector<2x8x8x4xbf16>
    %43 = vector.shape_cast %42 : vector<2x8x8x4xbf16> to vector<128x4xbf16>
    %c0_61 = arith.constant 0 : index
    %c32 = arith.constant 32 : index
    %44 = vector.load %arg11[%c0_61, %c32] : memref<128x72xbf16, #tpu.memory_space<vmem>>, vector<128x4xbf16>
    tpu.vector_store %arg11[%c0_61, %c32], %43 {strides = array<i32>} : memref<128x72xbf16, #tpu.memory_space<vmem>>, vector<128x4xbf16>,
    %c0_62 = arith.constant 0 : index
    %c0_63 = arith.constant 0 : index
    %45 = vector.load %arg11[%c0_62, %c0_63] : memref<128x72xbf16, #tpu.memory_space<vmem>>, vector<128x36xbf16>
    %cst_64 = arith.constant dense<0.000000e+00> : vector<128x8xf32>
    %46 = tpu.matmul %45, %17, %cst_64 {dimension_numbers = #tpu.dot_dimension_numbers<[1], [0], [0], [1], [0, 0, 1, 1], [], []>} : vector<128x36xbf16>, vector<36x8xbf16>, vector<128x8xf32> -> vector<128x8xf32>
    %c0_65 = arith.constant 0 : index
    %c0_66 = arith.constant 0 : index
    %47 = vector.load %arg3[%c0_65, %c0_66] : memref<1x8xf32, #tpu.memory_space<vmem>>, vector<1x8xf32>
    %c0_67 = arith.constant 0 : index
    %c0_68 = arith.constant 0 : index
    %48 = vector.load %arg4[%c0_67, %c0_68] : memref<1x8xf32, #tpu.memory_space<vmem>>, vector<1x8xf32>
    %cst_69 = arith.constant dense<0.000000e+00> : vector<8xf32>
    %49 = vector.multi_reduction <add>, %46, %cst_69 [0] : vector<128x8xf32> to vector<8xf32>
    %50 = vector.shape_cast %49 : vector<8xf32> to vector<1x8xf32>
    %cst_70 = arith.constant 7.812500e-03 : f32
    %51 = vector.broadcast %cst_70 : f32 to vector<1x8xf32>
    %52 = arith.mulf %50, %51 : vector<1x8xf32>
    %53 = arith.mulf %46, %46 : vector<128x8xf32>
    %cst_71 = arith.constant dense<0.000000e+00> : vector<8xf32>
    %54 = vector.multi_reduction <add>, %53, %cst_71 [0] : vector<128x8xf32> to vector<8xf32>
    %55 = vector.shape_cast %54 : vector<8xf32> to vector<1x8xf32>
    %cst_72 = arith.constant 7.812500e-03 : f32
    %56 = vector.broadcast %cst_72 : f32 to vector<1x8xf32>
    %57 = arith.mulf %55, %56 : vector<1x8xf32>
    %58 = arith.mulf %52, %52 : vector<1x8xf32>
    %59 = arith.subf %57, %58 : vector<1x8xf32>
    %cst_73 = arith.constant 9.99999974E-6 : f32
    %60 = vector.broadcast %cst_73 : f32 to vector<1x8xf32>
    %61 = arith.addf %59, %60 : vector<1x8xf32>
    %62 = math.rsqrt %61 : vector<1x8xf32>
    %63 = arith.mulf %47, %62 : vector<1x8xf32>
    %64 = arith.mulf %52, %63 : vector<1x8xf32>
    %65 = arith.subf %48, %64 : vector<1x8xf32>
    %66 = vector.broadcast %63 : vector<1x8xf32> to vector<128x8xf32>
    %67 = arith.mulf %46, %66 : vector<128x8xf32>
    %68 = vector.broadcast %65 : vector<1x8xf32> to vector<128x8xf32>
    %69 = arith.addf %67, %68 : vector<128x8xf32>
    %cst_74 = arith.constant 0.000000e+00 : f32
    %70 = vector.broadcast %cst_74 : f32 to vector<128x8xf32>
    %71 = arith.maximumf %69, %70 : vector<128x8xf32>
    %cst_75 = arith.constant 0.000000e+00 : bf16
    %72 = vector.broadcast %cst_75 : bf16 to vector<2x10x10x8xbf16>
    %c0_76 = arith.constant 0 : index
    %c0_77 = arith.constant 0 : index
    %c0_78 = arith.constant 0 : index
    %c0_79 = arith.constant 0 : index
    %73 = vector.load %arg10[%c0_76, %c0_77, %c0_78, %c0_79] : memref<2x10x10x8xbf16, #tpu.memory_space<vmem>>, vector<2x10x10x8xbf16>
    tpu.vector_store %arg10[%c0_76, %c0_77, %c0_78, %c0_79], %72 {strides = array<i32>} : memref<2x10x10x8xbf16, #tpu.memory_space<vmem>>, vector<2x10x10x8xbf16>,
    %74 = vector.shape_cast %71 : vector<128x8xf32> to vector<2x8x8x8xf32>
    %75 = arith.truncf %74 : vector<2x8x8x8xf32> to vector<2x8x8x8xbf16>
    %c0_80 = arith.constant 0 : index
    %c1_81 = arith.constant 1 : index
    %c1_82 = arith.constant 1 : index
    %c0_83 = arith.constant 0 : index
    %76 = vector.load %arg10[%c0_80, %c1_81, %c1_82, %c0_83] : memref<2x10x10x8xbf16, #tpu.memory_space<vmem>>, vector<2x8x8x8xbf16>
    tpu.vector_store %arg10[%c0_80, %c1_81, %c1_82, %c0_83], %75 {strides = array<i32>} : memref<2x10x10x8xbf16, #tpu.memory_space<vmem>>, vector<2x8x8x8xbf16>,
    %c0_84 = arith.constant 0 : index
    %c0_85 = arith.constant 0 : index
    %77 = vector.load %arg5[%c0_84, %c0_85] : memref<72x8xbf16, #tpu.memory_space<vmem>>, vector<72x8xbf16>
    %c0_86 = arith.constant 0 : index
    %c0_87 = arith.constant 0 : index
    %c0_88 = arith.constant 0 : index
    %c0_89 = arith.constant 0 : index
    %78 = vector.load %arg10[%c0_86, %c0_87, %c0_88, %c0_89] : memref<2x10x10x8xbf16, #tpu.memory_space<vmem>>, vector<2x8x8x8xbf16>
    %79 = vector.shape_cast %78 : vector<2x8x8x8xbf16> to vector<128x8xbf16>
    %c0_90 = arith.constant 0 : index
    %c0_91 = arith.constant 0 : index
    %80 = vector.load %arg11[%c0_90, %c0_91] : memref<128x72xbf16, #tpu.memory_space<vmem>>, vector<128x8xbf16>
    tpu.vector_store %arg11[%c0_90, %c0_91], %79 {strides = array<i32>} : memref<128x72xbf16, #tpu.memory_space<vmem>>, vector<128x8xbf16>,
    %c0_92 = arith.constant 0 : index
    %c0_93 = arith.constant 0 : index
    %c1_94 = arith.constant 1 : index
    %c0_95 = arith.constant 0 : index
    %81 = vector.load %arg10[%c0_92, %c0_93, %c1_94, %c0_95] : memref<2x10x10x8xbf16, #tpu.memory_space<vmem>>, vector<2x8x8x8xbf16>
    %82 = vector.shape_cast %81 : vector<2x8x8x8xbf16> to vector<128x8xbf16>
    %c0_96 = arith.constant 0 : index
    %c8_97 = arith.constant 8 : index
    %83 = vector.load %arg11[%c0_96, %c8_97] : memref<128x72xbf16, #tpu.memory_space<vmem>>, vector<128x8xbf16>
    tpu.vector_store %arg11[%c0_96, %c8_97], %82 {strides = array<i32>} : memref<128x72xbf16, #tpu.memory_space<vmem>>, vector<128x8xbf16>,
    %c0_98 = arith.constant 0 : index
    %c0_99 = arith.constant 0 : index
    %c2_100 = arith.constant 2 : index
    %c0_101 = arith.constant 0 : index
    %84 = vector.load %arg10[%c0_98, %c0_99, %c2_100, %c0_101] : memref<2x10x10x8xbf16, #tpu.memory_space<vmem>>, vector<2x8x8x8xbf16>
    %85 = vector.shape_cast %84 : vector<2x8x8x8xbf16> to vector<128x8xbf16>
    %c0_102 = arith.constant 0 : index
    %c16_103 = arith.constant 16 : index
    %86 = vector.load %arg11[%c0_102, %c16_103] : memref<128x72xbf16, #tpu.memory_space<vmem>>, vector<128x8xbf16>
    tpu.vector_store %arg11[%c0_102, %c16_103], %85 {strides = array<i32>} : memref<128x72xbf16, #tpu.memory_space<vmem>>, vector<128x8xbf16>,
    %c0_104 = arith.constant 0 : index
    %c1_105 = arith.constant 1 : index
    %c0_106 = arith.constant 0 : index
    %c0_107 = arith.constant 0 : index
    %87 = vector.load %arg10[%c0_104, %c1_105, %c0_106, %c0_107] : memref<2x10x10x8xbf16, #tpu.memory_space<vmem>>, vector<2x8x8x8xbf16>
    %88 = vector.shape_cast %87 : vector<2x8x8x8xbf16> to vector<128x8xbf16>
    %c0_108 = arith.constant 0 : index
    %c24_109 = arith.constant 24 : index
    %89 = vector.load %arg11[%c0_108, %c24_109] : memref<128x72xbf16, #tpu.memory_space<vmem>>, vector<128x8xbf16>
    tpu.vector_store %arg11[%c0_108, %c24_109], %88 {strides = array<i32>} : memref<128x72xbf16, #tpu.memory_space<vmem>>, vector<128x8xbf16>,
    %c0_110 = arith.constant 0 : index
    %c1_111 = arith.constant 1 : index
    %c1_112 = arith.constant 1 : index
    %c0_113 = arith.constant 0 : index
    %90 = vector.load %arg10[%c0_110, %c1_111, %c1_112, %c0_113] : memref<2x10x10x8xbf16, #tpu.memory_space<vmem>>, vector<2x8x8x8xbf16>
    %91 = vector.shape_cast %90 : vector<2x8x8x8xbf16> to vector<128x8xbf16>
    %c0_114 = arith.constant 0 : index
    %c32_115 = arith.constant 32 : index
    %92 = vector.load %arg11[%c0_114, %c32_115] : memref<128x72xbf16, #tpu.memory_space<vmem>>, vector<128x8xbf16>
    tpu.vector_store %arg11[%c0_114, %c32_115], %91 {strides = array<i32>} : memref<128x72xbf16, #tpu.memory_space<vmem>>, vector<128x8xbf16>,
    %c0_116 = arith.constant 0 : index
    %c1_117 = arith.constant 1 : index
    %c2_118 = arith.constant 2 : index
    %c0_119 = arith.constant 0 : index
    %93 = vector.load %arg10[%c0_116, %c1_117, %c2_118, %c0_119] : memref<2x10x10x8xbf16, #tpu.memory_space<vmem>>, vector<2x8x8x8xbf16>
    %94 = vector.shape_cast %93 : vector<2x8x8x8xbf16> to vector<128x8xbf16>
    %c0_120 = arith.constant 0 : index
    %c40 = arith.constant 40 : index
    %95 = vector.load %arg11[%c0_120, %c40] : memref<128x72xbf16, #tpu.memory_space<vmem>>, vector<128x8xbf16>
    tpu.vector_store %arg11[%c0_120, %c40], %94 {strides = array<i32>} : memref<128x72xbf16, #tpu.memory_space<vmem>>, vector<128x8xbf16>,
    %c0_121 = arith.constant 0 : index
    %c2_122 = arith.constant 2 : index
    %c0_123 = arith.constant 0 : index
    %c0_124 = arith.constant 0 : index
    %96 = vector.load %arg10[%c0_121, %c2_122, %c0_123, %c0_124] : memref<2x10x10x8xbf16, #tpu.memory_space<vmem>>, vector<2x8x8x8xbf16>
    %97 = vector.shape_cast %96 : vector<2x8x8x8xbf16> to vector<128x8xbf16>
    %c0_125 = arith.constant 0 : index
    %c48 = arith.constant 48 : index
    %98 = vector.load %arg11[%c0_125, %c48] : memref<128x72xbf16, #tpu.memory_space<vmem>>, vector<128x8xbf16>
    tpu.vector_store %arg11[%c0_125, %c48], %97 {strides = array<i32>} : memref<128x72xbf16, #tpu.memory_space<vmem>>, vector<128x8xbf16>,
    %c0_126 = arith.constant 0 : index
    %c2_127 = arith.constant 2 : index
    %c1_128 = arith.constant 1 : index
    %c0_129 = arith.constant 0 : index
    %99 = vector.load %arg10[%c0_126, %c2_127, %c1_128, %c0_129] : memref<2x10x10x8xbf16, #tpu.memory_space<vmem>>, vector<2x8x8x8xbf16>
    %100 = vector.shape_cast %99 : vector<2x8x8x8xbf16> to vector<128x8xbf16>
    %c0_130 = arith.constant 0 : index
    %c56 = arith.constant 56 : index
    %101 = vector.load %arg11[%c0_130, %c56] : memref<128x72xbf16, #tpu.memory_space<vmem>>, vector<128x8xbf16>
    tpu.vector_store %arg11[%c0_130, %c56], %100 {strides = array<i32>} : memref<128x72xbf16, #tpu.memory_space<vmem>>, vector<128x8xbf16>,
    %c0_131 = arith.constant 0 : index
    %c2_132 = arith.constant 2 : index
    %c2_133 = arith.constant 2 : index
    %c0_134 = arith.constant 0 : index
    %102 = vector.load %arg10[%c0_131, %c2_132, %c2_133, %c0_134] : memref<2x10x10x8xbf16, #tpu.memory_space<vmem>>, vector<2x8x8x8xbf16>
    %103 = vector.shape_cast %102 : vector<2x8x8x8xbf16> to vector<128x8xbf16>
    %c0_135 = arith.constant 0 : index
    %c64 = arith.constant 64 : index
    %104 = vector.load %arg11[%c0_135, %c64] : memref<128x72xbf16, #tpu.memory_space<vmem>>, vector<128x8xbf16>
    tpu.vector_store %arg11[%c0_135, %c64], %103 {strides = array<i32>} : memref<128x72xbf16, #tpu.memory_space<vmem>>, vector<128x8xbf16>,
    %c0_136 = arith.constant 0 : index
    %c0_137 = arith.constant 0 : index
    %105 = vector.load %arg11[%c0_136, %c0_137] : memref<128x72xbf16, #tpu.memory_space<vmem>>, vector<128x72xbf16>
    %cst_138 = arith.constant dense<0.000000e+00> : vector<128x8xf32>
    %106 = tpu.matmul %105, %77, %cst_138 {dimension_numbers = #tpu.dot_dimension_numbers<[1], [0], [0], [1], [0, 0, 1, 1], [], []>} : vector<128x72xbf16>, vector<72x8xbf16>, vector<128x8xf32> -> vector<128x8xf32>
    %c0_139 = arith.constant 0 : index
    %c0_140 = arith.constant 0 : index
    %107 = vector.load %arg6[%c0_139, %c0_140] : memref<1x8xf32, #tpu.memory_space<vmem>>, vector<1x8xf32>
    %c0_141 = arith.constant 0 : index
    %c0_142 = arith.constant 0 : index
    %108 = vector.load %arg7[%c0_141, %c0_142] : memref<1x8xf32, #tpu.memory_space<vmem>>, vector<1x8xf32>
    %cst_143 = arith.constant dense<0.000000e+00> : vector<8xf32>
    %109 = vector.multi_reduction <add>, %106, %cst_143 [0] : vector<128x8xf32> to vector<8xf32>
    %110 = vector.shape_cast %109 : vector<8xf32> to vector<1x8xf32>
    %cst_144 = arith.constant 7.812500e-03 : f32
    %111 = vector.broadcast %cst_144 : f32 to vector<1x8xf32>
    %112 = arith.mulf %110, %111 : vector<1x8xf32>
    %113 = arith.mulf %106, %106 : vector<128x8xf32>
    %cst_145 = arith.constant dense<0.000000e+00> : vector<8xf32>
    %114 = vector.multi_reduction <add>, %113, %cst_145 [0] : vector<128x8xf32> to vector<8xf32>
    %115 = vector.shape_cast %114 : vector<8xf32> to vector<1x8xf32>
    %cst_146 = arith.constant 7.812500e-03 : f32
    %116 = vector.broadcast %cst_146 : f32 to vector<1x8xf32>
    %117 = arith.mulf %115, %116 : vector<1x8xf32>
    %118 = arith.mulf %112, %112 : vector<1x8xf32>
    %119 = arith.subf %117, %118 : vector<1x8xf32>
    %cst_147 = arith.constant 9.99999974E-6 : f32
    %120 = vector.broadcast %cst_147 : f32 to vector<1x8xf32>
    %121 = arith.addf %119, %120 : vector<1x8xf32>
    %122 = math.rsqrt %121 : vector<1x8xf32>
    %123 = arith.mulf %107, %122 : vector<1x8xf32>
    %124 = arith.mulf %112, %123 : vector<1x8xf32>
    %125 = arith.subf %108, %124 : vector<1x8xf32>
    %126 = vector.broadcast %123 : vector<1x8xf32> to vector<128x8xf32>
    %127 = arith.mulf %106, %126 : vector<128x8xf32>
    %128 = vector.broadcast %125 : vector<1x8xf32> to vector<128x8xf32>
    %129 = arith.addf %127, %128 : vector<128x8xf32>
    %cst_148 = arith.constant 0.000000e+00 : f32
    %130 = vector.broadcast %cst_148 : f32 to vector<128x8xf32>
    %131 = arith.maximumf %129, %130 : vector<128x8xf32>
    %c0_149 = arith.constant 0 : index
    %c0_150 = arith.constant 0 : index
    %132 = vector.load %arg12[%c0_149, %c0_150] : memref<128x8xf32, #tpu.memory_space<vmem>>, vector<128x8xf32>
    tpu.vector_store %arg12[%c0_149, %c0_150], %131 {strides = array<i32>} : memref<128x8xf32, #tpu.memory_space<vmem>>, vector<128x8xf32>,
    %c0_151 = arith.constant 0 : index
    %c0_152 = arith.constant 0 : index
    %133 = tpu.strided_load %arg12[%c0_151, %c0_152] {strides = array<i32: 8, 1>} : memref<128x8xf32, #tpu.memory_space<vmem>>, vector<16x8xf32>
    %c0_153 = arith.constant 0 : index
    %c0_154 = arith.constant 0 : index
    %134 = vector.load %arg8[%c0_153, %c0_154] : memref<16x64xf32, #tpu.memory_space<vmem>>, vector<16x8xf32>
    tpu.vector_store %arg8[%c0_153, %c0_154], %133 {strides = array<i32>} : memref<16x64xf32, #tpu.memory_space<vmem>>, vector<16x8xf32>,
    %c1_155 = arith.constant 1 : index
    %c0_156 = arith.constant 0 : index
    %135 = tpu.strided_load %arg12[%c1_155, %c0_156] {strides = array<i32: 8, 1>} : memref<128x8xf32, #tpu.memory_space<vmem>>, vector<16x8xf32>
    %c0_157 = arith.constant 0 : index
    %c8_158 = arith.constant 8 : index
    %136 = vector.load %arg8[%c0_157, %c8_158] : memref<16x64xf32, #tpu.memory_space<vmem>>, vector<16x8xf32>
    tpu.vector_store %arg8[%c0_157, %c8_158], %135 {strides = array<i32>} : memref<16x64xf32, #tpu.memory_space<vmem>>, vector<16x8xf32>,
    %c2_159 = arith.constant 2 : index
    %c0_160 = arith.constant 0 : index
    %137 = tpu.strided_load %arg12[%c2_159, %c0_160] {strides = array<i32: 8, 1>} : memref<128x8xf32, #tpu.memory_space<vmem>>, vector<16x8xf32>
    %c0_161 = arith.constant 0 : index
    %c16_162 = arith.constant 16 : index
    %138 = vector.load %arg8[%c0_161, %c16_162] : memref<16x64xf32, #tpu.memory_space<vmem>>, vector<16x8xf32>
    tpu.vector_store %arg8[%c0_161, %c16_162], %137 {strides = array<i32>} : memref<16x64xf32, #tpu.memory_space<vmem>>, vector<16x8xf32>,
    %c3 = arith.constant 3 : index
    %c0_163 = arith.constant 0 : index
    %139 = tpu.strided_load %arg12[%c3, %c0_163] {strides = array<i32: 8, 1>} : memref<128x8xf32, #tpu.memory_space<vmem>>, vector<16x8xf32>
    %c0_164 = arith.constant 0 : index
    %c24_165 = arith.constant 24 : index
    %140 = vector.load %arg8[%c0_164, %c24_165] : memref<16x64xf32, #tpu.memory_space<vmem>>, vector<16x8xf32>
    tpu.vector_store %arg8[%c0_164, %c24_165], %139 {strides = array<i32>} : memref<16x64xf32, #tpu.memory_space<vmem>>, vector<16x8xf32>,
    %c4_166 = arith.constant 4 : index
    %c0_167 = arith.constant 0 : index
    %141 = tpu.strided_load %arg12[%c4_166, %c0_167] {strides = array<i32: 8, 1>} : memref<128x8xf32, #tpu.memory_space<vmem>>, vector<16x8xf32>
    %c0_168 = arith.constant 0 : index
    %c32_169 = arith.constant 32 : index
    %142 = vector.load %arg8[%c0_168, %c32_169] : memref<16x64xf32, #tpu.memory_space<vmem>>, vector<16x8xf32>
    tpu.vector_store %arg8[%c0_168, %c32_169], %141 {strides = array<i32>} : memref<16x64xf32, #tpu.memory_space<vmem>>, vector<16x8xf32>,
    %c5 = arith.constant 5 : index
    %c0_170 = arith.constant 0 : index
    %143 = tpu.strided_load %arg12[%c5, %c0_170] {strides = array<i32: 8, 1>} : memref<128x8xf32, #tpu.memory_space<vmem>>, vector<16x8xf32>
    %c0_171 = arith.constant 0 : index
    %c40_172 = arith.constant 40 : index
    %144 = vector.load %arg8[%c0_171, %c40_172] : memref<16x64xf32, #tpu.memory_space<vmem>>, vector<16x8xf32>
    tpu.vector_store %arg8[%c0_171, %c40_172], %143 {strides = array<i32>} : memref<16x64xf32, #tpu.memory_space<vmem>>, vector<16x8xf32>,
    %c6 = arith.constant 6 : index
    %c0_173 = arith.constant 0 : index
    %145 = tpu.strided_load %arg12[%c6, %c0_173] {strides = array<i32: 8, 1>} : memref<128x8xf32, #tpu.memory_space<vmem>>, vector<16x8xf32>
    %c0_174 = arith.constant 0 : index
    %c48_175 = arith.constant 48 : index
    %146 = vector.load %arg8[%c0_174, %c48_175] : memref<16x64xf32, #tpu.memory_space<vmem>>, vector<16x8xf32>
    tpu.vector_store %arg8[%c0_174, %c48_175], %145 {strides = array<i32>} : memref<16x64xf32, #tpu.memory_space<vmem>>, vector<16x8xf32>,
    %c7 = arith.constant 7 : index
    %c0_176 = arith.constant 0 : index
    %147 = tpu.strided_load %arg12[%c7, %c0_176] {strides = array<i32: 8, 1>} : memref<128x8xf32, #tpu.memory_space<vmem>>, vector<16x8xf32>
    %c0_177 = arith.constant 0 : index
    %c56_178 = arith.constant 56 : index
    %148 = vector.load %arg8[%c0_177, %c56_178] : memref<16x64xf32, #tpu.memory_space<vmem>>, vector<16x8xf32>
    tpu.vector_store %arg8[%c0_177, %c56_178], %147 {strides = array<i32>} : memref<16x64xf32, #tpu.memory_space<vmem>>, vector<16x8xf32>,
    return
  }
  func.func @transform_0(%arg0: i32) -> (i32, i32, i32, i32) {
    %c0_i32 = arith.constant 0 : i32
    %c0_i32_0 = arith.constant 0 : i32
    %c0_i32_1 = arith.constant 0 : i32
    %c0_i32_2 = arith.constant 0 : i32
    %c0_i32_3 = arith.constant 0 : i32
    return %c0_i32, %c0_i32_0, %c0_i32_1, %c0_i32_2 : i32, i32, i32, i32
  }
  func.func @transform_1(%arg0: i32) -> (i32, i32) {
    %c0_i32 = arith.constant 0 : i32
    %c0_i32_0 = arith.constant 0 : i32
    %c0_i32_1 = arith.constant 0 : i32
    return %c0_i32, %c0_i32_0 : i32, i32
  }
  func.func @transform_2(%arg0: i32) -> (i32, i32) {
    %c0_i32 = arith.constant 0 : i32
    %c0_i32_0 = arith.constant 0 : i32
    %c0_i32_1 = arith.constant 0 : i32
    return %c0_i32, %c0_i32_0 : i32, i32
  }
  func.func @transform_3(%arg0: i32) -> (i32, i32) {
    %c0_i32 = arith.constant 0 : i32
    %c0_i32_0 = arith.constant 0 : i32
    %c0_i32_1 = arith.constant 0 : i32
    return %c0_i32, %c0_i32_0 : i32, i32
  }
  func.func @transform_4(%arg0: i32) -> (i32, i32) {
    %c0_i32 = arith.constant 0 : i32
    %c0_i32_0 = arith.constant 0 : i32
    %c0_i32_1 = arith.constant 0 : i32
    return %c0_i32, %c0_i32_0 : i32, i32
  }
  func.func @transform_5(%arg0: i32) -> (i32, i32) {
    %c0_i32 = arith.constant 0 : i32
    %c0_i32_0 = arith.constant 0 : i32
    %c0_i32_1 = arith.constant 0 : i32
    return %c0_i32, %c0_i32_0 : i32, i32
  }
  func.func @transform_6(%arg0: i32) -> (i32, i32) {
    %c0_i32 = arith.constant 0 : i32
    %c0_i32_0 = arith.constant 0 : i32
    %c0_i32_1 = arith.constant 0 : i32
    return %c0_i32, %c0_i32_0 : i32, i32
  }
  func.func @transform_7(%arg0: i32) -> (i32, i32) {
    %c0_i32 = arith.constant 0 : i32
    %c0_i32_0 = arith.constant 0 : i32
    %c0_i32_1 = arith.constant 0 : i32
    return %c0_i32, %c0_i32_0 : i32, i32
  }
}

</mosaic_0001>

<bundles_post_ra>
// kernel: tpu_custom_call.1
= control target key start
LH: loop header
LB: loop body
LE: loop exit
PB: predicated region body
PF: predicated region fallthrough
CT: control target
= control target key end

     0   :  { %vm205_vm0 = vcmask 27648   ;;  %v5770_v9 = vmov 0   ;;  %s5771_s15 = smov 124   ;;  %vm207_vm1 = vcmask 24576   ;;  %s8191_s0 = inlined_call_operand.vmem [shape: bf16[16,2,8,8], index: 0, kind: input, shape index: {}]   ;;  %s8192_s1 = inlined_call_operand.vmem [shape: bf16[36,8], index: 1, kind: input, shape index: {}]   ;;  %s8193_s2 = inlined_call_operand.vmem [shape: f32[1,8], index: 2, kind: input, shape index: {}]   ;;  %s8194_s3 = inlined_call_operand.vmem [shape: f32[1,8], index: 3, kind: input, shape index: {}]   ;;  %s8195_s4 = inlined_call_operand.vmem [shape: bf16[72,8], index: 4, kind: input, shape index: {}]   ;;  %s8196_s5 = inlined_call_operand.vmem [shape: f32[1,8], index: 5, kind: input, shape index: {}]   ;;  %s8197_s6 = inlined_call_operand.vmem [shape: f32[1,8], index: 6, kind: input, shape index: {}]   ;;  %s8198_s7 = inlined_call_operand.hbm [shape: f32[16,64], index: 7, kind: output, shape index: {}]  }
   0x1   :  { %v30_v0 = vld [vmem:[%s8191_s0 + $0x10] sm:$0xff]   ;;  %v28_v1 = vld [vmem:[%s8191_s0] sm:$0xff]   ;;  %v31_v2 = vld [vmem:[%s8191_s0 + $0x18] sm:$0xff]   ;;  %213 = vst.msk [vmem:[#allocation2 + $0x18] sm:$0xf] %vm205_vm0, %v5770_v9 }
   0x2   :  { %v46_v3 = vunpack.c.l.bf16 %v30_v0  ;;  %v79_v4 = vunpack.c.h.bf16 %v30_v0  ;;  %v44_v5 = vunpack.c.l.bf16 %v28_v1  ;;  %v77_v6 = vunpack.c.h.bf16 %v28_v1  ;;  %v29_v7 = vld [vmem:[%s8191_s0 + $0x8] sm:$0xff]   ;;  %206 = vst.msk [vmem:[#allocation2] sm:$0xf] %vm205_vm0, %v5770_v9  ;;  %209 = vst.msk [vmem:[#allocation2 + $0x8] sm:$0xf] %vm205_vm0, %v5770_v9  ;;  %v32_v14 = vld [vmem:[%s8191_s0 + $0x20] sm:$0xff]  }
   0x3   :  { %v33_v8 = vld [vmem:[%s8191_s0 + $0x28] sm:$0xff]   ;;  %211 = vst.msk [vmem:[#allocation2 + $0x10] sm:$0xf] %vm205_vm0, %v5770_v9  ;;  %215 = vst.msk [vmem:[#allocation2 + $0x20] sm:$0xf] %vm205_vm0, %v5770_v9  ;;  %v47_v10 = vunpack.c.l.bf16 %v31_v2  ;;  %v80_v11 = vunpack.c.h.bf16 %v31_v2  ;;  %v45_v12 = vunpack.c.l.bf16 %v29_v7  ;;  %v78_v13 = vunpack.c.h.bf16 %v29_v7  ;;  %v35_v19 = vld [vmem:[%s8191_s0 + $0x38] sm:$0xff]  }
   0x4   :  { %217 = vst.msk [vmem:[#allocation2 + $0x28] sm:$0xf] %vm205_vm0, %v5770_v9  ;;  %219 = vst.msk [vmem:[#allocation2 + $0x30] sm:$0xf] %vm205_vm0, %v5770_v9  ;;  %v5884_v15 = vadd.f32 %v79_v4, %v46_v3  ;;  %v5886_v16 = vadd.f32 %v77_v6, %v44_v5  ;;  %v49_v17 = vunpack.c.l.bf16 %v33_v8  ;;  %v82_v18 = vunpack.c.h.bf16 %v33_v8  ;;  %v34_v24 = vld [vmem:[%s8191_s0 + $0x30] sm:$0xff]   ;;  %v37_v31 = vld [vmem:[%s8191_s0 + $0x48] sm:$0xff]  }
   0x5   :  { %221 = vst.msk [vmem:[#allocation2 + $0x38] sm:$0xf] %vm205_vm0, %v5770_v9  ;;  %223 = vst.msk [vmem:[#allocation2 + $0x40] sm:$0xf] %vm205_vm0, %v5770_v9  ;;  %v5895_v20 = vadd.f32 %v80_v11, %v47_v10  ;;  %v5897_v21 = vadd.f32 %v78_v13, %v45_v12  ;;  %v48_v22 = vunpack.c.l.bf16 %v32_v14  ;;  %v81_v23 = vunpack.c.h.bf16 %v32_v14  ;;  %v36_v32 = vld [vmem:[%s8191_s0 + $0x40] sm:$0xff]   ;;  %v39_v35 = vld [vmem:[%s8191_s0 + $0x58] sm:$0xff]  }
   0x6   :  { %225 = vst.msk [vmem:[#allocation2 + $0x48] sm:$0xf] %vm205_vm0, %v5770_v9  ;;  %227 = vst.msk [vmem:[#allocation2 + $0x50] sm:$0xf] %vm205_vm0, %v5770_v9  ;;  %129 = vrot.lane.b32.xlu1 %v5884_v15, %s5771_s15  ;;  %125 = vrot.lane.b32.xlu0 %v5886_v16, %s5771_s15  ;;  %v5902_v25 = vadd.f32 %v82_v18, %v49_v17  ;;  %v51_v26 = vunpack.c.l.bf16 %v35_v19  ;;  %v84_v28 = vunpack.c.h.bf16 %v35_v19  ;;  %v50_v29 = vunpack.c.l.bf16 %v34_v24  ;;  %v38_v40 = vld [vmem:[%s8191_s0 + $0x50] sm:$0xff]  }
   0x7   :  { %229 = vst.msk [vmem:[#allocation2 + $0x58] sm:$0xf] %vm205_vm0, %v5770_v9  ;;  %231 = vst.msk [vmem:[#allocation2 + $0x60] sm:$0xf] %vm205_vm0, %v5770_v9  ;;  %v5908_v27 = vadd.f32 %v81_v23, %v48_v22  ;;  %v83_v30 = vunpack.c.h.bf16 %v34_v24  ;;  %v53_v33 = vunpack.c.l.bf16 %v37_v31  ;;  %v86_v34 = vunpack.c.h.bf16 %v37_v31 }
   0x8   :  { %233 = vst.msk [vmem:[#allocation2 + $0x68] sm:$0xf] %vm205_vm0, %v5770_v9  ;;  %235 = vst.msk [vmem:[#allocation2 + $0x70] sm:$0xf] %vm205_vm0, %v5770_v9  ;;  %v5923_v36 = vadd.f32 %v84_v28, %v51_v26  ;;  %v52_v38 = vunpack.c.l.bf16 %v36_v32  ;;  %v85_v39 = vunpack.c.h.bf16 %v36_v32 }
   0x9   :  { %237 = vst.msk [vmem:[#allocation2 + $0x78] sm:$0xf] %vm205_vm0, %v5770_v9  ;;  %239 = vst.msk [vmem:[#allocation2 + $0x80] sm:$0xf] %vm205_vm0, %v5770_v9  ;;  %v5925_v37 = vadd.f32 %v83_v30, %v50_v29 }
   0xa   :  { %241 = vst.msk [vmem:[#allocation2 + $0x88] sm:$0xf] %vm205_vm0, %v5770_v9  ;;  %243 = vst.msk [vmem:[#allocation2 + $0x90] sm:$0xf] %vm205_vm0, %v5770_v9  ;;  %131 = vrot.lane.b32.xlu1 %v5895_v20, %s5771_s15  ;;  %127 = vrot.lane.b32.xlu0 %v5897_v21, %s5771_s15 }
   0xb   :  { %245 = vst.msk [vmem:[#allocation2 + $0x98] sm:$0xf] %vm205_vm0, %v5770_v9 }
   0xc   :  { %214 = vst.msk [vmem:[#allocation2 + $0x1c] sm:$0x1] %vm207_vm1, %v5770_v9  ;;  %208 = vst.msk [vmem:[#allocation2 + $0x4] sm:$0x1] %vm207_vm1, %v5770_v9 }
   0xd   :  { %210 = vst.msk [vmem:[#allocation2 + $0xc] sm:$0x1] %vm207_vm1, %v5770_v9  ;;  %212 = vst.msk [vmem:[#allocation2 + $0x14] sm:$0x1] %vm207_vm1, %v5770_v9 }
   0xe   :  { %135 = vrot.lane.b32.xlu1 %v5902_v25, %s5771_s15  ;;  %133 = vrot.lane.b32.xlu0 %v5908_v27, %s5771_s15  ;;  %216 = vst.msk [vmem:[#allocation2 + $0x24] sm:$0x1] %vm207_vm1, %v5770_v9  ;;  %218 = vst.msk [vmem:[#allocation2 + $0x2c] sm:$0x1] %vm207_vm1, %v5770_v9 }
   0xf   :  { %220 = vst.msk [vmem:[#allocation2 + $0x34] sm:$0x1] %vm207_vm1, %v5770_v9  ;;  %222 = vst.msk [vmem:[#allocation2 + $0x3c] sm:$0x1] %vm207_vm1, %v5770_v9 }
  0x10   :  { %224 = vst.msk [vmem:[#allocation2 + $0x44] sm:$0x1] %vm207_vm1, %v5770_v9  ;;  %226 = vst.msk [vmem:[#allocation2 + $0x4c] sm:$0x1] %vm207_vm1, %v5770_v9 }
  0x11   :  { %228 = vst.msk [vmem:[#allocation2 + $0x54] sm:$0x1] %vm207_vm1, %v5770_v9  ;;  %230 = vst.msk [vmem:[#allocation2 + $0x5c] sm:$0x1] %vm207_vm1, %v5770_v9 }
  0x12   :  { %232 = vst.msk [vmem:[#allocation2 + $0x64] sm:$0x1] %vm207_vm1, %v5770_v9  ;;  %234 = vst.msk [vmem:[#allocation2 + $0x6c] sm:$0x1] %vm207_vm1, %v5770_v9 }
  0x13   :  { %236 = vst.msk [vmem:[#allocation2 + $0x74] sm:$0x1] %vm207_vm1, %v5770_v9  ;;  %238 = vst.msk [vmem:[#allocation2 + $0x7c] sm:$0x1] %vm207_vm1, %v5770_v9 }
  0x14   :  { %240 = vst.msk [vmem:[#allocation2 + $0x84] sm:$0x1] %vm207_vm1, %v5770_v9  ;;  %242 = vst.msk [vmem:[#allocation2 + $0x8c] sm:$0x1] %vm207_vm1, %v5770_v9 }
  0x15   :  { %244 = vst.msk [vmem:[#allocation2 + $0x94] sm:$0x1] %vm207_vm1, %v5770_v9  ;;  %246 = vst.msk [vmem:[#allocation2 + $0x9c] sm:$0x1] %vm207_vm1, %v5770_v9 }
  0x16   :  { %12 = vsyncpa [#allocation7], 0  ;;  %v5970_v41 = vadd.f32 %v86_v34, %v53_v33  ;;  %v55_v42 = vunpack.c.l.bf16 %v39_v35  ;;  %139 = vrot.lane.b32.xlu1 %v5923_v36, %s5771_s15  ;;  %137 = vrot.lane.b32.xlu0 %v5925_v37, %s5771_s15  ;;  %v5976_v43 = vadd.f32 %v85_v39, %v52_v38  ;;  %v88_v44 = vunpack.c.h.bf16 %v39_v35  ;;  %v41_v47 = vld [vmem:[%s8191_s0 + $0x68] sm:$0xff]   ;;  %v40_v48 = vld [vmem:[%s8191_s0 + $0x60] sm:$0xff]   ;;  %s5773_s11 = smov 24   ;;  %s5774_s12 = smov 8  }
  0x17   :  { %v54_v45 = vunpack.c.l.bf16 %v38_v40  ;;  %v87_v46 = vunpack.c.h.bf16 %v38_v40  ;;  %v57_v49 = vunpack.c.l.bf16 %v41_v47  ;;  %v90_v50 = vunpack.c.h.bf16 %v41_v47  ;;  %v43_v55 = vld [vmem:[%s8191_s0 + $0x78] sm:$0xff]   ;;  %v42_v56 = vld [vmem:[%s8191_s0 + $0x70] sm:$0xff]   ;;  %v652_v1 = vld [vmem:[#allocation2] sm:$0xf]  ;;  %s5772_s0 = smov 12   ;;  %s5775_s13 = smov 20  }
  0x18   :  { %v5988_v51 = vadd.f32 %v88_v44, %v55_v42  ;;  %v56_v53 = vunpack.c.l.bf16 %v40_v48  ;;  %v89_v54 = vunpack.c.h.bf16 %v40_v48  ;;  %v59_v58 = vunpack.c.l.bf16 %v43_v55  ;;  %v1847_v4 = vld [vmem:[#allocation2 + $0x48] sm:$0xf]  ;;  %v6018_v5 = vld [vmem:[#allocation2] sm:$0xe]  ;;  %v6020_v6 = vld [vmem:[#allocation2 + $0x4] sm:$0x1] }
  0x19   :  { %v5990_v52 = vadd.f32 %v87_v46, %v54_v45  ;;  %v5998_v57 = vadd.f32 %v90_v50, %v57_v49  ;;  %v92_v60 = vunpack.c.h.bf16 %v43_v55  ;;  %v58_v61 = vunpack.c.l.bf16 %v42_v56  ;;  %v653_v18 = vld [vmem:[#allocation2 + $0x4] sm:$0x1]  ;;  %v1848_v19 = vld [vmem:[#allocation2 + $0x4c] sm:$0x1]  ;;  %v6026_v24 = vld [vmem:[#allocation2 + $0x48] sm:$0xe] }
  0x1a   :  { %143 = vrot.lane.b32.xlu1 %v5970_v41, %s5771_s15  ;;  %141 = vrot.lane.b32.xlu0 %v5976_v43, %s5771_s15  ;;  %v6004_v59 = vadd.f32 %v89_v54, %v56_v53  ;;  %v91_v62 = vunpack.c.h.bf16 %v42_v56  ;;  %v688_v2 = vshrl.u32 %v652_v1, 16  ;;  %v691_v3 = vshll.u32 %v652_v1, 16  ;;  %v6028_v26 = vld [vmem:[#allocation2 + $0x4c] sm:$0x1]  ;;  %v6030_v30 = vld [vmem:[#allocation2 + $0x50] sm:$0xe] }
  0x1b   :  { %v6010_v63 = vadd.f32 %v92_v60, %v59_v58  ;;  %vm473_vm2 = vsmask.f32 7938  ;;  %v1964_v12 = vshrl.u32 %v1847_v4, 16  ;;  %v1967_v13 = vshll.u32 %v1847_v4, 16  ;;  %v6032_v31 = vld [vmem:[#allocation2 + $0x54] sm:$0x1] }
  0x1c   :  { %v6012_v0 = vadd.f32 %v91_v62, %v58_v61  ;;  %v690_v7 = vrot.slane %v688_v2, 4  ;;  %v693_v8 = vrot.slane %v691_v3, 5  ;;  %vm479_vm3 = vsmask.f32 256  ;;  %v490_v55 = vld [vmem:[#allocation2 + $0x18] sm:$0xf]  ;;  %vm6052_vm4 = vmand %vm205_vm0, %vm473_vm2 }
  0x1d   :  { %v5300_v22 = vrot.slane %v6018_v5, 9  ;;  %v1037_v23 = vrot.slane %v6020_v6, 5  ;;  %v6034_v34 = vrot.slane %v1964_v12, 4  ;;  %v6036_v35 = vrot.slane %v1967_v13, 5  ;;  %v475_v2 = vld [vmem:[#allocation2 + $0x8] sm:$0xf]  ;;  %vm6060_vm5 = vmand %vm207_vm1, %vm479_vm3 }
  0x1e   :  { %147 = vrot.lane.b32.xlu1 %v5988_v51, %s5771_s15  ;;  %145 = vrot.lane.b32.xlu0 %v5990_v52, %s5771_s15  ;;  %v694_v32 = vor.u32 %v693_v8, %v690_v7  ;;  %v1973_v38 = vshll.u32 %v1848_v19, 16  ;;  %v5387_v45 = vrot.slane %v6026_v24, 9  ;;  %v2240_v46 = vrot.slane %v6028_v26, 5  ;;  %s5776_s14 = smov 32   ;;  %s5778_s16 = smov 16  }
  0x1f   :  { %v5308_v47 = vrot.slane %v6030_v30, 9  ;;  %v1069_v48 = vrot.slane %v6032_v31, 5  ;;  %v1970_v7 = vor.u32 %v6036_v35, %v6034_v34  ;;  %vm1032_vm6 = vcmask 1042432   ;;  %s5779_s17 = smov 28   ;;  %s5781_s26 = smov 40  }
  0x20   :  { %v6044_v54 = vrot.slane %v694_v32, 4  ;;  %vm1033_vm7 = vcmask 1046532   ;;  %vm684_vm8 = vsmask.f32 3328  ;;  %vm685_vm9 = vsmask.f32 7440 }
  0x21   :  { %vm6208_vm10 = vmor %vm1032_vm6, %vm1033_vm7  ;;  %vm643_vm12 = vcmask 31744   ;;  %vm2379_vm13 = vcmask 1041408   ;;  %vm959_vm14 = vcmask 64544   ;;  %vm1147_vm15 = vcmask 97344   ;;  %s5782_s27 = smov 64   ;;  %s5783_s28 = smov 56  }
  0x22   :  { %151 = vrot.lane.b32.xlu1 %v5998_v57, %s5771_s15  ;;  %149 = vrot.lane.b32.xlu0 %v6004_v59, %s5771_s15  ;;  %vm6227_vm11 = vmor %vm684_vm8, %vm685_vm9  ;;  %v6253_v5 = vsel %vm6208_vm10, %v5387_v45, %v2240_v46  ;;  %v6266_v24 = vsel %vm6208_vm10, %v5308_v47, %v1069_v48  ;;  %vm1236_vm0 = vcmask 130144   ;;  %vm1549_vm1 = vcmask 162944  }
  0x23   :  { %vm2137_vm6 = vcmask 261344   ;;  %vm2322_vm7 = vcmask 294144   ;;  %vm2354_vm8 = vcmask 293888   ;;  %vm2642_vm9 = vcmask 60416  }
  0x24   :  { %2676 = vst.msk [vmem:[#allocation3 + $0x80] sm:$0xf] %vm2642_vm9, %v5770_v9  ;;  %2643 = vst.msk [vmem:[#allocation3] sm:$0xf] %vm2642_vm9, %v5770_v9 }
  0x25   :  { %2646 = vst.msk [vmem:[#allocation3 + $0x8] sm:$0xf] %vm2642_vm9, %v5770_v9  ;;  %2648 = vst.msk [vmem:[#allocation3 + $0x10] sm:$0xf] %vm2642_vm9, %v5770_v9 }
  0x26   :  { %155 = vrot.lane.b32.xlu1 %v6010_v63, %s5771_s15  ;;  %153 = vrot.lane.b32.xlu0 %v6012_v0, %s5771_s15  ;;  %s5777_s15 = smov 4   ;;  %2650 = vst.msk [vmem:[#allocation3 + $0x18] sm:$0xf] %vm2642_vm9, %v5770_v9  ;;  %2652 = vst.msk [vmem:[#allocation3 + $0x20] sm:$0xf] %vm2642_vm9, %v5770_v9 }
  0x27   :  { %2654 = vst.msk [vmem:[#allocation3 + $0x28] sm:$0xf] %vm2642_vm9, %v5770_v9  ;;  %2656 = vst.msk [vmem:[#allocation3 + $0x30] sm:$0xf] %vm2642_vm9, %v5770_v9 }
  0x28   :  { %2658 = vst.msk [vmem:[#allocation3 + $0x38] sm:$0xf] %vm2642_vm9, %v5770_v9  ;;  %2660 = vst.msk [vmem:[#allocation3 + $0x40] sm:$0xf] %vm2642_vm9, %v5770_v9 }
  0x29   :  { %2662 = vst.msk [vmem:[#allocation3 + $0x48] sm:$0xf] %vm2642_vm9, %v5770_v9  ;;  %2664 = vst.msk [vmem:[#allocation3 + $0x50] sm:$0xf] %vm2642_vm9, %v5770_v9 }
  0x2a   :  { %2666 = vst.msk [vmem:[#allocation3 + $0x58] sm:$0xf] %vm2642_vm9, %v5770_v9  ;;  %2668 = vst.msk [vmem:[#allocation3 + $0x60] sm:$0xf] %vm2642_vm9, %v5770_v9 }
  0x2b   :  { %2670 = vst.msk [vmem:[#allocation3 + $0x68] sm:$0xf] %vm2642_vm9, %v5770_v9  ;;  %2672 = vst.msk [vmem:[#allocation3 + $0x70] sm:$0xf] %vm2642_vm9, %v5770_v9 }
  0x2c   :  { %2674 = vst.msk [vmem:[#allocation3 + $0x78] sm:$0xf] %vm2642_vm9, %v5770_v9  ;;  %2678 = vst.msk [vmem:[#allocation3 + $0x88] sm:$0xf] %vm2642_vm9, %v5770_v9 }
  0x2d   :  { %2680 = vst.msk [vmem:[#allocation3 + $0x90] sm:$0xf] %vm2642_vm9, %v5770_v9  ;;  %2682 = vst.msk [vmem:[#allocation3 + $0x98] sm:$0xf] %vm2642_vm9, %v5770_v9 }
  0x78   :  { %v130_v10 = vpop.permute.xlu1 %129  ;;  %v126_v11 = vpop.permute.xlu0 %125 }
  0x79   :  { %v175_v14 = vadd.f32 %v130_v10, %v5884_v15  ;;  %v173_v17 = vadd.f32 %v126_v11, %v5886_v16  ;;  %v697_v16 = vshll.u32 %v653_v18, 16  ;;  %v493_v10 = vld [vmem:[#allocation2 + $0x1c] sm:$0x1]  ;;  %v481_v11 = vld [vmem:[#allocation2 + $0xc] sm:$0x1] }
  0x7b   :  { %v191_v28 = vmul.f32 0.25, %v175_v14  ;;  %v189_v29 = vmul.f32 0.25, %v173_v17  ;;  %v6046_v61 = vrot.slane %v697_v16, 5 }
  0x7c   :  { %v132_v15 = vpop.permute.xlu1 %131  ;;  %v128_v33 = vpop.permute.xlu0 %127 }
  0x7d   :  { %v5566_v39 = vpack.c.bf16 %v191_v28, %v191_v28  ;;  %v5564_v40 = vpack.c.bf16 %v189_v29, %v189_v29  ;;  %v176_v42 = vadd.f32 %v132_v15, %v5895_v20  ;;  %v174_v44 = vadd.f32 %v128_v33, %v5897_v21 }
  0x7e   :  { %v6048_v21 = vrot.slane %v1973_v38, 5  ;;  %v700_v26 = vsel %vm6227_vm11, %v6044_v54, %v6046_v61 }
  0x7f   :  { %v328_v49 = vshrl.u32 %v5566_v39, 16  ;;  %v331_v50 = vshll.u32 %v5566_v39, 16  ;;  %v312_v53 = vshrl.u32 %v5564_v40, 16  ;;  %v192_v56 = vmul.f32 0.25, %v176_v42 }
  0x80   :  { %v190_v58 = vmul.f32 0.25, %v174_v44  ;;  %v136_v60 = vpop.permute.xlu1 %135  ;;  %v134_v20 = vpop.permute.xlu0 %133  ;;  %v315_v4 = vshll.u32 %v5564_v40, 16  ;;  %v6066_v40 = vld [vmem:[#allocation2 + $0x50] sm:$0xf] }
  0x81   :  { %v330_v1 = vrot.slane %v328_v49, 7  ;;  %v314_v3 = vrot.slane %v312_v53, 7  ;;  %v5567_v12 = vpack.c.bf16 %v192_v56, %v192_v56  ;;  %v178_v14 = vadd.f32 %v136_v60, %v5902_v25  ;;  %v496_v49 = vld [vmem:[#allocation2 + $0x20] sm:$0xf]  ;;  %v484_v53 = vld [vmem:[#allocation2 + $0x10] sm:$0xf] }
  0x82   :  { %v5565_v13 = vpack.c.bf16 %v190_v58, %v190_v58  ;;  %v177_v17 = vadd.f32 %v134_v20, %v5908_v27  ;;  %v487_v20 = vld [vmem:[#allocation2 + $0x14] sm:$0x1] }
  0x83   :  { %v333_v18 = vor.u32 %v331_v50, %v330_v1  ;;  %v334_v19 = vrot.slane %v330_v1, 4  ;;  %v317_v28 = vor.u32 %v315_v4, %v314_v3  ;;  %v318_v29 = vrot.slane %v314_v3, 4 }
  0x84   :  { %v336_v32 = vshrl.u32 %v5567_v12, 16  ;;  %v339_v15 = vshll.u32 %v5567_v12, 16  ;;  %v320_v33 = vshrl.u32 %v5565_v13, 16  ;;  %v323_v16 = vshll.u32 %v5565_v13, 16 }
  0x85   :  { %v491_v42 = vsel %vm6052_vm4, %v333_v18, %v490_v55  ;;  %v494_v25 = vsel %vm6060_vm5, %v334_v19, %v493_v10  ;;  %v476_v27 = vsel %vm6052_vm4, %v317_v28, %v475_v2  ;;  %v482_v44 = vsel %vm6060_vm5, %v318_v29, %v481_v11  ;;  %v499_v55 = vld [vmem:[#allocation2 + $0x24] sm:$0x1] }
  0x86   :  { %492 = vst [vmem:[#allocation2 + $0x18] sm:$0xf] %v491_v42  ;;  %495 = vst [vmem:[#allocation2 + $0x1c] sm:$0x1] %v494_v25  ;;  %v338_v50 = vrot.slane %v336_v32, 7  ;;  %v322_v56 = vrot.slane %v320_v33, 7 }
  0x87   :  { %477 = vst [vmem:[#allocation2 + $0x8] sm:$0xf] %v476_v27  ;;  %483 = vst [vmem:[#allocation2 + $0xc] sm:$0x1] %v482_v44  ;;  %v194_v58 = vmul.f32 0.25, %v178_v14  ;;  %v193_v60 = vmul.f32 0.25, %v177_v17 }
  0x88   :  { %v140_v38 = vpop.permute.xlu1 %139  ;;  %v138_v39 = vpop.permute.xlu0 %137  ;;  %v800_v2 = vshrl.u32 %v6066_v40, 16  ;;  %v803_v4 = vshll.u32 %v6066_v40, 16  ;;  %v341_v10 = vor.u32 %v339_v15, %v338_v50  ;;  %v342_v11 = vrot.slane %v338_v50, 4  ;;  %v508_v42 = vld [vmem:[#allocation2 + $0x30] sm:$0xf] }
  0x89   :  { %v180_v1 = vadd.f32 %v140_v38, %v5923_v36  ;;  %v179_v3 = vadd.f32 %v138_v39, %v5925_v37  ;;  %v325_v12 = vor.u32 %v323_v16, %v322_v56  ;;  %v326_v13 = vrot.slane %v322_v56, 4  ;;  %v511_v25 = vld [vmem:[#allocation2 + $0x34] sm:$0x1]  ;;  %v502_v27 = vld [vmem:[#allocation2 + $0x28] sm:$0xf] }
  0x8a   :  { %v5569_v28 = vpack.c.bf16 %v194_v58, %v194_v58  ;;  %v5568_v29 = vpack.c.bf16 %v193_v60, %v193_v60  ;;  %v497_v32 = vsel %vm6052_vm4, %v341_v10, %v496_v49  ;;  %v500_v36 = vsel %vm6060_vm5, %v342_v11, %v499_v55  ;;  %v505_v44 = vld [vmem:[#allocation2 + $0x2c] sm:$0x1] }
  0x8b   :  { %v196_v14 = vmul.f32 0.25, %v180_v1  ;;  %v195_v17 = vmul.f32 0.25, %v179_v3  ;;  %v485_v37 = vsel %vm6052_vm4, %v325_v12, %v484_v53  ;;  %v488_v15 = vsel %vm6060_vm5, %v326_v13, %v487_v20  ;;  %498 = vst [vmem:[#allocation2 + $0x20] sm:$0xf] %v497_v32  ;;  %501 = vst [vmem:[#allocation2 + $0x24] sm:$0x1] %v500_v36 }
  0x8c   :  { %v144_v18 = vpop.permute.xlu1 %143  ;;  %v142_v19 = vpop.permute.xlu0 %141  ;;  %486 = vst [vmem:[#allocation2 + $0x10] sm:$0xf] %v485_v37  ;;  %489 = vst [vmem:[#allocation2 + $0x14] sm:$0x1] %v488_v15  ;;  %v352_v33 = vshrl.u32 %v5569_v28, 16  ;;  %v355_v16 = vshll.u32 %v5569_v28, 16 }
  0x8d   :  { %v344_v38 = vshrl.u32 %v5568_v29, 16  ;;  %v347_v39 = vshll.u32 %v5568_v29, 16  ;;  %v5571_v49 = vpack.c.bf16 %v196_v14, %v196_v14  ;;  %v5570_v50 = vpack.c.bf16 %v195_v17, %v195_v17  ;;  %v520_v32 = vld [vmem:[#allocation2 + $0x40] sm:$0xf]  ;;  %v1835_v61 = vld [vmem:[#allocation2 + $0x18] sm:$0xf] }
  0x8e   :  { %v182_v56 = vadd.f32 %v144_v18, %v5970_v41  ;;  %v181_v53 = vadd.f32 %v142_v19, %v5976_v43  ;;  %v354_v55 = vrot.slane %v352_v33, 7  ;;  %v514_v18 = vld [vmem:[#allocation2 + $0x38] sm:$0xf]  ;;  %v6152_v40 = vld [vmem:[#allocation2 + $0x8] sm:$0xe] }
  0x8f   :  { %v346_v20 = vrot.slane %v344_v38, 7  ;;  %v368_v10 = vshrl.u32 %v5571_v49, 16  ;;  %v371_v11 = vshll.u32 %v5571_v49, 16  ;;  %v360_v12 = vshrl.u32 %v5570_v50, 16  ;;  %v523_v38 = vld [vmem:[#allocation2 + $0x44] sm:$0x1] }
  0x90   :  { %v148_v58 = vpop.permute.xlu1 %147  ;;  %v146_v60 = vpop.permute.xlu0 %145  ;;  %v363_v13 = vshll.u32 %v5570_v50, 16  ;;  %v357_v28 = vor.u32 %v355_v16, %v354_v55  ;;  %v358_v29 = vrot.slane %v354_v55, 4  ;;  %v198_v19 = vmul.f32 0.25, %v182_v56 }
  0x91   :  { %v184_v1 = vadd.f32 %v148_v58, %v5988_v51  ;;  %v183_v3 = vadd.f32 %v146_v60, %v5990_v52  ;;  %v349_v14 = vor.u32 %v347_v39, %v346_v20  ;;  %v350_v17 = vrot.slane %v346_v20, 4  ;;  %v517_v39 = vld [vmem:[#allocation2 + $0x3c] sm:$0x1] }
  0x92   :  { %v370_v41 = vrot.slane %v368_v10, 7  ;;  %v362_v43 = vrot.slane %v360_v12, 7  ;;  %v197_v36 = vmul.f32 0.25, %v181_v53  ;;  %v509_v51 = vsel %vm6052_vm4, %v357_v28, %v508_v42  ;;  %v5686_v42 = vld [vmem:[#allocation2 + $0x18] ss:$8 sps:$4 sm:$0xff]  }
  0x93   :  { %v512_v52 = vsel %vm6060_vm5, %v358_v29, %v511_v25  ;;  %v503_v33 = vsel %vm6052_vm4, %v349_v14, %v502_v27  ;;  %v506_v16 = vsel %vm6060_vm5, %v350_v17, %v505_v44  ;;  %510 = vst [vmem:[#allocation2 + $0x30] sm:$0xf] %v509_v51  ;;  %v5573_v58 = vpack.c.bf16 %v198_v19, %v198_v19  ;;  %v5687_v20 = vld [vmem:[#allocation2 + $0x8] ss:$8 sps:$4 sm:$0xff]   ;;  %v532_v14 = vld [vmem:[#allocation2 + $0x60] sm:$0xf] }
  0x94   :  { %v152_v37 = vpop.permute.xlu1 %151  ;;  %v150_v15 = vpop.permute.xlu0 %149  ;;  %513 = vst [vmem:[#allocation2 + $0x34] sm:$0x1] %v512_v52  ;;  %504 = vst [vmem:[#allocation2 + $0x28] sm:$0xf] %v503_v33  ;;  %v373_v49 = vor.u32 %v371_v11, %v370_v41  ;;  %v374_v50 = vrot.slane %v370_v41, 4  ;;  %v365_v56 = vor.u32 %v363_v13, %v362_v43  ;;  %v366_v53 = vrot.slane %v362_v43, 4  ;;  %1214 = vrot.lane.b32.xlu1 %v5686_v42, %s5772_s0 }
  0x95   :  { %507 = vst [vmem:[#allocation2 + $0x2c] sm:$0x1] %v506_v16  ;;  %v5572_v60 = vpack.c.bf16 %v197_v36, %v197_v36  ;;  %v200_v25 = vmul.f32 0.25, %v184_v1  ;;  %v199_v55 = vmul.f32 0.25, %v183_v3  ;;  %v384_v1 = vshrl.u32 %v5573_v58, 16  ;;  %1212 = vrot.lane.b32.xlu0 %v5687_v20, %s5772_s0 }
  0x96   :  { %v521_v27 = vsel %vm6052_vm4, %v373_v49, %v520_v32  ;;  %v524_v44 = vsel %vm6060_vm5, %v374_v50, %v523_v38  ;;  %v515_v10 = vsel %vm6052_vm4, %v365_v56, %v514_v18  ;;  %v518_v11 = vsel %vm6060_vm5, %v366_v53, %v517_v39  ;;  %v535_v17 = vld [vmem:[#allocation2 + $0x64] sm:$0x1]  ;;  %v526_v36 = vld [vmem:[#allocation2 + $0x58] sm:$0xf]  ;;  %v529_v38 = vld [vmem:[#allocation2 + $0x5c] sm:$0x1] }
  0x97   :  { %522 = vst [vmem:[#allocation2 + $0x40] sm:$0xf] %v521_v27  ;;  %525 = vst [vmem:[#allocation2 + $0x44] sm:$0x1] %v524_v44  ;;  %v387_v3 = vshll.u32 %v5573_v58, 16  ;;  %v376_v28 = vshrl.u32 %v5572_v60, 16  ;;  %v5575_v32 = vpack.c.bf16 %v200_v25, %v200_v25  ;;  %v5574_v41 = vpack.c.bf16 %v199_v55, %v199_v55 }
  0x98   :  { %v156_v12 = vpop.permute.xlu1 %155  ;;  %v154_v13 = vpop.permute.xlu0 %153  ;;  %516 = vst [vmem:[#allocation2 + $0x38] sm:$0xf] %v515_v10  ;;  %519 = vst [vmem:[#allocation2 + $0x3c] sm:$0x1] %v518_v11  ;;  %v379_v29 = vshll.u32 %v5572_v60, 16  ;;  %v186_v18 = vadd.f32 %v152_v37, %v5998_v57  ;;  %v185_v43 = vadd.f32 %v150_v15, %v6004_v59  ;;  %v386_v19 = vrot.slane %v384_v1, 7 }
  0x99   :  { %v378_v51 = vrot.slane %v376_v28, 7  ;;  %v188_v52 = vadd.f32 %v156_v12, %v6010_v63  ;;  %v187_v33 = vadd.f32 %v154_v13, %v6012_v0  ;;  %v5688_v16 = vld [vmem:[#allocation2 + $0x10] ss:$8 sps:$4 sm:$0xff]   ;;  %v400_v39 = vshrl.u32 %v5575_v32, 16  ;;  %v547_v37 = vld [vmem:[#allocation2 + $0x74] sm:$0x1] }
  0x9a   :  { %v403_v49 = vshll.u32 %v5575_v32, 16  ;;  %v392_v50 = vshrl.u32 %v5574_v41, 16  ;;  %v395_v56 = vshll.u32 %v5574_v41, 16  ;;  %v389_v53 = vor.u32 %v387_v3, %v386_v19  ;;  %v544_v57 = vld [vmem:[#allocation2 + $0x70] sm:$0xf]  ;;  %1800 = vrot.lane.b32.xlu0 %v5688_v16, %s5773_s11 }
  0x9b   :  { %v390_v42 = vrot.slane %v386_v19, 4  ;;  %v381_v58 = vor.u32 %v379_v29, %v378_v51  ;;  %v382_v60 = vrot.slane %v378_v51, 4  ;;  %v538_v59 = vld [vmem:[#allocation2 + $0x68] sm:$0xf]  ;;  %v541_v15 = vld [vmem:[#allocation2 + $0x6c] sm:$0x1] }
  0x9c   :  { %v5689_v63 = vld [vmem:[#allocation2 + $0x20] ss:$8 sps:$4 sm:$0xff]   ;;  %v402_v25 = vrot.slane %v400_v39, 7  ;;  %v394_v0 = vrot.slane %v392_v50, 7  ;;  %v202_v55 = vmul.f32 0.25, %v186_v18  ;;  %v201_v20 = vmul.f32 0.25, %v185_v43 }
  0x9d   :  { %v533_v27 = vsel %vm6052_vm4, %v389_v53, %v532_v14  ;;  %v536_v44 = vsel %vm6060_vm5, %v390_v42, %v535_v17  ;;  %v527_v10 = vsel %vm6052_vm4, %v381_v58, %v526_v36  ;;  %v530_v11 = vsel %vm6060_vm5, %v382_v60, %v529_v38  ;;  %1802 = vrot.lane.b32.xlu1 %v5689_v63, %s5773_s11  ;;  %v5690_v12 = vld [vmem:[#allocation2 + $0x28] ss:$8 sps:$4 sm:$0xff]   ;;  %v6124_v13 = vld [vmem:[#allocation2 + $0x54] sm:$0x1]  ;;  %v559_v50 = vld [vmem:[#allocation2 + $0x84] sm:$0x1] }
  0x9e   :  { %534 = vst [vmem:[#allocation2 + $0x60] sm:$0xf] %v533_v27  ;;  %537 = vst [vmem:[#allocation2 + $0x64] sm:$0x1] %v536_v44  ;;  %v405_v1 = vor.u32 %v403_v49, %v402_v25  ;;  %v406_v3 = vrot.slane %v402_v25, 4  ;;  %v397_v28 = vor.u32 %v395_v56, %v394_v0  ;;  %v398_v29 = vrot.slane %v394_v0, 4  ;;  %1216 = vrot.lane.b32.xlu0 %v5690_v12, %s5772_s0 }
  0x9f   :  { %528 = vst [vmem:[#allocation2 + $0x58] sm:$0xf] %v527_v10  ;;  %531 = vst [vmem:[#allocation2 + $0x5c] sm:$0x1] %v530_v11  ;;  %v5577_v14 = vpack.c.bf16 %v202_v55, %v202_v55  ;;  %v5576_v17 = vpack.c.bf16 %v201_v20, %v201_v20  ;;  %v204_v32 = vmul.f32 0.25, %v188_v52  ;;  %v203_v41 = vmul.f32 0.25, %v187_v33 }
  0xa0   :  { %v5691_v18 = vld [vmem:[#allocation2 + $0x38] ss:$8 sps:$4 sm:$0xff]   ;;  %v545_v43 = vsel %vm6052_vm4, %v405_v1, %v544_v57  ;;  %v548_v19 = vsel %vm6060_vm5, %v406_v3, %v547_v37  ;;  %v539_v36 = vsel %vm6052_vm4, %v397_v28, %v538_v59  ;;  %v542_v51 = vsel %vm6060_vm5, %v398_v29, %v541_v15  ;;  %v553_v53 = vld [vmem:[#allocation2 + $0x7c] sm:$0x1]  ;;  %v568_v10 = vld [vmem:[#allocation2 + $0x90] sm:$0xf] }
  0xa1   :  { %546 = vst [vmem:[#allocation2 + $0x70] sm:$0xf] %v545_v43  ;;  %549 = vst [vmem:[#allocation2 + $0x74] sm:$0x1] %v548_v19  ;;  %v416_v52 = vshrl.u32 %v5577_v14, 16  ;;  %v419_v33 = vshll.u32 %v5577_v14, 16  ;;  %1218 = vrot.lane.b32.xlu1 %v5691_v18, %s5772_s0  ;;  %v5579_v42 = vpack.c.bf16 %v204_v32, %v204_v32  ;;  %v5578_v58 = vpack.c.bf16 %v203_v41, %v203_v41 }
  0xa2   :  { %540 = vst [vmem:[#allocation2 + $0x68] sm:$0xf] %v539_v36  ;;  %543 = vst [vmem:[#allocation2 + $0x6c] sm:$0x1] %v542_v51  ;;  %v408_v16 = vshrl.u32 %v5576_v17, 16  ;;  %v411_v38 = vshll.u32 %v5576_v17, 16 }
  0xa3   :  { %v5692_v39 = vld [vmem:[#allocation2 + $0x30] ss:$8 sps:$4 sm:$0xff]   ;;  %v556_v49 = vld [vmem:[#allocation2 + $0x80] sm:$0xf]  ;;  %v6139_v60 = vrot.slane %v1970_v7, 4  ;;  %v809_v57 = vshll.u32 %v6124_v13, 16 }
  0xa4   :  { %v550_v56 = vld [vmem:[#allocation2 + $0x78] sm:$0xf]  ;;  %v418_v37 = vrot.slane %v416_v52, 7  ;;  %v410_v59 = vrot.slane %v408_v16, 7  ;;  %1804 = vrot.lane.b32.xlu0 %v5692_v39, %s5773_s11  ;;  %v5693_v15 = vld [vmem:[#allocation2 + $0x40] ss:$8 sps:$4 sm:$0xff]  }
  0xa5   :  { %v6145_v63 = vrot.slane %v800_v2, 4  ;;  %v6149_v25 = vrot.slane %v803_v4, 5  ;;  %v432_v34 = vshrl.u32 %v5579_v42, 16  ;;  %v435_v35 = vshll.u32 %v5579_v42, 16  ;;  %v571_v11 = vld [vmem:[#allocation2 + $0x94] sm:$0x1]  ;;  %1806 = vrot.lane.b32.xlu1 %v5693_v15, %s5773_s11 }
  0xa6   :  { %v424_v7 = vshrl.u32 %v5578_v58, 16  ;;  %v427_v0 = vshll.u32 %v5578_v58, 16  ;;  %v421_v55 = vor.u32 %v419_v33, %v418_v37  ;;  %v422_v20 = vrot.slane %v418_v37, 4  ;;  %v562_v12 = vld [vmem:[#allocation2 + $0x88] sm:$0xf] }
  0xa7   :  { %v413_v27 = vor.u32 %v411_v38, %v410_v59  ;;  %v414_v44 = vrot.slane %v410_v59, 4  ;;  %v565_v1 = vld [vmem:[#allocation2 + $0x8c] sm:$0x1]  ;;  %v434_v2 = vrot.slane %v432_v34, 7  ;;  %v5694_v28 = vld [vmem:[#allocation2 + $0x58] ss:$8 sps:$4 sm:$0xff]   ;;  %v1976_v47 = vsel %vm6227_vm11, %v6139_v60, %v6048_v21 }
  0xa8   :  { %v426_v3 = vrot.slane %v424_v7, 7  ;;  %v6154_v4 = vld [vmem:[#allocation2 + $0xc] sm:$0x1]  ;;  %v557_v29 = vsel %vm6052_vm4, %v421_v55, %v556_v49  ;;  %v560_v14 = vsel %vm6060_vm5, %v422_v20, %v559_v50  ;;  %v6164_v41 = vld [vmem:[#allocation2 + $0x10] sm:$0xe]  ;;  %1220 = vrot.lane.b32.xlu0 %v5694_v28, %s5772_s0  ;;  %v5301_v7 = vrot.slane %v6152_v40, 9 }
  0xa9   :  { %v551_v17 = vsel %vm6052_vm4, %v413_v27, %v550_v56  ;;  %v554_v32 = vsel %vm6060_vm5, %v414_v44, %v553_v53  ;;  %v6166_v18 = vld [vmem:[#allocation2 + $0x14] sm:$0x1]  ;;  %v6168_v43 = vld [vmem:[#allocation2 + $0x18] sm:$0xe]  ;;  %v6170_v19 = vld [vmem:[#allocation2 + $0x1c] sm:$0x1]  ;;  %v437_v51 = vor.u32 %v435_v35, %v434_v2  ;;  %v806_v48 = vor.u32 %v6149_v25, %v6145_v63 }
  0xaa   :  { %v6172_v36 = vld [vmem:[#allocation2 + $0x8] sm:$0xe]  ;;  %558 = vst [vmem:[#allocation2 + $0x80] sm:$0xf] %v557_v29  ;;  %561 = vst [vmem:[#allocation2 + $0x84] sm:$0x1] %v560_v14  ;;  %v429_v33 = vor.u32 %v427_v0, %v426_v3 }
  0xab   :  { %552 = vst [vmem:[#allocation2 + $0x78] sm:$0xf] %v551_v17  ;;  %555 = vst [vmem:[#allocation2 + $0x7c] sm:$0x1] %v554_v32  ;;  %v438_v52 = vrot.slane %v434_v2, 4  ;;  %v430_v16 = vrot.slane %v426_v3, 4  ;;  %v569_v58 = vsel %vm6052_vm4, %v437_v51, %v568_v10 }
  0xac   :  { %v6175_v38 = vld [vmem:[#allocation2 + $0xc] sm:$0x1]  ;;  %v6177_v39 = vld [vmem:[#allocation2 + $0x10] sm:$0xe]  ;;  %v6179_v49 = vld [vmem:[#allocation2 + $0x14] sm:$0x1]  ;;  %v563_v59 = vsel %vm6052_vm4, %v429_v33, %v562_v12 }
  0xad   :  { %v6181_v50 = vld [vmem:[#allocation2 + $0x18] sm:$0xe]  ;;  %v5695_v56 = vld [vmem:[#allocation2 + $0x68] ss:$8 sps:$4 sm:$0xff]   ;;  %v6183_v53 = vld [vmem:[#allocation2 + $0x1c] sm:$0x1]  ;;  %v572_v37 = vsel %vm6060_vm5, %v438_v52, %v571_v11  ;;  %v566_v15 = vsel %vm6060_vm5, %v430_v16, %v565_v1 }
  0xae   :  { %v6185_v42 = vld [vmem:[#allocation2 + $0x20] sm:$0xe]  ;;  %v6195_v35 = vld [vmem:[#allocation2 + $0x24] sm:$0x1]  ;;  %570 = vst [vmem:[#allocation2 + $0x90] sm:$0xf] %v569_v58  ;;  %1222 = vrot.lane.b32.xlu1 %v5695_v56, %s5772_s0 }
  0xaf   :  { %v5696_v34 = vld [vmem:[#allocation2 + $0x60] ss:$8 sps:$4 sm:$0xff]   ;;  %573 = vst [vmem:[#allocation2 + $0x94] sm:$0x1] %v572_v37  ;;  %564 = vst [vmem:[#allocation2 + $0x88] sm:$0xf] %v563_v59 }
  0xb0   :  { %567 = vst [vmem:[#allocation2 + $0x8c] sm:$0x1] %v566_v15  ;;  %v1041_v0 = vrot.slane %v6154_v4, 5  ;;  %v5302_v55 = vrot.slane %v6164_v41, 9  ;;  %v2146_v62 = vld [vmem:[#allocation2 + $0x10] sm:$0xe]  ;;  %1808 = vrot.lane.b32.xlu0 %v5696_v34, %s5773_s11 }
  0xb1   :  { %v6203_v8 = vrot.slane %v809_v57, 5  ;;  %v1045_v27 = vrot.slane %v6166_v18, 5  ;;  %v5303_v44 = vrot.slane %v6168_v43, 9  ;;  %v1049_v10 = vrot.slane %v6170_v19, 5  ;;  %v2147_v12 = vld [vmem:[#allocation2 + $0x14] sm:$0x1] }
  0xb2   :  { %v5340_v11 = vrot.slane %v6172_v36, 9  ;;  %v1624_v13 = vrot.slane %v6175_v38, 5  ;;  %v5341_v57 = vrot.slane %v6177_v39, 9  ;;  %v1628_v1 = vrot.slane %v6179_v49, 5  ;;  %v2148_v3 = vld [vmem:[#allocation2 + $0x18] sm:$0xe] }
  0xb3   :  { %v5342_v2 = vrot.slane %v6181_v50, 9  ;;  %v1632_v28 = vrot.slane %v6183_v53, 5  ;;  %v5343_v40 = vrot.slane %v6185_v42, 9  ;;  %v1636_v4 = vrot.slane %v6195_v35, 5  ;;  %v2149_v29 = vld [vmem:[#allocation2 + $0x1c] sm:$0x1] }
  0xb4   :  { %v5380_v14 = vrot.slane %v2146_v62, 9  ;;  %v6223_v17 = vld [vmem:[#allocation2 + $0x30] sm:$0xe]  ;;  %v6237_v18 = vsel %vm6208_vm10, %v5300_v22, %v1037_v23  ;;  %v6241_v43 = vsel %vm6208_vm10, %v5301_v7, %v1041_v0  ;;  %v6243_v19 = vld [vmem:[#allocation2 + $0x34] sm:$0x1]  ;;  %v2212_v6 = vrot.slane %v2147_v12, 5 }
  0xb5   :  { %v5697_v41 = vld [vmem:[#allocation2 + $0x70] ss:$8 sps:$4 sm:$0xff]   ;;  %v983_v52 = vld [vmem:[#allocation2 + $0x3c] sm:$0x1]  ;;  %v6245_v33 = vld [vmem:[#allocation2 + $0x20] sm:$0xe]  ;;  %v5316_v46 = vcombine.low %v6237_v18, %v6241_v43  ;;  %v6277_v31 = vsel %vm6208_vm10, %v5302_v55, %v1045_v27  ;;  %v1050_v50 = vsel %vm6208_vm10, %v5303_v44, %v1049_v10  ;;  %v6289_v56 = vsel %vm6208_vm10, %v5341_v57, %v1628_v1 }
  0xb6   :  { %v982_v36 = vld [vmem:[#allocation2 + $0x38] sm:$0xe]  ;;  %v2152_v16 = vld [vmem:[#allocation2 + $0x28] sm:$0xe]  ;;  %1810 = vrot.lane.b32.xlu1 %v5697_v41, %s5773_s11  ;;  %v5381_v22 = vrot.slane %v2148_v3, 9  ;;  %v2216_v53 = vrot.slane %v2149_v29, 5  ;;  %v6294_v37 = vsel %vm6208_vm10, %v5343_v40, %v1636_v4  ;;  %v6298_v59 = vsel %vm6208_vm10, %v5380_v14, %v2212_v6 }
  0xb7   :  { %v5698_v51 = vld [vmem:[#allocation2 + $0x78] ss:$8 sps:$4 sm:$0xff]   ;;  %v6256_v23 = vld [vmem:[#allocation2 + $0x24] sm:$0x1]  ;;  %v2153_v38 = vld [vmem:[#allocation2 + $0x2c] sm:$0x1]  ;;  %v5317_v44 = vcombine.low %v6277_v31, %v1050_v50  ;;  %v1625_v10 = vsel %vm6208_vm10, %v5340_v11, %v1624_v13  ;;  %v6311_v40 = vsel %vm6208_vm10, %v5342_v2, %v1632_v28 }
  0xb8   :  { %v6258_v39 = vld [vmem:[#allocation2 + $0x38] sm:$0xe]  ;;  %1224 = vrot.lane.b32.xlu0 %v5698_v51, %s5772_s0  ;;  %v5699_v45 = vld [vmem:[#allocation2 + $0x88] ss:$8 sps:$4 sm:$0xff]   ;;  %v1571_v30 = vld [vmem:[#allocation2 + $0x3c] sm:$0x1]  ;;  %v6315_v4 = vsel %vm6208_vm10, %v5381_v22, %v2216_v53  ;;  %v5356_v11 = vcombine.low %v1625_v10, %v6289_v56  ;;  %v5357_v13 = vcombine.low %v6311_v40, %v6294_v37 }
  0xb9   :  { %v1572_v49 = vld [vmem:[#allocation2 + $0x40] sm:$0xe]  ;;  %v5306_v42 = vrot.slane %v6223_v17, 9  ;;  %v1061_v15 = vrot.slane %v6243_v19, 5  ;;  %v5307_v34 = vrot.slane %v982_v36, 9  ;;  %v1065_v0 = vrot.slane %v983_v52, 5 }
  0xba   :  { %v5700_v58 = vld [vmem:[#allocation2 + $0x80] ss:$8 sps:$4 sm:$0xff]   ;;  %v1573_v35 = vld [vmem:[#allocation2 + $0x44] sm:$0x1]  ;;  %1226 = vrot.lane.b32.xlu1 %v5699_v45, %s5772_s0  ;;  %v5701_v7 = vld [vmem:[#allocation2 + $0x90] ss:$8 sps:$4 sm:$0xff]   ;;  %v5396_v18 = vcombine.low %v6298_v59, %v6315_v4 }
  0xbb   :  { %v5382_v55 = vrot.slane %v6245_v33, 9  ;;  %v5383_v62 = vrot.slane %v2152_v16, 9  ;;  %v2224_v27 = vrot.slane %v2153_v38, 5  ;;  %v2220_v12 = vrot.slane %v6256_v23, 5  ;;  %v976_v1 = vld [vmem:[#allocation2 + $0x20] sm:$0xe] }
  0xbc   :  { %1812 = vrot.lane.b32.xlu0 %v5700_v58, %s5773_s11  ;;  %v5346_v57 = vrot.slane %v6258_v39, 9  ;;  %v977_v3 = vld [vmem:[#allocation2 + $0x24] sm:$0x1]  ;;  %v1648_v29 = vrot.slane %v1571_v30, 5  ;;  %v5347_v14 = vrot.slane %v1572_v49, 9  ;;  %v1652_v43 = vrot.slane %v1573_v35, 5 }
  0xbd   :  { %v978_v17 = vld [vmem:[#allocation2 + $0x28] sm:$0xe]  ;;  %v979_v41 = vld [vmem:[#allocation2 + $0x2c] sm:$0x1]  ;;  %v988_v19 = vld [vmem:[#allocation2 + $0x60] sm:$0xe]  ;;  %v6325_v28 = vsel %vm6208_vm10, %v5307_v34, %v1065_v0  ;;  %v6329_v36 = vsel %vm6208_vm10, %v5383_v62, %v2224_v27  ;;  %v6334_v45 = vsel %vm6208_vm10, %v5306_v42, %v1061_v15  ;;  %v6338_v31 = vsel %vm6208_vm10, %v5382_v55, %v2220_v12 }
  0xbe   :  { %v990_v2 = vld [vmem:[#allocation2 + $0x68] sm:$0xe]  ;;  %1814 = vrot.lane.b32.xlu1 %v5701_v7, %s5773_s11  ;;  %v5304_v51 = vrot.slane %v976_v1, 9  ;;  %v1053_v52 = vrot.slane %v977_v3, 5  ;;  %v989_v33 = vld [vmem:[#allocation2 + $0x64] sm:$0x1]  ;;  %v6342_v30 = vsel %vm6208_vm10, %v5346_v57, %v1648_v29  ;;  %v5319_v53 = vcombine.low %v6334_v45, %v6325_v28 }
  0xbf   :  { %v991_v16 = vld [vmem:[#allocation2 + $0x6c] sm:$0x1]  ;;  %v5305_v6 = vrot.slane %v978_v17, 9  ;;  %v1057_v22 = vrot.slane %v979_v41, 5  ;;  %v5311_v23 = vrot.slane %v990_v2, 9  ;;  %v5397_v42 = vcombine.low %v6338_v31, %v6329_v36 }
  0xc0   :  { %1123 = vrot.lane.b32.xlu0 %v5316_v46, %s5774_s12  ;;  %v1081_v38 = vrot.slane %v991_v16, 5  ;;  %v1566_v39 = vld [vmem:[#allocation2 + $0x28] sm:$0xe]  ;;  %v6346_v46 = vsel %vm6208_vm10, %v5347_v14, %v1652_v43  ;;  %v1567_v49 = vld [vmem:[#allocation2 + $0x2c] sm:$0x1]  ;;  %v5310_v58 = vrot.slane %v988_v19, 9  ;;  %v6371_v41 = vsel %vm6208_vm10, %v5304_v51, %v1053_v52 }
  0xc1   :  { %v1568_v50 = vld [vmem:[#allocation2 + $0x30] sm:$0xe]  ;;  %v1569_v56 = vld [vmem:[#allocation2 + $0x34] sm:$0x1]  ;;  %v1077_v37 = vrot.slane %v989_v33, 5  ;;  %v5344_v35 = vrot.slane %v1566_v39, 9  ;;  %v5359_v27 = vcombine.low %v6342_v30, %v6346_v46  ;;  %v6358_v3 = vsel %vm6208_vm10, %v5305_v6, %v1057_v22 }
  0xc2   :  { %v1578_v15 = vld [vmem:[#allocation2 + $0x68] sm:$0xe]  ;;  %v1579_v34 = vld [vmem:[#allocation2 + $0x6c] sm:$0x1]  ;;  %1125 = vrot.lane.b32.xlu1 %v5317_v44, %s5774_s12  ;;  %v1640_v7 = vrot.slane %v1567_v49, 5  ;;  %v5345_v0 = vrot.slane %v1568_v50, 9  ;;  %v6362_v44 = vsel %vm6208_vm10, %v5311_v23, %v1081_v38 }
  0xc3   :  { %v1644_v55 = vrot.slane %v1569_v56, 5  ;;  %v1580_v62 = vld [vmem:[#allocation2 + $0x70] sm:$0xe]  ;;  %v1581_v10 = vld [vmem:[#allocation2 + $0x74] sm:$0x1]  ;;  %v5350_v12 = vrot.slane %v1578_v15, 9 }
  0xc4   :  { %1710 = vrot.lane.b32.xlu0 %v5356_v11, %s5775_s13  ;;  %v1664_v57 = vrot.slane %v1579_v34, 5  ;;  %v5351_v1 = vrot.slane %v1580_v62, 9  ;;  %v1668_v40 = vrot.slane %v1581_v10, 5  ;;  %v2154_v29 = vld [vmem:[#allocation2 + $0x30] sm:$0xe]  ;;  %v6367_v17 = vrot.slane %v806_v48, 4 }
  0xc5   :  { %v2155_v14 = vld [vmem:[#allocation2 + $0x34] sm:$0x1]  ;;  %v6375_v11 = vsel %vm6208_vm10, %v5310_v58, %v1077_v37  ;;  %v2156_v43 = vld [vmem:[#allocation2 + $0x38] sm:$0xe]  ;;  %v2157_v19 = vld [vmem:[#allocation2 + $0x3c] sm:$0x1]  ;;  %v6380_v33 = vsel %vm6208_vm10, %v5344_v35, %v1640_v7  ;;  %v6384_v63 = vsel %vm6208_vm10, %v5345_v0, %v1644_v55 }
  0xc6   :  { %v5384_v2 = vrot.slane %v2154_v29, 9  ;;  %v2228_v28 = vrot.slane %v2155_v14, 5  ;;  %1712 = vrot.lane.b32.xlu1 %v5357_v13, %s5775_s13  ;;  %v5385_v25 = vrot.slane %v2156_v43, 9  ;;  %v2232_v48 = vrot.slane %v2157_v19, 5  ;;  %v996_v51 = vld [vmem:[#allocation2 + $0x80] sm:$0xe] }
  0xc7   :  { %v997_v52 = vld [vmem:[#allocation2 + $0x84] sm:$0x1]  ;;  %v5318_v13 = vcombine.low %v6371_v41, %v6358_v3  ;;  %v5321_v16 = vcombine.low %v6375_v11, %v6362_v44  ;;  %v998_v6 = vld [vmem:[#allocation2 + $0x88] sm:$0xe]  ;;  %v999_v22 = vld [vmem:[#allocation2 + $0x8c] sm:$0x1]  ;;  %v6396_v39 = vsel %vm6208_vm10, %v5350_v12, %v1664_v57  ;;  %v6400_v45 = vsel %vm6208_vm10, %v5351_v1, %v1668_v40 }
  0xc8   :  { %2298 = vrot.lane.b32.xlu0 %v5396_v18, %s5776_s14  ;;  %v5314_v23 = vrot.slane %v996_v51, 9  ;;  %v1093_v38 = vrot.slane %v997_v52, 5  ;;  %v5315_v59 = vrot.slane %v998_v6, 9  ;;  %v1097_v4 = vrot.slane %v999_v22, 5  ;;  %v2158_v18 = vld [vmem:[#allocation2 + $0x40] sm:$0xe] }
  0xc9   :  { %v2159_v49 = vld [vmem:[#allocation2 + $0x44] sm:$0x1]  ;;  %v5358_v50 = vcombine.low %v6380_v33, %v6384_v63  ;;  %v5386_v56 = vrot.slane %v2158_v18, 9  ;;  %v1586_v37 = vld [vmem:[#allocation2 + $0x88] sm:$0xe]  ;;  %v812_v34 = vsel %vm6227_vm11, %v6367_v17, %v6203_v8  ;;  %v6411_v35 = vsel %vm6208_vm10, %v5385_v25, %v2232_v48 }
  0xca   :  { %v2236_v58 = vrot.slane %v2159_v49, 5  ;;  %v1587_v15 = vld [vmem:[#allocation2 + $0x8c] sm:$0x1]  ;;  %1129 = vrot.lane.b32.xlu1 %v5319_v53, %s5774_s12  ;;  %v6415_v7 = vsel %vm6208_vm10, %v5315_v59, %v1097_v4  ;;  %v1588_v0 = vld [vmem:[#allocation2 + $0x90] sm:$0xe]  ;;  %v5354_v62 = vrot.slane %v1586_v37, 9  ;;  %v5361_v53 = vcombine.low %v6396_v39, %v6400_v45 }
  0xcb   :  { %v1589_v55 = vld [vmem:[#allocation2 + $0x94] sm:$0x1]  ;;  %v1680_v10 = vrot.slane %v1587_v15, 5  ;;  %v5355_v57 = vrot.slane %v1588_v0, 9  ;;  %v986_v3 = vld [vmem:[#allocation2 + $0x58] sm:$0xe]  ;;  %v6429_v29 = vsel %vm6208_vm10, %v5384_v2, %v2228_v28  ;;  %v6433_v14 = vsel %vm6208_vm10, %v5314_v23, %v1093_v38 }
  0xcc   :  { %2300 = vrot.lane.b32.xlu0 %v5397_v42, %s5776_s14  ;;  %v6425_v12 = vsel %vm6208_vm10, %v5386_v56, %v2236_v58  ;;  %v1684_v1 = vrot.slane %v1589_v55, 5  ;;  %v987_v40 = vld [vmem:[#allocation2 + $0x5c] sm:$0x1]  ;;  %v5309_v36 = vrot.slane %v986_v3, 9  ;;  %v656_v42 = vld [vmem:[#allocation2 + $0x10] sm:$0xf]  ;;  %v5398_v43 = vcombine.low %v6429_v29, %v6411_v35 }
  0xcd   :  { %v1073_v31 = vrot.slane %v987_v40, 5  ;;  %v657_v41 = vld [vmem:[#allocation2 + $0x14] sm:$0x1]  ;;  %v5323_v19 = vcombine.low %v6433_v14, %v6415_v7  ;;  %v658_v33 = vld [vmem:[#allocation2 + $0x18] sm:$0xf]  ;;  %v716_v25 = vshrl.u32 %v656_v42, 16  ;;  %v5399_v2 = vcombine.low %v6425_v12, %v6253_v5 }
  0xce   :  { %v659_v63 = vld [vmem:[#allocation2 + $0x1c] sm:$0x1]  ;;  %v719_v48 = vshll.u32 %v656_v42, 16  ;;  %1716 = vrot.lane.b32.xlu1 %v5359_v27, %s5775_s13  ;;  %v6447_v28 = vsel %vm6208_vm10, %v5354_v62, %v1680_v10  ;;  %v725_v51 = vshll.u32 %v657_v41, 16  ;;  %v730_v52 = vshrl.u32 %v658_v33, 16  ;;  %v5709_v8 = vld [vmem:[%s8192_s1 + $0x8] sm:$0xff]  }
  0xcf   :  { %v1574_v6 = vld [vmem:[#allocation2 + $0x58] sm:$0xe]  ;;  %v1575_v22 = vld [vmem:[#allocation2 + $0x5c] sm:$0x1]  ;;  %v6452_v23 = vsel %vm6208_vm10, %v5355_v57, %v1684_v1  ;;  %v718_v38 = vrot.slane %v716_v25, 4  ;;  %v733_v46 = vshll.u32 %v658_v33, 16  ;;  %v6462_v55 = vsel %vm6208_vm10, %v5309_v36, %v1073_v31 }
  0xd0   :  { %1127 = vrot.lane.b32.xlu0 %v5318_v13, %s5774_s12  ;;  %v721_v30 = vrot.slane %v719_v48, 5  ;;  %v1576_v27 = vld [vmem:[#allocation2 + $0x60] sm:$0xe]  ;;  %v727_v59 = vrot.slane %v725_v51, 5  ;;  %v732_v4 = vrot.slane %v730_v52, 4  ;;  %v739_v18 = vshll.u32 %v659_v63, 16 }
  0xd1   :  { %v1577_v49 = vld [vmem:[#allocation2 + $0x64] sm:$0x1]  ;;  %v5348_v56 = vrot.slane %v1574_v6, 9  ;;  %v735_v37 = vrot.slane %v733_v46, 5  ;;  %v1656_v15 = vrot.slane %v1575_v22, 5  ;;  %v5349_v35 = vrot.slane %v1576_v27, 9 }
  0xd2   :  { %v722_v58 = vor.u32 %v721_v30, %v718_v38  ;;  %v1249_v0 = vld [vmem:[#allocation2 + $0x18] sm:$0xf]  ;;  %1133 = vrot.lane.b32.xlu1 %v5321_v16, %s5774_s12  ;;  %v5363_v13 = vcombine.low %v6447_v28, %v6452_v23  ;;  %v741_v62 = vrot.slane %v739_v18, 5  ;;  %v1660_v10 = vrot.slane %v1577_v49, 5  ;;  %v1250_v57 = vld [vmem:[#allocation2 + $0x1c] sm:$0x1] }
  0xd3   :  { %v1251_v1 = vld [vmem:[#allocation2 + $0x20] sm:$0xf]  ;;  %v736_v40 = vor.u32 %v735_v37, %v732_v4  ;;  %v6467_v29 = vsel %vm6208_vm10, %v5348_v56, %v1656_v15  ;;  %v1252_v44 = vld [vmem:[#allocation2 + $0x24] sm:$0x1]  ;;  %v1306_v11 = vshrl.u32 %v1249_v0, 16  ;;  %v1309_v36 = vshll.u32 %v1249_v0, 16 }
  0xd4   :  { %1714 = vrot.lane.b32.xlu0 %v5358_v50, %s5775_s13  ;;  %v723_v3 = vrot.slane %v722_v58, 4  ;;  %v2162_v16 = vld [vmem:[#allocation2 + $0x60] sm:$0xe]  ;;  %v6471_v42 = vsel %vm6208_vm10, %v5349_v35, %v1660_v10  ;;  %v1315_v31 = vshll.u32 %v1250_v57, 16  ;;  %v1320_v41 = vshrl.u32 %v1251_v1, 16 }
  0xd5   :  { %v2163_v33 = vld [vmem:[#allocation2 + $0x64] sm:$0x1]  ;;  %v5320_v50 = vcombine.low %v6266_v24, %v6462_v55  ;;  %v737_v25 = vrot.slane %v736_v40, 4  ;;  %v1308_v48 = vrot.slane %v1306_v11, 4  ;;  %v2164_v51 = vld [vmem:[#allocation2 + $0x68] sm:$0xe]  ;;  %v5360_v6 = vcombine.low %v6467_v29, %v6471_v42 }
  0xd6   :  { %v728_v63 = vsel %vm6227_vm11, %v723_v3, %v727_v59  ;;  %v2165_v52 = vld [vmem:[#allocation2 + $0x6c] sm:$0x1]  ;;  %1720 = vrot.lane.b32.xlu1 %v5361_v53, %s5775_s13  ;;  %v1311_v22 = vrot.slane %v1309_v36, 5  ;;  %v1322_v38 = vrot.slane %v1320_v41, 4  ;;  %v1323_v30 = vshll.u32 %v1251_v1, 16 }
  0xd7   :  { %v1837_v46 = vld [vmem:[#allocation2 + $0x20] sm:$0xf]  ;;  %v742_v24 = vsel %vm6227_vm11, %v737_v25, %v741_v62  ;;  %v1317_v27 = vrot.slane %v1315_v31, 5  ;;  %v1329_v59 = vshll.u32 %v1252_v44, 16  ;;  %v5388_v4 = vrot.slane %v2162_v16, 9 }
  0xd8   :  { %2302 = vrot.lane.b32.xlu0 %v5398_v43, %s5776_s14  ;;  %v1838_v18 = vld [vmem:[#allocation2 + $0x24] sm:$0x1]  ;;  %v1312_v49 = vor.u32 %v1311_v22, %v1308_v48  ;;  %v1325_v56 = vrot.slane %v1323_v30, 5  ;;  %v2244_v39 = vrot.slane %v2163_v33, 5  ;;  %v5389_v45 = vrot.slane %v2164_v51, 9 }
  0xd9   :  { %v1839_v53 = vld [vmem:[#allocation2 + $0x28] sm:$0xf]  ;;  %v5293_v58 = vcombine.low %v728_v63, %v742_v24  ;;  %v1331_v37 = vrot.slane %v1329_v59, 5  ;;  %v2248_v15 = vrot.slane %v2165_v52, 5  ;;  %v1840_v35 = vld [vmem:[#allocation2 + $0x2c] sm:$0x1] }
  0xda   :  { %v1894_v0 = vshrl.u32 %v1837_v46, 16  ;;  %1137 = vrot.lane.b32.xlu1 %v5323_v19, %s5774_s12  ;;  %v1313_v43 = vrot.slane %v1312_v49, 4  ;;  %v1326_v55 = vor.u32 %v1325_v56, %v1322_v38  ;;  %v1897_v62 = vshll.u32 %v1837_v46, 16  ;;  %v2166_v57 = vld [vmem:[#allocation2 + $0x70] sm:$0xe] }
  0xdb   :  { %v1903_v10 = vshll.u32 %v1838_v18, 16  ;;  %v6496_v1 = vsel %vm6208_vm10, %v5389_v45, %v2248_v15  ;;  %v1908_v40 = vshrl.u32 %v1839_v53, 16  ;;  %v1911_v44 = vshll.u32 %v1839_v53, 16  ;;  %v2167_v11 = vld [vmem:[#allocation2 + $0x74] sm:$0x1] }
  0xdc   :  { %2304 = vrot.lane.b32.xlu0 %v5399_v2, %s5776_s14  ;;  %v1896_v3 = vrot.slane %v1894_v0, 4  ;;  %v1318_v7 = vsel %vm6227_vm11, %v1313_v43, %v1317_v27  ;;  %v1327_v14 = vrot.slane %v1326_v55, 4  ;;  %v6502_v19 = vsel %vm6208_vm10, %v5388_v4, %v2244_v39  ;;  %v2168_v36 = vld [vmem:[#allocation2 + $0x78] sm:$0xe]  ;;  %v2169_v5 = vld [vmem:[#allocation2 + $0x7c] sm:$0x1] }
  0xdd   :  { %v1899_v16 = vrot.slane %v1897_v62, 5  ;;  %v5400_v12 = vcombine.low %v6502_v19, %v6496_v1  ;;  %v1910_v2 = vrot.slane %v1908_v40, 4  ;;  %v1913_v31 = vrot.slane %v1911_v44, 5  ;;  %v660_v33 = vld [vmem:[#allocation2 + $0x20] sm:$0xf] }
  0xde   :  { %v1917_v41 = vshll.u32 %v1840_v35, 16  ;;  %1724 = vrot.lane.b32.xlu1 %v5363_v13, %s5775_s13  ;;  %v1332_v63 = vsel %vm6227_vm11, %v1327_v14, %v1331_v37  ;;  %v5390_v48 = vrot.slane %v2166_v57, 9  ;;  %v2252_v51 = vrot.slane %v2167_v11, 5  ;;  %v661_v52 = vld [vmem:[#allocation2 + $0x24] sm:$0x1] }
  0xdf   :  { %v1900_v25 = vor.u32 %v1899_v16, %v1896_v3  ;;  %v662_v22 = vld [vmem:[#allocation2 + $0x28] sm:$0xf]  ;;  %v5333_v38 = vcombine.low %v1318_v7, %v1332_v63  ;;  %v1905_v30 = vrot.slane %v1903_v10, 5  ;;  %v1914_v46 = vor.u32 %v1913_v31, %v1910_v2  ;;  %v663_v18 = vld [vmem:[#allocation2 + $0x2c] sm:$0x1] }
  0xe0   :  { %1131 = vrot.lane.b32.xlu0 %v5320_v50, %s5774_s12  ;;  %v5391_v24 = vrot.slane %v2168_v36, 9  ;;  %v1919_v59 = vrot.slane %v1917_v41, 5  ;;  %v2256_v4 = vrot.slane %v2169_v5, 5  ;;  %v744_v28 = vshrl.u32 %v660_v33, 16  ;;  %v992_v39 = vld [vmem:[#allocation2 + $0x70] sm:$0xe] }
  0xe1   :  { %v1901_v27 = vrot.slane %v1900_v25, 4  ;;  %v1915_v23 = vrot.slane %v1914_v46, 4  ;;  %v747_v13 = vshll.u32 %v660_v33, 16  ;;  %v753_v49 = vshll.u32 %v661_v52, 16  ;;  %v993_v15 = vld [vmem:[#allocation2 + $0x74] sm:$0x1] }
  0xe2   :  { %v758_v56 = vshrl.u32 %v662_v22, 16  ;;  %937 = vrot.lane.b32.xlu1 %v5293_v58, %s5777_s15  ;;  %v2253_v45 = vsel %vm6208_vm10, %v5390_v48, %v2252_v51  ;;  %v746_v53 = vrot.slane %v744_v28, 4  ;;  %v761_v37 = vshll.u32 %v662_v22, 16  ;;  %v994_v35 = vld [vmem:[#allocation2 + $0x78] sm:$0xe] }
  0xe3   :  { %v1906_v50 = vsel %vm6227_vm11, %v1901_v27, %v1905_v30  ;;  %v1920_v0 = vsel %vm6227_vm11, %v1915_v23, %v1919_v59  ;;  %v2257_v58 = vsel %vm6208_vm10, %v5391_v24, %v2256_v4  ;;  %v749_v43 = vrot.slane %v747_v13, 5  ;;  %v995_v62 = vld [vmem:[#allocation2 + $0x7c] sm:$0x1]  ;;  %v664_v10 = vld [vmem:[#allocation2 + $0x30] sm:$0xf] }
  0xe4   :  { %1718 = vrot.lane.b32.xlu0 %v5360_v6, %s5775_s13  ;;  %v755_v55 = vrot.slane %v753_v49, 5  ;;  %v5373_v57 = vcombine.low %v1906_v50, %v1920_v0  ;;  %v760_v1 = vrot.slane %v758_v56, 4  ;;  %v763_v3 = vrot.slane %v761_v37, 5  ;;  %v665_v44 = vld [vmem:[#allocation2 + $0x34] sm:$0x1] }
  0xe5   :  { %v767_v40 = vshll.u32 %v663_v18, 16  ;;  %v750_v11 = vor.u32 %v749_v43, %v746_v53  ;;  %v5312_v7 = vrot.slane %v992_v39, 9  ;;  %v1085_v14 = vrot.slane %v993_v15, 5  ;;  %v666_v42 = vld [vmem:[#allocation2 + $0x38] sm:$0xf] }
  0xe6   :  { %v5313_v29 = vrot.slane %v994_v35, 9  ;;  %1527 = vrot.lane.b32.xlu1 %v5333_v38, %s5778_s16  ;;  %v764_v6 = vor.u32 %v763_v3, %v760_v1  ;;  %v1089_v16 = vrot.slane %v995_v62, 5  ;;  %v667_v36 = vld [vmem:[#allocation2 + $0x3c] sm:$0x1]  ;;  %v772_v5 = vshrl.u32 %v664_v10, 16 }
  0xe7   :  { %v769_v19 = vrot.slane %v767_v40, 5  ;;  %v751_v2 = vrot.slane %v750_v11, 4  ;;  %v1086_v31 = vsel %vm6208_vm10, %v5312_v7, %v1085_v14  ;;  %v775_v41 = vshll.u32 %v664_v10, 16  ;;  %v1582_v63 = vld [vmem:[#allocation2 + $0x78] sm:$0xe] }
  0xe8   :  { %2306 = vrot.lane.b32.xlu0 %v5400_v12, %s5776_s14  ;;  %v781_v33 = vshll.u32 %v665_v44, 16  ;;  %v765_v25 = vrot.slane %v764_v6, 4  ;;  %v1090_v48 = vsel %vm6208_vm10, %v5313_v29, %v1089_v16  ;;  %v774_v51 = vrot.slane %v772_v5, 4  ;;  %v1583_v22 = vld [vmem:[#allocation2 + $0x7c] sm:$0x1] }
  0xe9   :  { %v786_v52 = vshrl.u32 %v666_v42, 16  ;;  %v5401_v38 = vcombine.low %v2253_v45, %v2257_v58  ;;  %v756_v30 = vsel %vm6227_vm11, %v751_v2, %v755_v55  ;;  %v5322_v46 = vcombine.low %v1086_v31, %v1090_v48  ;;  %v1584_v24 = vld [vmem:[#allocation2 + $0x80] sm:$0xe]  ;;  %v1585_v27 = vld [vmem:[#allocation2 + $0x84] sm:$0x1] }
  0xea   :  { %v777_v12 = vrot.slane %v775_v41, 5  ;;  %2115 = vrot.lane.b32.xlu1 %v5373_v57, %s5779_s17  ;;  %v770_v59 = vsel %vm6227_vm11, %v765_v25, %v769_v19  ;;  %v789_v18 = vshll.u32 %v666_v42, 16  ;;  %v795_v28 = vshll.u32 %v667_v36, 16  ;;  %v1257_v23 = vld [vmem:[#allocation2 + $0x38] sm:$0xf] }
  0xeb   :  { %v788_v4 = vrot.slane %v786_v52, 4  ;;  %v783_v49 = vrot.slane %v781_v33, 5  ;;  %v5352_v56 = vrot.slane %v1582_v63, 9  ;;  %v1672_v39 = vrot.slane %v1583_v22, 5  ;;  %v1259_v50 = vld [vmem:[#allocation2 + $0x40] sm:$0xf] }
  0xec   :  { %2308 = vrot.lane.b32.xlu0 %v5401_v38, %s5776_s14  ;;  %v778_v13 = vor.u32 %v777_v12, %v774_v51  ;;  %v5294_v45 = vcombine.low %v756_v30, %v770_v59  ;;  %v791_v53 = vrot.slane %v789_v18, 5  ;;  %v5353_v37 = vrot.slane %v1584_v24, 9  ;;  %v1258_v35 = vld [vmem:[#allocation2 + $0x3c] sm:$0x1]  ;;  %v1260_v43 = vld [vmem:[#allocation2 + $0x44] sm:$0x1] }
  0xed   :  { %v1676_v15 = vrot.slane %v1585_v27, 5  ;;  %v1673_v58 = vsel %vm6208_vm10, %v5352_v56, %v1672_v39  ;;  %v1362_v55 = vshrl.u32 %v1257_v23, 16  ;;  %v1365_v62 = vshll.u32 %v1257_v23, 16  ;;  %v654_v40 = vld [vmem:[#allocation2 + $0x8] sm:$0xf] }
  0xee   :  { %v779_v0 = vrot.slane %v778_v13, 4  ;;  %939 = vrot.lane.b32.xlu1 %v5294_v45, %s5777_s15  ;;  %v792_v10 = vor.u32 %v791_v53, %v788_v4  ;;  %v797_v57 = vrot.slane %v795_v28, 5  ;;  %v1376_v3 = vshrl.u32 %v1259_v50, 16  ;;  %v655_v44 = vld [vmem:[#allocation2 + $0xc] sm:$0x1] }
  0xef   :  { %v1677_v1 = vsel %vm6208_vm10, %v5353_v37, %v1676_v15  ;;  %v1364_v7 = vrot.slane %v1362_v55, 4  ;;  %v1367_v14 = vrot.slane %v1365_v62, 5  ;;  %v1371_v29 = vshll.u32 %v1258_v35, 16  ;;  %v1845_v42 = vld [vmem:[#allocation2 + $0x40] sm:$0xf] }
  0xf0   :  { %1135 = vrot.lane.b32.xlu0 %v5322_v46, %s5774_s12  ;;  %v784_v11 = vsel %vm6227_vm11, %v779_v0, %v783_v49  ;;  %v793_v6 = vrot.slane %v792_v10, 4  ;;  %v5362_v19 = vcombine.low %v1673_v58, %v1677_v1  ;;  %v1378_v16 = vrot.slane %v1376_v3, 4  ;;  %v1846_v33 = vld [vmem:[#allocation2 + $0x44] sm:$0x1]  ;;  %v1245_v52 = vld [vmem:[#allocation2 + $0x8] sm:$0xf] }
  0xf1   :  { %v1379_v36 = vshll.u32 %v1259_v50, 16  ;;  %v1368_v5 = vor.u32 %v1367_v14, %v1364_v7  ;;  %v1385_v2 = vshll.u32 %v1260_v43, 16  ;;  %v702_v31 = vshrl.u32 %v654_v40, 16  ;;  %v1246_v12 = vld [vmem:[#allocation2 + $0xc] sm:$0x1] }
  0xf2   :  { %v705_v41 = vshll.u32 %v654_v40, 16  ;;  %v798_v63 = vsel %vm6227_vm11, %v793_v6, %v797_v57  ;;  %v711_v48 = vshll.u32 %v655_v44, 16  ;;  %v1950_v51 = vshrl.u32 %v1845_v42, 16  ;;  %v1247_v18 = vld [vmem:[#allocation2 + $0x10] sm:$0xf] }
  0xf3   :  { %v1381_v25 = vrot.slane %v1379_v36, 5  ;;  %v5295_v22 = vcombine.low %v784_v11, %v798_v63  ;;  %v1369_v38 = vrot.slane %v1368_v5, 4  ;;  %v1373_v30 = vrot.slane %v1371_v29, 5  ;;  %v1248_v45 = vld [vmem:[#allocation2 + $0x14] sm:$0x1]  ;;  %v5707_v5 = vld [vmem:[%s8192_s1] sm:$0xff]  }
  0xf4   :  { %1722 = vrot.lane.b32.xlu0 %v5362_v19, %s5775_s13  ;;  %v704_v46 = vrot.slane %v702_v31, 4  ;;  %v1387_v27 = vrot.slane %v1385_v2, 5  ;;  %v707_v59 = vrot.slane %v705_v41, 5  ;;  %v713_v4 = vrot.slane %v711_v48, 5  ;;  %v670_v58 = vld [vmem:[#allocation2 + $0x58] sm:$0xf]  ;;  %5620 = vmatprep.subr.bf16.mxu0 %v5707_v5 }
  0xf5   :  { %v1382_v24 = vor.u32 %v1381_v25, %v1378_v16  ;;  %941 = vrot.lane.b32.xlu1 %v5295_v22, %s5777_s15  ;;  %v1952_v28 = vrot.slane %v1950_v51, 4  ;;  %v1953_v23 = vshll.u32 %v1845_v42, 16  ;;  %v1959_v13 = vshll.u32 %v1846_v33, 16  ;;  %v671_v44 = vld [vmem:[#allocation2 + $0x5c] sm:$0x1]  ;;  %5621 = vmatpush3.bf16.msra.mxu0 %v5707_v5 }
  0xf6   :  { %v1278_v49 = vshrl.u32 %v1245_v52, 16  ;;  %v1374_v56 = vsel %vm6227_vm11, %v1369_v38, %v1373_v30  ;;  %v708_v50 = vor.u32 %v707_v59, %v704_v46  ;;  %v1281_v53 = vshll.u32 %v1245_v52, 16  ;;  %v1833_v42 = vld [vmem:[#allocation2 + $0x10] sm:$0xf]  ;;  %v1834_v63 = vld [vmem:[#allocation2 + $0x14] sm:$0x1]  ;;  %5622 = vmatprep.subr.bf16.mxu0 %v5709_v8 }
  0xf7   :  { %v1383_v39 = vrot.slane %v1382_v24, 4  ;;  %v1955_v37 = vrot.slane %v1953_v23, 5  ;;  %v1287_v35 = vshll.u32 %v1246_v12, 16  ;;  %v1292_v0 = vshrl.u32 %v1247_v18, 16  ;;  %v1836_v38 = vld [vmem:[#allocation2 + $0x1c] sm:$0x1] }
  0xf8   :  { %v1280_v15 = vrot.slane %v1278_v49, 4  ;;  %v709_v55 = vrot.slane %v708_v50, 4  ;;  %v1961_v62 = vrot.slane %v1959_v13, 5  ;;  %v1283_v10 = vrot.slane %v1281_v53, 5  ;;  %v672_v46 = vld [vmem:[#allocation2 + $0x60] sm:$0xf] }
  0xf9   :  { %v1388_v43 = vsel %vm6227_vm11, %v1383_v39, %v1387_v27  ;;  %v1956_v1 = vor.u32 %v1955_v37, %v1952_v28  ;;  %v1294_v3 = vrot.slane %v1292_v0, 4  ;;  %v1295_v40 = vshll.u32 %v1247_v18, 16  ;;  %v673_v13 = vld [vmem:[#allocation2 + $0x64] sm:$0x1]  ;;  %v674_v53 = vld [vmem:[#allocation2 + $0x68] sm:$0xf]  ;;  %5623 = vmatpush3.bf16.msra.mxu0 %v5709_v8 }
  0xfa   :  { %v5335_v57 = vcombine.low %v1374_v56, %v1388_v43  ;;  %v714_v11 = vsel %vm6227_vm11, %v709_v55, %v713_v4  ;;  %v1284_v7 = vor.u32 %v1283_v10, %v1280_v15  ;;  %v1301_v14 = vshll.u32 %v1248_v45, 16  ;;  %v675_v37 = vld [vmem:[#allocation2 + $0x6c] sm:$0x1]  ;;  %v1253_v43 = vld [vmem:[#allocation2 + $0x28] sm:$0xf] }
  0xfb   :  { %v814_v29 = vshrl.u32 %v670_v58, 16  ;;  %v5292_v6 = vcombine.low %v700_v26, %v714_v11  ;;  %v1957_v19 = vrot.slane %v1956_v1, 4  ;;  %v1297_v16 = vrot.slane %v1295_v40, 5  ;;  %v1254_v11 = vld [vmem:[#allocation2 + $0x2c] sm:$0x1] }
  0xfc   :  { %1531 = vrot.lane.b32.xlu1 %v5335_v57, %s5778_s16  ;;  %v817_v36 = vshll.u32 %v670_v58, 16  ;;  %v1285_v2 = vrot.slane %v1284_v7, 4  ;;  %v1289_v31 = vrot.slane %v1287_v35, 5  ;;  %v823_v33 = vshll.u32 %v671_v44, 16 }
  0xfd   :  { %v816_v41 = vrot.slane %v814_v29, 4  ;;  %935 = vrot.lane.b32.xlu0 %v5292_v6, %s5777_s15  ;;  %v1962_v25 = vsel %vm6227_vm11, %v1957_v19, %v1961_v62  ;;  %v1298_v48 = vor.u32 %v1297_v16, %v1294_v3  ;;  %v1866_v26 = vshrl.u32 %v1833_v42, 16 }
  0xfe   :  { %v819_v54 = vrot.slane %v817_v36, 5  ;;  %v5375_v51 = vcombine.low %v1962_v25, %v1976_v47  ;;  %v1290_v52 = vsel %vm6227_vm11, %v1285_v2, %v1289_v31  ;;  %v1303_v22 = vrot.slane %v1301_v14, 5  ;;  %v1256_v36 = vld [vmem:[#allocation2 + $0x34] sm:$0x1] }
  0xff   :  { %v1869_v30 = vshll.u32 %v1833_v42, 16  ;;  %v1299_v12 = vrot.slane %v1298_v48, 4  ;;  %v1868_v27 = vrot.slane %v1866_v26, 4  ;;  %v1875_v59 = vshll.u32 %v1834_v63, 16  ;;  %v1255_v42 = vld [vmem:[#allocation2 + $0x30] sm:$0xf] }
 0x100   :  { %v820_v24 = vor.u32 %v819_v54, %v816_v41  ;;  %2119 = vrot.lane.b32.xlu1 %v5375_v51, %s5779_s17  ;;  %v825_v4 = vrot.slane %v823_v33, 5  ;;  %v1880_v28 = vshrl.u32 %v1835_v61, 16  ;;  %v1883_v23 = vshll.u32 %v1835_v61, 16  ;;  %v1265_v33 = vld [vmem:[#allocation2 + $0x68] sm:$0xf] }
 0x101   :  { %v1871_v18 = vrot.slane %v1869_v30, 5  ;;  %v1304_v21 = vsel %vm6227_vm11, %v1299_v12, %v1303_v22  ;;  %v1889_v47 = vshll.u32 %v1836_v38, 16  ;;  %v828_v49 = vshrl.u32 %v672_v46, 16  ;;  %v1266_v61 = vld [vmem:[#allocation2 + $0x6c] sm:$0x1] }
 0x102   :  { %v821_v60 = vrot.slane %v820_v24, 4  ;;  %v5332_v56 = vcombine.low %v1290_v52, %v1304_v21  ;;  %v1882_v50 = vrot.slane %v1880_v28, 4  ;;  %v1885_v45 = vrot.slane %v1883_v23, 5  ;;  %v1267_v38 = vld [vmem:[#allocation2 + $0x70] sm:$0xf] }
 0x103   :  { %v1872_v39 = vor.u32 %v1871_v18, %v1868_v27  ;;  %v1877_v35 = vrot.slane %v1875_v59, 5  ;;  %v830_v0 = vrot.slane %v828_v49, 4  ;;  %v831_v58 = vshll.u32 %v672_v46, 16  ;;  %v1268_v18 = vld [vmem:[#allocation2 + $0x74] sm:$0x1] }
 0x104   :  { %v826_v15 = vsel %vm6227_vm11, %v821_v60, %v825_v4  ;;  %1525 = vrot.lane.b32.xlu0 %v5332_v56, %s5778_s16  ;;  %v1886_v10 = vor.u32 %v1885_v45, %v1882_v50  ;;  %v837_v57 = vshll.u32 %v673_v13, 16  ;;  %v1891_v1 = vrot.slane %v1889_v47, 5  ;;  %v1841_v13 = vld [vmem:[#allocation2 + $0x30] sm:$0xf] }
 0x105   :  { %v5296_v55 = vcombine.low %v812_v34, %v826_v15  ;;  %v1873_v62 = vrot.slane %v1872_v39, 4  ;;  %v833_v3 = vrot.slane %v831_v58, 5  ;;  %v842_v40 = vshrl.u32 %v674_v53, 16  ;;  %v1843_v58 = vld [vmem:[#allocation2 + $0x38] sm:$0xf] }
 0x106   :  { %v845_v44 = vshll.u32 %v674_v53, 16  ;;  %v1887_v14 = vrot.slane %v1886_v10, 4  ;;  %v851_v29 = vshll.u32 %v675_v37, 16  ;;  %v1334_v6 = vshrl.u32 %v1253_v43, 16  ;;  %v6599_v45 = vpop.permute.xlu1 %1214  ;;  %v1842_v10 = vld [vmem:[#allocation2 + $0x34] sm:$0x1] }
 0x107   :  { %943 = vrot.lane.b32.xlu1 %v5296_v55, %s5777_s15  ;;  %v1878_v7 = vsel %vm6227_vm11, %v1873_v62, %v1877_v35  ;;  %v834_v17 = vor.u32 %v833_v3, %v830_v0  ;;  %v839_v34 = vrot.slane %v837_v57, 5  ;;  %v844_v19 = vrot.slane %v842_v40, 4  ;;  %v6601_v53 = vpop.permute.xlu0 %1212 }
 0x108   :  { %v847_v16 = vrot.slane %v845_v44, 5  ;;  %v1892_v5 = vsel %vm6227_vm11, %v1887_v14, %v1891_v1  ;;  %v1336_v2 = vrot.slane %v1334_v6, 4  ;;  %v1337_v31 = vshll.u32 %v1253_v43, 16  ;;  %v1844_v44 = vld [vmem:[#allocation2 + $0x3c] sm:$0x1] }
 0x109   :  { %v1343_v41 = vshll.u32 %v1254_v11, 16  ;;  %v5372_v63 = vcombine.low %v1878_v7, %v1892_v5  ;;  %v835_v25 = vrot.slane %v834_v17, 4  ;;  %v1348_v54 = vshrl.u32 %v1255_v42, 16  ;;  %v1853_v6 = vld [vmem:[#allocation2 + $0x70] sm:$0xf] }
 0x10a   :  { %v848_v48 = vor.u32 %v847_v16, %v844_v19  ;;  %v853_v26 = vrot.slane %v851_v29, 5  ;;  %v1339_v51 = vrot.slane %v1337_v31, 5  ;;  %v1351_v22 = vshll.u32 %v1255_v42, 16  ;;  %v1855_v5 = vld [vmem:[#allocation2 + $0x78] sm:$0xf] }
 0x10b   :  { %v1345_v52 = vrot.slane %v1343_v41, 5  ;;  %2113 = vrot.lane.b32.xlu0 %v5372_v63, %s5779_s17  ;;  %v1350_v46 = vrot.slane %v1348_v54, 4  ;;  %v1357_v12 = vshll.u32 %v1256_v36, 16  ;;  %v1418_v24 = vshrl.u32 %v1265_v33, 16  ;;  %v1854_v36 = vld [vmem:[#allocation2 + $0x74] sm:$0x1] }
 0x10c   :  { %v849_v30 = vrot.slane %v848_v48, 4  ;;  %v840_v27 = vsel %vm6227_vm11, %v835_v25, %v839_v34  ;;  %v1340_v59 = vor.u32 %v1339_v51, %v1336_v2  ;;  %v1353_v4 = vrot.slane %v1351_v22, 5  ;;  %v6608_v8 = vpop.permute.xlu0 %1800  ;;  %v1856_v51 = vld [vmem:[#allocation2 + $0x7c] sm:$0x1] }
 0x10d   :  { %v1421_v28 = vshll.u32 %v1265_v33, 16  ;;  %v1420_v21 = vrot.slane %v1418_v24, 4  ;;  %v1427_v60 = vshll.u32 %v1266_v61, 16  ;;  %v1432_v47 = vshrl.u32 %v1267_v38, 16 }
 0x10e   :  { %v854_v23 = vsel %vm6227_vm11, %v849_v30, %v853_v26  ;;  %v1341_v56 = vrot.slane %v1340_v59, 4  ;;  %v1354_v39 = vor.u32 %v1353_v4, %v1350_v46  ;;  %v1359_v37 = vrot.slane %v1357_v12, 5 }
 0x10f   :  { %v5297_v49 = vcombine.low %v840_v27, %v854_v23  ;;  %v1423_v50 = vrot.slane %v1421_v28, 5  ;;  %v1434_v15 = vrot.slane %v1432_v47, 4  ;;  %v1435_v35 = vshll.u32 %v1267_v38, 16  ;;  %v6612_v63 = vpop.permute.xlu1 %1802  ;;  %v1261_v27 = vld [vmem:[#allocation2 + $0x58] sm:$0xf] }
 0x110   :  { %v1441_v0 = vshll.u32 %v1268_v18, 16  ;;  %v1346_v43 = vsel %vm6227_vm11, %v1341_v56, %v1345_v52  ;;  %v1355_v55 = vrot.slane %v1354_v39, 4  ;;  %v1922_v57 = vshrl.u32 %v1841_v13, 16  ;;  %v6615_v38 = vpop.permute.xlu0 %1216  ;;  %v1262_v23 = vld [vmem:[#allocation2 + $0x5c] sm:$0x1] }
 0x111   :  { %945 = vrot.lane.b32.xlu1 %v5297_v49, %s5777_s15  ;;  %v1424_v62 = vor.u32 %v1423_v50, %v1420_v21  ;;  %v1429_v1 = vrot.slane %v1427_v60, 5  ;;  %v1437_v3 = vrot.slane %v1435_v35, 5  ;;  %v1925_v11 = vshll.u32 %v1841_v13, 16  ;;  %v1263_v21 = vld [vmem:[#allocation2 + $0x60] sm:$0xf] }
 0x112   :  { %v1443_v40 = vrot.slane %v1441_v0, 5  ;;  %v1360_v7 = vsel %vm6227_vm11, %v1355_v55, %v1359_v37  ;;  %v1924_v29 = vrot.slane %v1922_v57, 4  ;;  %v1936_v42 = vshrl.u32 %v1843_v58, 16  ;;  %v1264_v37 = vld [vmem:[#allocation2 + $0x64] sm:$0x1] }
 0x113   :  { %v1425_v14 = vrot.slane %v1424_v62, 4  ;;  %v5334_v17 = vcombine.low %v1346_v43, %v1360_v7  ;;  %v1438_v34 = vor.u32 %v1437_v3, %v1434_v15  ;;  %v1927_v19 = vrot.slane %v1925_v11, 5  ;;  %v6619_v60 = vpop.permute.xlu1 %1218 }
 0x114   :  { %v1931_v16 = vshll.u32 %v1842_v10, 16  ;;  %v1938_v31 = vrot.slane %v1936_v42, 4  ;;  %v1939_v41 = vshll.u32 %v1843_v58, 16  ;;  %v1945_v33 = vshll.u32 %v1844_v44, 16  ;;  %v676_v10 = vld [vmem:[#allocation2 + $0x70] sm:$0xf] }
 0x115   :  { %v1430_v2 = vsel %vm6227_vm11, %v1425_v14, %v1429_v1  ;;  %1529 = vrot.lane.b32.xlu0 %v5334_v17, %s5778_s16  ;;  %v1439_v25 = vrot.slane %v1438_v34, 4  ;;  %v1928_v48 = vor.u32 %v1927_v19, %v1924_v29  ;;  %v2006_v54 = vshrl.u32 %v1853_v6, 16  ;;  %v678_v44 = vld [vmem:[#allocation2 + $0x78] sm:$0xf]  ;;  %v677_v19 = vld [vmem:[#allocation2 + $0x74] sm:$0x1] }
 0x116   :  { %v2009_v61 = vshll.u32 %v1853_v6, 16  ;;  %v1941_v26 = vrot.slane %v1939_v41, 5  ;;  %v2015_v52 = vshll.u32 %v1854_v36, 16  ;;  %v2020_v22 = vshrl.u32 %v1855_v5, 16  ;;  %v6622_v0 = vpop.permute.xlu0 %1804 }
 0x117   :  { %v1444_v30 = vsel %vm6227_vm11, %v1439_v25, %v1443_v40  ;;  %v1929_v46 = vrot.slane %v1928_v48, 4  ;;  %v2008_v12 = vrot.slane %v2006_v54, 4  ;;  %v1933_v4 = vrot.slane %v1931_v16, 5  ;;  %v6628_v11 = vpop.permute.xlu1 %1806 }
 0x118   :  { %v2011_v24 = vrot.slane %v2009_v61, 5  ;;  %v5337_v59 = vcombine.low %v1430_v2, %v1444_v30  ;;  %v1942_v18 = vor.u32 %v1941_v26, %v1938_v31  ;;  %v1947_v28 = vrot.slane %v1945_v33, 5  ;;  %v679_v2 = vld [vmem:[#allocation2 + $0x7c] sm:$0x1]  ;;  %v1849_v26 = vld [vmem:[#allocation2 + $0x60] sm:$0xf] }
 0x119   :  { %v2022_v13 = vrot.slane %v2020_v22, 4  ;;  %v2023_v49 = vshll.u32 %v1855_v5, 16  ;;  %v2029_v56 = vshll.u32 %v1856_v51, 16  ;;  %v2017_v50 = vrot.slane %v2015_v52, 5 }
 0x11a   :  { %v2012_v47 = vor.u32 %v2011_v24, %v2008_v12  ;;  %1535 = vrot.lane.b32.xlu1 %v5337_v59, %s5778_s16  ;;  %v1943_v39 = vrot.slane %v1942_v18, 4  ;;  %v1390_v15 = vshrl.u32 %v1261_v27, 16  ;;  %v1393_v35 = vshll.u32 %v1261_v27, 16  ;;  %v6631_v33 = vpop.permute.xlu0 %1220 }
 0x11b   :  { %v1934_v58 = vsel %vm6227_vm11, %v1929_v46, %v1933_v4  ;;  %v2025_v43 = vrot.slane %v2023_v49, 5  ;;  %v1399_v55 = vshll.u32 %v1262_v23, 16  ;;  %v1404_v62 = vshrl.u32 %v1263_v21, 16  ;;  %v1851_v46 = vld [vmem:[#allocation2 + $0x68] sm:$0xf] }
 0x11c   :  { %v1948_v57 = vsel %vm6227_vm11, %v1943_v39, %v1947_v28  ;;  %v2013_v1 = vrot.slane %v2012_v47, 4  ;;  %v1392_v3 = vrot.slane %v1390_v15, 4  ;;  %v1395_v40 = vrot.slane %v1393_v35, 5  ;;  %v1850_v4 = vld [vmem:[#allocation2 + $0x64] sm:$0x1] }
 0x11d   :  { %v5374_v7 = vcombine.low %v1934_v58, %v1948_v57  ;;  %v2026_v14 = vor.u32 %v2025_v43, %v2022_v13  ;;  %v2031_v29 = vrot.slane %v2029_v56, 5  ;;  %v1406_v42 = vrot.slane %v1404_v62, 4  ;;  %v680_v49 = vld [vmem:[#allocation2 + $0x80] sm:$0xf]  ;;  %v682_v35 = vld [vmem:[#allocation2 + $0x88] sm:$0xf] }
 0x11e   :  { %v1396_v6 = vor.u32 %v1395_v40, %v1392_v3  ;;  %v1407_v17 = vshll.u32 %v1263_v21, 16  ;;  %v1413_v34 = vshll.u32 %v1264_v37, 16  ;;  %v856_v16 = vshrl.u32 %v676_v10, 16  ;;  %v1852_v21 = vld [vmem:[#allocation2 + $0x6c] sm:$0x1] }
 0x11f   :  { %2117 = vrot.lane.b32.xlu0 %v5374_v7, %s5779_s17  ;;  %v2027_v36 = vrot.slane %v2026_v14, 4  ;;  %v1401_v5 = vrot.slane %v1399_v55, 5  ;;  %v859_v31 = vshll.u32 %v676_v10, 16  ;;  %v870_v41 = vshrl.u32 %v678_v44, 16  ;;  %v681_v10 = vld [vmem:[#allocation2 + $0x84] sm:$0x1] }
 0x120   :  { %v2018_v25 = vsel %vm6227_vm11, %v2013_v1, %v2017_v50  ;;  %v1397_v48 = vrot.slane %v1396_v6, 4  ;;  %v1409_v54 = vrot.slane %v1407_v17, 5  ;;  %v858_v61 = vrot.slane %v856_v16, 4  ;;  %v6637_v18 = vpop.permute.xlu1 %1222  ;;  %v683_v6 = vld [vmem:[#allocation2 + $0x8c] sm:$0x1] }
 0x121   :  { %v2032_v51 = vsel %vm6227_vm11, %v2027_v36, %v2031_v29  ;;  %v1415_v52 = vrot.slane %v1413_v34, 5  ;;  %v861_v22 = vrot.slane %v859_v31, 5  ;;  %v865_v30 = vshll.u32 %v677_v19, 16  ;;  %v5703_v17 = vld [vmem:[#allocation2 + $0x20] ss:$8 sps:$4 sm:$0xff]  }
 0x122   :  { %v5377_v12 = vcombine.low %v2018_v25, %v2032_v51  ;;  %v1410_v24 = vor.u32 %v1409_v54, %v1406_v42  ;;  %v872_v27 = vrot.slane %v870_v41, 4  ;;  %v873_v59 = vshll.u32 %v678_v44, 16  ;;  %v6639_v56 = vpop.permute.xlu0 %1808  ;;  %v5702_v44 = vld [vmem:[#allocation2 + $0x10] ss:$8 sps:$4 sm:$0xff]   ;;  %v1270_v54 = vld [vmem:[#allocation2 + $0x7c] sm:$0x1] }
 0x123   :  { %v862_v28 = vor.u32 %v861_v22, %v858_v61  ;;  %v879_v23 = vshll.u32 %v679_v2, 16  ;;  %v1978_v47 = vshrl.u32 %v1849_v26, 16  ;;  %v1981_v13 = vshll.u32 %v1849_v26, 16  ;;  %645 = vst.msk [vmem:[#allocation4 + $0x8] sm:$0xff] %vm643_vm12, %v5702_v44  ;;  %v1271_v61 = vld [vmem:[#allocation2 + $0x80] sm:$0xf] }
 0x124   :  { %2123 = vrot.lane.b32.xlu1 %v5377_v12, %s5779_s17  ;;  %v1402_v39 = vsel %vm6227_vm11, %v1397_v48, %v1401_v5  ;;  %v1411_v50 = vrot.slane %v1410_v24, 4  ;;  %v875_v37 = vrot.slane %v873_v59, 5  ;;  %v1992_v15 = vshrl.u32 %v1851_v46, 16  ;;  %v1269_v5 = vld [vmem:[#allocation2 + $0x78] sm:$0xf]  ;;  %646 = vst.msk [vmem:[#allocation4 + $0x10] sm:$0xff] %vm643_vm12, %v5703_v17 }
 0x125   :  { %v863_v58 = vrot.slane %v862_v28, 4  ;;  %v867_v43 = vrot.slane %v865_v30, 5  ;;  %v1980_v55 = vrot.slane %v1978_v47, 4  ;;  %v1983_v62 = vrot.slane %v1981_v13, 5  ;;  %v1272_v13 = vld [vmem:[#allocation2 + $0x84] sm:$0x1] }
 0x126   :  { %v1416_v57 = vsel %vm6227_vm11, %v1411_v50, %v1415_v52  ;;  %v876_v1 = vor.u32 %v875_v37, %v872_v27  ;;  %v881_v3 = vrot.slane %v879_v23, 5  ;;  %v1987_v40 = vshll.u32 %v1850_v4, 16  ;;  %v5705_v4 = vld [vmem:[#allocation2] ss:$8 sps:$4 sm:$0xff]   ;;  %v1274_v17 = vld [vmem:[#allocation2 + $0x8c] sm:$0x1] }
 0x127   :  { %v5336_v7 = vcombine.low %v1402_v39, %v1416_v57  ;;  %v1984_v14 = vor.u32 %v1983_v62, %v1980_v55  ;;  %v1994_v29 = vrot.slane %v1992_v15, 4  ;;  %v1995_v42 = vshll.u32 %v1851_v46, 16  ;;  %v5704_v46 = vld [vmem:[#allocation2 + $0x30] ss:$8 sps:$4 sm:$0xff]   ;;  %644 = vst.msk [vmem:[#allocation4] sm:$0xff] %vm643_vm12, %v5705_v4 }
 0x128   :  { %v877_v34 = vrot.slane %v876_v1, 4  ;;  %v2001_v19 = vshll.u32 %v1852_v21, 16  ;;  %v884_v16 = vshrl.u32 %v680_v49, 16  ;;  %v887_v36 = vshll.u32 %v680_v49, 16  ;;  %v6646_v2 = vpop.permute.xlu1 %1810  ;;  %v1273_v49 = vld [vmem:[#allocation2 + $0x88] sm:$0xf] }
 0x129   :  { %1533 = vrot.lane.b32.xlu0 %v5336_v7, %s5778_s16  ;;  %v868_v31 = vsel %vm6227_vm11, %v863_v58, %v867_v43  ;;  %v1985_v41 = vrot.slane %v1984_v14, 4  ;;  %v1997_v25 = vrot.slane %v1995_v42, 5  ;;  %v898_v48 = vshrl.u32 %v682_v35, 16  ;;  %647 = vst.msk [vmem:[#allocation4 + $0x18] sm:$0xff] %vm643_vm12, %v5704_v46  ;;  %v1275_v43 = vld [vmem:[#allocation2 + $0x90] sm:$0xf] }
 0x12a   :  { %v6652_v26 = vpop.permute.xlu0 %1224  ;;  %v882_v51 = vsel %vm6227_vm11, %v877_v34, %v881_v3  ;;  %v886_v52 = vrot.slane %v884_v16, 4  ;;  %v889_v22 = vrot.slane %v887_v36, 5  ;;  %v893_v30 = vshll.u32 %v681_v10, 16 }
 0x12b   :  { %v5298_v12 = vcombine.low %v868_v31, %v882_v51  ;;  %v1989_v24 = vrot.slane %v1987_v40, 5  ;;  %v1998_v27 = vor.u32 %v1997_v25, %v1994_v29  ;;  %v2003_v59 = vrot.slane %v2001_v19, 5  ;;  %v5708_v19 = vld [vmem:[#allocation2 + $0x60] ss:$8 sps:$4 sm:$0xff]   ;;  %v1276_v31 = vld [vmem:[#allocation2 + $0x94] sm:$0x1] }
 0x12c   :  { %v890_v28 = vor.u32 %v889_v22, %v886_v52  ;;  %v900_v23 = vrot.slane %v898_v48, 4  ;;  %v901_v21 = vshll.u32 %v682_v35, 16  ;;  %v907_v47 = vshll.u32 %v683_v6, 16  ;;  %v6657_v39 = vpop.permute.xlu1 %1226  ;;  %v5706_v35 = vld [vmem:[#allocation2 + $0x50] ss:$8 sps:$4 sm:$0xff]   ;;  %649 = vst.msk [vmem:[#allocation4 + $0x28] sm:$0xff] %vm643_vm12, %v5708_v19 }
 0x12d   :  { %947 = vrot.lane.b32.xlu1 %v5298_v12, %s5777_s15  ;;  %v1990_v50 = vsel %vm6227_vm11, %v1985_v41, %v1989_v24  ;;  %v1999_v37 = vrot.slane %v1998_v27, 4  ;;  %v1446_v15 = vshrl.u32 %v1269_v5, 16  ;;  %v1449_v58 = vshll.u32 %v1269_v5, 16  ;;  %648 = vst.msk [vmem:[#allocation4 + $0x20] sm:$0xff] %vm643_vm12, %v5706_v35  ;;  %v1857_v25 = vld [vmem:[#allocation2 + $0x80] sm:$0xf] }
 0x12e   :  { %v6663_v55 = vpop.permute.xlu0 %1812  ;;  %v895_v62 = vrot.slane %v893_v30, 5  ;;  %v903_v10 = vrot.slane %v901_v21, 5  ;;  %v1455_v57 = vshll.u32 %v1270_v54, 16  ;;  %v1460_v1 = vshrl.u32 %v1271_v61, 16  ;;  %v1859_v30 = vld [vmem:[#allocation2 + $0x88] sm:$0xf] }
 0x12f   :  { %v2004_v3 = vsel %vm6227_vm11, %v1999_v37, %v2003_v59  ;;  %v891_v40 = vrot.slane %v890_v28, 4  ;;  %v1448_v44 = vrot.slane %v1446_v15, 4  ;;  %v1451_v7 = vrot.slane %v1449_v58, 5  ;;  %v5711_v27 = vld [vmem:[#allocation2 + $0x70] ss:$8 sps:$4 sm:$0xff]  }
 0x130   :  { %v5376_v14 = vcombine.low %v1990_v50, %v2004_v3  ;;  %v904_v29 = vor.u32 %v903_v10, %v900_v23  ;;  %v909_v42 = vrot.slane %v907_v47, 5  ;;  %v1462_v6 = vrot.slane %v1460_v1, 4  ;;  %v6669_v34 = vpop.permute.xlu1 %1814  ;;  %650 = vst.msk [vmem:[#allocation4 + $0x30] sm:$0xff] %vm643_vm12, %v5711_v27  ;;  %v5712_v15 = vld [vmem:[#allocation2 + $0x80] ss:$8 sps:$4 sm:$0xff]  }
 0x131   :  { %v1452_v16 = vor.u32 %v1451_v7, %v1448_v44  ;;  %v1463_v36 = vshll.u32 %v1271_v61, 16  ;;  %v1469_v5 = vshll.u32 %v1272_v13, 16  ;;  %v1474_v41 = vshrl.u32 %v1273_v49, 16  ;;  %651 = vst.msk [vmem:[#allocation4 + $0x38] sm:$0xff] %vm643_vm12, %v5712_v15 }
 0x132   :  { %v6671_v48 = vpop.permute.xlu0 %1123  ;;  %2121 = vrot.lane.b32.xlu0 %v5376_v14, %s5779_s17  ;;  %v905_v54 = vrot.slane %v904_v29, 4  ;;  %v1457_v51 = vrot.slane %v1455_v57, 5  ;;  %v1477_v52 = vshll.u32 %v1273_v49, 16  ;;  %v1488_v22 = vshrl.u32 %v1275_v43, 16  ;;  %v1861_v29 = vld [vmem:[#allocation2 + $0x90] sm:$0xf] }
 0x133   :  { %v896_v46 = vsel %vm6227_vm11, %v891_v40, %v895_v62  ;;  %v1453_v12 = vrot.slane %v1452_v16, 4  ;;  %v1465_v61 = vrot.slane %v1463_v36, 5  ;;  %v1476_v24 = vrot.slane %v1474_v41, 4  ;;  %v1858_v40 = vld [vmem:[#allocation2 + $0x84] sm:$0x1] }
 0x134   :  { %v910_v59 = vsel %vm6227_vm11, %v905_v54, %v909_v42  ;;  %v1471_v4 = vrot.slane %v1469_v5, 5  ;;  %v1479_v28 = vrot.slane %v1477_v52, 5  ;;  %v1483_v23 = vshll.u32 %v1274_v17, 16  ;;  %v6679_v21 = vpop.permute.xlu1 %1125  ;;  %v1860_v36 = vld [vmem:[#allocation2 + $0x8c] sm:$0x1] }
 0x135   :  { %v5299_v47 = vcombine.low %v896_v46, %v910_v59  ;;  %v1466_v13 = vor.u32 %v1465_v61, %v1462_v6  ;;  %v1490_v49 = vrot.slane %v1488_v22, 4  ;;  %v1491_v50 = vshll.u32 %v1275_v43, 16  ;;  %v1863_v5 = vld [vmem:[#allocation2 + $0x98] sm:$0xf]  ;;  %v1862_v46 = vld [vmem:[#allocation2 + $0x94] sm:$0x1] }
 0x136   :  { %v6681_v37 = vpop.permute.xlu0 %1710  ;;  %v1480_v58 = vor.u32 %v1479_v28, %v1476_v24  ;;  %v1497_v35 = vshll.u32 %v1276_v31, 16  ;;  %v2034_v62 = vshrl.u32 %v1857_v25, 16  ;;  %v2037_v10 = vshll.u32 %v1857_v25, 16 }
 0x137   :  { %949 = vrot.lane.b32.xlu1 %v5299_v47, %s5777_s15  ;;  %v1458_v57 = vsel %vm6227_vm11, %v1453_v12, %v1457_v51  ;;  %v1467_v1 = vrot.slane %v1466_v13, 4  ;;  %v1493_v3 = vrot.slane %v1491_v50, 5  ;;  %v2048_v44 = vshrl.u32 %v1859_v30, 16 }
 0x138   :  { %v1481_v43 = vrot.slane %v1480_v58, 4  ;;  %v2036_v7 = vrot.slane %v2034_v62, 4  ;;  %v2039_v14 = vrot.slane %v2037_v10, 5  ;;  %v6688_v42 = vpop.permute.xlu1 %1712  ;;  %v1485_v17 = vrot.slane %v1483_v23, 5  ;;  %v2170_v10 = vld [vmem:[#allocation2 + $0x80] sm:$0xe] }
 0x139   :  { %v1472_v6 = vsel %vm6227_vm11, %v1467_v1, %v1471_v4  ;;  %v1494_v19 = vor.u32 %v1493_v3, %v1490_v49  ;;  %v1499_v16 = vrot.slane %v1497_v35, 5  ;;  %v2050_v54 = vrot.slane %v2048_v44, 4  ;;  %v1864_v4 = vld [vmem:[#allocation2 + $0x9c] sm:$0x1]  ;;  %v2172_v49 = vld [vmem:[#allocation2 + $0x88] sm:$0xe] }
 0x13a   :  { %v6692_v31 = vpop.permute.xlu0 %2298  ;;  %v5338_v41 = vcombine.low %v1458_v57, %v1472_v6  ;;  %v2040_v25 = vor.u32 %v2039_v14, %v2036_v7  ;;  %v2051_v51 = vshll.u32 %v1859_v30, 16  ;;  %v1486_v52 = vsel %vm6227_vm11, %v1481_v43, %v1485_v17  ;;  %v2173_v57 = vld [vmem:[#allocation2 + $0x8c] sm:$0x1]  ;;  %v2171_v43 = vld [vmem:[#allocation2 + $0x84] sm:$0x1] }
 0x13b   :  { %v1495_v22 = vrot.slane %v1494_v19, 4  ;;  %v2062_v12 = vshrl.u32 %v1861_v29, 16  ;;  %v2065_v61 = vshll.u32 %v1861_v29, 16  ;;  %v2043_v24 = vshll.u32 %v1858_v40, 16  ;;  %v2174_v17 = vld [vmem:[#allocation2 + $0x90] sm:$0xe] }
 0x13c   :  { %1537 = vrot.lane.b32.xlu0 %v5338_v41, %s5778_s16  ;;  %v2053_v27 = vrot.slane %v2051_v51, 5  ;;  %v2057_v59 = vshll.u32 %v1860_v36, 16  ;;  %v2076_v28 = vshrl.u32 %v1863_v5, 16  ;;  %v6697_v23 = vpop.permute.xlu1 %1129  ;;  %v2041_v58 = vrot.slane %v2040_v25, 4  ;;  %v2175_v25 = vld [vmem:[#allocation2 + $0x94] sm:$0x1] }
 0x13d   :  { %v1500_v47 = vsel %vm6227_vm11, %v1495_v22, %v1499_v16  ;;  %v2064_v30 = vrot.slane %v2062_v12, 4  ;;  %v2067_v13 = vrot.slane %v2065_v61, 5  ;;  %v2071_v62 = vshll.u32 %v1862_v46, 16  ;;  %v2176_v46 = vld [vmem:[#allocation2 + $0x98] sm:$0xe] }
 0x13e   :  { %v6701_v50 = vpop.permute.xlu0 %2300  ;;  %v5339_v15 = vcombine.low %v1486_v52, %v1500_v47  ;;  %v2054_v35 = vor.u32 %v2053_v27, %v2050_v54  ;;  %v2078_v3 = vrot.slane %v2076_v28, 4  ;;  %v2079_v40 = vshll.u32 %v1863_v5, 16  ;;  %v2177_v12 = vld [vmem:[#allocation2 + $0x9c] sm:$0x1] }
 0x13f   :  { %v2068_v1 = vor.u32 %v2067_v13, %v2064_v30  ;;  %v2085_v44 = vshll.u32 %v1864_v4, 16  ;;  %v2045_v7 = vrot.slane %v2043_v24, 5  ;;  %v2059_v29 = vrot.slane %v2057_v59, 5 }
 0x140   :  { %1539 = vrot.lane.b32.xlu1 %v5339_v15, %s5778_s16  ;;  %v2055_v14 = vrot.slane %v2054_v35, 4  ;;  %v5393_v6 = vrot.slane %v2172_v49, 9  ;;  %v6704_v19 = vpop.permute.xlu1 %1716  ;;  %v2081_v36 = vrot.slane %v2079_v40, 5  ;;  %v2264_v41 = vrot.slane %v2173_v57, 5 }
 0x141   :  { %v2069_v16 = vrot.slane %v2068_v1, 4  ;;  %v2046_v5 = vsel %vm6227_vm11, %v2041_v58, %v2045_v7  ;;  %v5392_v52 = vrot.slane %v2170_v10, 9  ;;  %v2260_v22 = vrot.slane %v2171_v43, 5 }
 0x142   :  { %v6706_v54 = vpop.permute.xlu0 %1127  ;;  %v2060_v51 = vsel %vm6227_vm11, %v2055_v14, %v2059_v29  ;;  %v2073_v24 = vrot.slane %v2071_v62, 5  ;;  %v2082_v27 = vor.u32 %v2081_v36, %v2078_v3  ;;  %v2087_v59 = vrot.slane %v2085_v44, 5  ;;  %v5710_v62 = vld [vmem:[%s8192_s1 + $0x10] ss:$0 sps:$4 sm:$0x33]  }
 0x143   :  { %v5378_v61 = vcombine.low %v2046_v5, %v2060_v51  ;;  %v2265_v4 = vsel %vm6208_vm10, %v5393_v6, %v2264_v41  ;;  %v5394_v28 = vrot.slane %v2174_v17, 9  ;;  %v2268_v47 = vrot.slane %v2175_v25, 5  ;;  %5668 = vmatprep.subr.msk.bf16.mxu0 %vm2379_vm13, %v5710_v62 }
 0x144   :  { %v6714_v30 = vpop.permute.xlu1 %1133  ;;  %v2074_v13 = vsel %vm6227_vm11, %v2069_v16, %v2073_v24  ;;  %v2083_v49 = vrot.slane %v2082_v27, 4  ;;  %v5395_v15 = vrot.slane %v2176_v46, 9  ;;  %v2272_v58 = vrot.slane %v2177_v12, 5 }
 0x145   :  { %2125 = vrot.lane.b32.xlu0 %v5378_v61, %s5779_s17  ;;  %v2261_v10 = vsel %vm6208_vm10, %v5392_v52, %v2260_v22  ;;  %v2269_v44 = vsel %vm6208_vm10, %v5394_v28, %v2268_v47  ;;  %v2381_v14 = vsel %vm2379_vm13, %v5710_v62, 0  ;;  %vm1734_vm4 = vcmask 195744  }
 0x146   :  { %v6719_v35 = vpop.permute.xlu0 %1714  ;;  %v2088_v57 = vsel %vm6227_vm11, %v2083_v49, %v2087_v59  ;;  %v5402_v1 = vcombine.low %v2261_v10, %v2265_v4  ;;  %v2273_v43 = vsel %vm6208_vm10, %v5395_v15, %v2272_v58  ;;  %5625 = vmatpush3.bf16.msra.mxu0 %v2381_v14  ;;  %vm1824_vm5 = vcmask 228544  }
 0x147   :  { %v5379_v3 = vcombine.low %v2074_v13, %v2088_v57  ;;  %v5403_v29 = vcombine.low %v2269_v44, %v2273_v43  ;;  %vm2644_vm12 = vcmask 57344   ;;  %vm2482_vm13 = vcmask 64512  }
 0x148   :  { %v6728_v40 = vpop.permute.xlu1 %1720  ;;  %2677 = vst.msk [vmem:[#allocation3 + $0x84] sm:$0x1] %vm2644_vm12, %v5770_v9  ;;  %2645 = vst.msk [vmem:[#allocation3 + $0x4] sm:$0x1] %vm2644_vm12, %v5770_v9 }
 0x149   :  { %2310 = vrot.lane.b32.xlu0 %v5402_v1, %s5776_s14  ;;  %2127 = vrot.lane.b32.xlu1 %v5379_v3, %s5779_s17  ;;  %2647 = vst.msk [vmem:[#allocation3 + $0xc] sm:$0x1] %vm2644_vm12, %v5770_v9  ;;  %2649 = vst.msk [vmem:[#allocation3 + $0x14] sm:$0x1] %vm2644_vm12, %v5770_v9 }
 0x14a   :  { %v6735_v7 = vpop.permute.xlu0 %2302  ;;  %2651 = vst.msk [vmem:[#allocation3 + $0x1c] sm:$0x1] %vm2644_vm12, %v5770_v9  ;;  %2653 = vst.msk [vmem:[#allocation3 + $0x24] sm:$0x1] %vm2644_vm12, %v5770_v9 }
 0x14b   :  { %2655 = vst.msk [vmem:[#allocation3 + $0x2c] sm:$0x1] %vm2644_vm12, %v5770_v9  ;;  %2657 = vst.msk [vmem:[#allocation3 + $0x34] sm:$0x1] %vm2644_vm12, %v5770_v9 }
 0x14c   :  { %v6738_v6 = vpop.permute.xlu1 %1137  ;;  %2659 = vst.msk [vmem:[#allocation3 + $0x3c] sm:$0x1] %vm2644_vm12, %v5770_v9  ;;  %2661 = vst.msk [vmem:[#allocation3 + $0x44] sm:$0x1] %vm2644_vm12, %v5770_v9 }
 0x14d   :  { %2312 = vrot.lane.b32.xlu1 %v5403_v29, %s5776_s14  ;;  %2663 = vst.msk [vmem:[#allocation3 + $0x4c] sm:$0x1] %vm2644_vm12, %v5770_v9  ;;  %2665 = vst.msk [vmem:[#allocation3 + $0x54] sm:$0x1] %vm2644_vm12, %v5770_v9 }
 0x14e   :  { %v2305_v17 = vpop.permute.xlu0 %2304  ;;  %2667 = vst.msk [vmem:[#allocation3 + $0x5c] sm:$0x1] %vm2644_vm12, %v5770_v9  ;;  %2669 = vst.msk [vmem:[#allocation3 + $0x64] sm:$0x1] %vm2644_vm12, %v5770_v9 }
 0x14f   :  { %2671 = vst.msk [vmem:[#allocation3 + $0x6c] sm:$0x1] %vm2644_vm12, %v5770_v9  ;;  %2673 = vst.msk [vmem:[#allocation3 + $0x74] sm:$0x1] %vm2644_vm12, %v5770_v9 }
 0x150   :  { %v6741_v16 = vpop.permute.xlu1 %1724  ;;  %2675 = vst.msk [vmem:[#allocation3 + $0x7c] sm:$0x1] %vm2644_vm12, %v5770_v9  ;;  %2679 = vst.msk [vmem:[#allocation3 + $0x8c] sm:$0x1] %vm2644_vm12, %v5770_v9 }
 0x151   :  { %2681 = vst.msk [vmem:[#allocation3 + $0x94] sm:$0x1] %vm2644_vm12, %v5770_v9  ;;  %2683 = vst.msk [vmem:[#allocation3 + $0x9c] sm:$0x1] %vm2644_vm12, %v5770_v9 }
 0x152   :  { %v1132_v36 = vpop.permute.xlu0 %1131 }
 0x154   :  { %v938_v41 = vpop.permute.xlu1 %937 }
 0x155   :  { %961 = vst.msk [vmem:[#allocation4 + $0x8] sm:$0xff] %vm959_vm14, %v938_v41 }
 0x156   :  { %v6744_v25 = vpop.permute.xlu0 %1718  ;;  %1149 = vst.msk [vmem:[#allocation4 + $0x8] sm:$0xff] %vm1147_vm15, %v6679_v21 }
 0x157   :  { %1238 = vst.msk [vmem:[#allocation4 + $0x8] sm:$0xff] %vm1236_vm0, %v6599_v45 }
 0x158   :  { %v1528_v5 = vpop.permute.xlu1 %1527 }
 0x159   :  { %1551 = vst.msk [vmem:[#allocation4 + $0x8] sm:$0xff] %vm1549_vm1, %v1528_v5 }
 0x15a   :  { %v6751_v51 = vpop.permute.xlu0 %2306  ;;  %1736 = vst.msk [vmem:[#allocation4 + $0x8] sm:$0xff] %vm1734_vm4, %v6688_v42 }
 0x15b   :  { %1826 = vst.msk [vmem:[#allocation4 + $0x8] sm:$0xff] %vm1824_vm5, %v6612_v63 }
 0x15c   :  { %v2116_v21 = vpop.permute.xlu1 %2115 }
 0x15d   :  { %2139 = vst.msk [vmem:[#allocation4 + $0x8] sm:$0xff] %vm2137_vm6, %v2116_v21 }
 0x15e   :  { %v2309_v52 = vpop.permute.xlu0 %2308  ;;  %2324 = vst.msk [vmem:[#allocation4 + $0x8] sm:$0xff] %vm2322_vm7, %v6701_v50 }
 0x160   :  { %v940_v45 = vpop.permute.xlu1 %939 }
 0x161   :  { %962 = vst.msk [vmem:[#allocation4 + $0x10] sm:$0xff] %vm959_vm14, %v940_v45 }
 0x162   :  { %1150 = vst.msk [vmem:[#allocation4 + $0x10] sm:$0xff] %vm1147_vm15, %v6706_v54  ;;  %v1136_v42 = vpop.permute.xlu0 %1135 }
 0x163   :  { %1239 = vst.msk [vmem:[#allocation4 + $0x10] sm:$0xff] %vm1236_vm0, %v6615_v38 }
 0x166   :  { %v6768_v63 = vpop.permute.xlu0 %1722 }
 0x167   :  { %v942_v22 = vpop.permute.xlu1 %941 }
 0x168   :  { %963 = vst.msk [vmem:[#allocation4 + $0x18] sm:$0xff] %vm959_vm14, %v942_v22 }
 0x169   :  { %1151 = vst.msk [vmem:[#allocation4 + $0x18] sm:$0xff] %vm1147_vm15, %v6697_v23 }
 0x16a   :  { %1240 = vst.msk [vmem:[#allocation4 + $0x18] sm:$0xff] %vm1236_vm0, %v6619_v60 }
 0x16e   :  { %v1532_v50 = vpop.permute.xlu1 %1531 }
 0x16f   :  { %1553 = vst.msk [vmem:[#allocation4 + $0x18] sm:$0xff] %vm1549_vm1, %v1532_v50  ;;  %v936_v54 = vpop.permute.xlu0 %935 }
 0x170   :  { %1738 = vst.msk [vmem:[#allocation4 + $0x18] sm:$0xff] %vm1734_vm4, %v6704_v19 }
 0x171   :  { %1828 = vst.msk [vmem:[#allocation4 + $0x18] sm:$0xff] %vm1824_vm5, %v6628_v11 }
 0x172   :  { %960 = vst.msk [vmem:[#allocation4] sm:$0xff] %vm959_vm14, %v936_v54  ;;  %v2120_v38 = vpop.permute.xlu1 %2119 }
 0x173   :  { %1148 = vst.msk [vmem:[#allocation4] sm:$0xff] %vm1147_vm15, %v6671_v48 }
 0x174   :  { %1237 = vst.msk [vmem:[#allocation4] sm:$0xff] %vm1236_vm0, %v6601_v53 }
 0x175   :  { %2141 = vst.msk [vmem:[#allocation4 + $0x18] sm:$0xff] %vm2137_vm6, %v2120_v38 }
 0x176   :  { %2326 = vst.msk [vmem:[#allocation4 + $0x18] sm:$0xff] %vm2322_vm7, %v2305_v17  ;;  %v1526_v60 = vpop.permute.xlu0 %1525 }
 0x177   :  { %1550 = vst.msk [vmem:[#allocation4] sm:$0xff] %vm1549_vm1, %v1526_v60 }
 0x178   :  { %1735 = vst.msk [vmem:[#allocation4] sm:$0xff] %vm1734_vm4, %v6681_v37 }
 0x179   :  { %v944_v23 = vpop.permute.xlu1 %943  ;;  %1825 = vst.msk [vmem:[#allocation4] sm:$0xff] %vm1824_vm5, %v6608_v8 }
 0x17a   :  { %964 = vst.msk [vmem:[#allocation4 + $0x20] sm:$0xff] %vm959_vm14, %v944_v23 }
 0x17b   :  { %1152 = vst.msk [vmem:[#allocation4 + $0x20] sm:$0xff] %vm1147_vm15, %v1132_v36 }
 0x17c   :  { %1241 = vst.msk [vmem:[#allocation4 + $0x20] sm:$0xff] %vm1236_vm0, %v6631_v33  ;;  %v2332_v33 = vld [vmem:[#allocation4 + $0x8] sm:$0xff] }
 0x17d   :  { %v2114_v53 = vpop.permute.xlu0 %2113  ;;  %v2334_v46 = vld [vmem:[#allocation4 + $0x18] sm:$0xff] }
 0x17e   :  { %2138 = vst.msk [vmem:[#allocation4] sm:$0xff] %vm2137_vm6, %v2114_v53 }
 0x17f   :  { %2323 = vst.msk [vmem:[#allocation4] sm:$0xff] %vm2322_vm7, %v6692_v31 }
 0x183   :  { %v946_v11 = vpop.permute.xlu1 %945 }
 0x184   :  { %965 = vst.msk [vmem:[#allocation4 + $0x28] sm:$0xff] %vm959_vm14, %v946_v11 }
 0x185   :  { %1153 = vst.msk [vmem:[#allocation4 + $0x28] sm:$0xff] %vm1147_vm15, %v6714_v30 }
 0x186   :  { %1242 = vst.msk [vmem:[#allocation4 + $0x28] sm:$0xff] %vm1236_vm0, %v6637_v18  ;;  %v2331_v8 = vld [vmem:[#allocation4] sm:$0xff] }
 0x187   :  { %v1530_v48 = vpop.permute.xlu0 %1529  ;;  %5626 = vmatprep.mubr.msk.bf16.mxu0 %vm2354_vm8, %v2331_v8 }
 0x188   :  { %1552 = vst.msk [vmem:[#allocation4 + $0x10] sm:$0xff] %vm1549_vm1, %v1530_v48  ;;  %5627 = vmatmul.mubr.msk.bf16.vlgmr.msra.gmra.mrb[0].mxu0 %vm2354_vm8, %v2332_v33 }
 0x189   :  { %1737 = vst.msk [vmem:[#allocation4 + $0x10] sm:$0xff] %vm1734_vm4, %v6719_v35 }
 0x18a   :  { %1827 = vst.msk [vmem:[#allocation4 + $0x10] sm:$0xff] %vm1824_vm5, %v6622_v0 }
 0x18c   :  { %v1536_v37 = vpop.permute.xlu1 %1535 }
 0x18d   :  { %1555 = vst.msk [vmem:[#allocation4 + $0x28] sm:$0xff] %vm1549_vm1, %v1536_v37 }
 0x18e   :  { %1740 = vst.msk [vmem:[#allocation4 + $0x28] sm:$0xff] %vm1734_vm4, %v6728_v40 }
 0x18f   :  { %1830 = vst.msk [vmem:[#allocation4 + $0x28] sm:$0xff] %vm1824_vm5, %v6646_v2 }
 0x191   :  { %v2118_v18 = vpop.permute.xlu0 %2117 }
 0x192   :  { %2140 = vst.msk [vmem:[#allocation4 + $0x10] sm:$0xff] %vm2137_vm6, %v2118_v18 }
 0x193   :  { %2325 = vst.msk [vmem:[#allocation4 + $0x10] sm:$0xff] %vm2322_vm7, %v6735_v7 }
 0x196   :  { %v2124_v31 = vpop.permute.xlu1 %2123 }
 0x197   :  { %2143 = vst.msk [vmem:[#allocation4 + $0x28] sm:$0xff] %vm2137_vm6, %v2124_v31 }
 0x198   :  { %2328 = vst.msk [vmem:[#allocation4 + $0x28] sm:$0xff] %vm2322_vm7, %v2309_v52 }
 0x19a   :  { %v2333_v0 = vld [vmem:[#allocation4 + $0x10] sm:$0xff] }
 0x19b   :  { %v1534_v19 = vpop.permute.xlu0 %1533  ;;  %5630 = vmatprep.mubr.msk.bf16.mxu0 %vm2354_vm8, %v2333_v0 }
 0x19c   :  { %1554 = vst.msk [vmem:[#allocation4 + $0x20] sm:$0xff] %vm1549_vm1, %v1534_v19  ;;  %5631 = vmatmul.mubr.msk.bf16.gmra.mrb[4].mxu0 %vm2354_vm8, %v2334_v46 }
 0x19d   :  { %1739 = vst.msk [vmem:[#allocation4 + $0x20] sm:$0xff] %vm1734_vm4, %v6744_v25 }
 0x19e   :  { %1829 = vst.msk [vmem:[#allocation4 + $0x20] sm:$0xff] %vm1824_vm5, %v6639_v56 }
 0x19f   :  { %v948_v2 = vpop.permute.xlu1 %947 }
 0x1a0   :  { %966 = vst.msk [vmem:[#allocation4 + $0x30] sm:$0xff] %vm959_vm14, %v948_v2 }
 0x1a1   :  { %1154 = vst.msk [vmem:[#allocation4 + $0x30] sm:$0xff] %vm1147_vm15, %v1136_v42 }
 0x1a2   :  { %1243 = vst.msk [vmem:[#allocation4 + $0x30] sm:$0xff] %vm1236_vm0, %v6652_v26  ;;  %v2336_v26 = vld [vmem:[#allocation4 + $0x28] sm:$0xff] }
 0x1a4   :  { %v2122_v12 = vpop.permute.xlu0 %2121 }
 0x1a5   :  { %2142 = vst.msk [vmem:[#allocation4 + $0x20] sm:$0xff] %vm2137_vm6, %v2122_v12 }
 0x1a6   :  { %2327 = vst.msk [vmem:[#allocation4 + $0x20] sm:$0xff] %vm2322_vm7, %v6751_v51 }
 0x1a9   :  { %v950_v61 = vpop.permute.xlu1 %949 }
 0x1aa   :  { %967 = vst.msk [vmem:[#allocation4 + $0x38] sm:$0xff] %vm959_vm14, %v950_v61  ;;  %vm7155_vm14 = vmand %vm2642_vm9, %vm473_vm2  ;;  %vm4823_vm2 = vcmask 1043456  }
 0x1ab   :  { %1155 = vst.msk [vmem:[#allocation4 + $0x38] sm:$0xff] %vm1147_vm15, %v6738_v6  ;;  %vm7163_vm15 = vmand %vm2644_vm12, %vm479_vm3  ;;  %vm3394_vm3 = vcmask 130112  }
 0x1ac   :  { %1244 = vst.msk [vmem:[#allocation4 + $0x38] sm:$0xff] %vm1236_vm0, %v6657_v39  ;;  %vm3981_vm0 = vcmask 326912  }
 0x1ad   :  { %v2335_v56 = vld [vmem:[#allocation4 + $0x20] sm:$0xff] }
 0x1ae   :  { %v1538_v24 = vpop.permute.xlu0 %1537  ;;  %5634 = vmatprep.mubr.msk.bf16.mxu0 %vm2354_vm8, %v2335_v56 }
 0x1af   :  { %1556 = vst.msk [vmem:[#allocation4 + $0x30] sm:$0xff] %vm1549_vm1, %v1538_v24  ;;  %5635 = vmatmul.mubr.msk.bf16.gmra.mrb[8].mxu0 %vm2354_vm8, %v2336_v26 }
 0x1b0   :  { %1741 = vst.msk [vmem:[#allocation4 + $0x30] sm:$0xff] %vm1734_vm4, %v6768_v63 }
 0x1b1   :  { %1831 = vst.msk [vmem:[#allocation4 + $0x30] sm:$0xff] %vm1824_vm5, %v6663_v55 }
 0x1b2   :  { %v1540_v27 = vpop.permute.xlu1 %1539 }
 0x1b3   :  { %1557 = vst.msk [vmem:[#allocation4 + $0x38] sm:$0xff] %vm1549_vm1, %v1540_v27  ;;  %vm4166_vm1 = vcmask 392512  }
 0x1b4   :  { %1742 = vst.msk [vmem:[#allocation4 + $0x38] sm:$0xff] %vm1734_vm4, %v6741_v16  ;;  %vm4256_vm4 = vcmask 458112  }
 0x1b5   :  { %1832 = vst.msk [vmem:[#allocation4 + $0x38] sm:$0xff] %vm1824_vm5, %v6669_v34  ;;  %vm4569_vm5 = vcmask 523712  }
 0x1b7   :  { %v2126_v39 = vpop.permute.xlu0 %2125 }
 0x1b8   :  { %2144 = vst.msk [vmem:[#allocation4 + $0x30] sm:$0xff] %vm2137_vm6, %v2126_v39 }
 0x1bb   :  { %v2311_v59 = vpop.permute.xlu0 %2310  ;;  %v2128_v4 = vpop.permute.xlu1 %2127 }
 0x1bc   :  { %2329 = vst.msk [vmem:[#allocation4 + $0x30] sm:$0xff] %vm2322_vm7, %v2311_v59 }
 0x1bd   :  { %2145 = vst.msk [vmem:[#allocation4 + $0x38] sm:$0xff] %vm2137_vm6, %v2128_v4  ;;  %vm4754_vm6 = vcmask 589312  }
 0x1bf   :  { %v2313_v28 = vpop.permute.xlu1 %2312 }
 0x1c0   :  { %2330 = vst.msk [vmem:[#allocation4 + $0x38] sm:$0xff] %vm2322_vm7, %v2313_v28  ;;  %vm4798_vm7 = vcmask 588800  }
 0x1c3   :  { %v2337_v55 = vld [vmem:[#allocation4 + $0x30] sm:$0xff] }
 0x1c4   :  { %5638 = vmatprep.mubr.msk.bf16.mxu0 %vm2354_vm8, %v2337_v55 }
 0x1c7   :  { %v2338_v47 = vld [vmem:[#allocation4 + $0x38] sm:$0xff] }
 0x1c8   :  { %5639 = vmatmul.mubr.msk.bf16.gmra.mrb[12].mxu0 %vm2354_vm8, %v2338_v47 }
 0x25b   :  { %v6935_v34 = vpop.f32.mrb[0].mxu0 }
 0x25c   :  { %v6937_v30 = vpop.f32.mrb[1].mxu0  ;;  %v2523_v58 = vmul.f32 %v6935_v34, %v6935_v34  ;;  %v2486_v57 = vsel %vm2482_vm13, %v6935_v34, 0.0 }
 0x25d   :  { %v2521_v13 = vmul.f32 %v6937_v30, %v6937_v30  ;;  %v6941_v49 = vpop.f32.mrb[2].mxu0  ;;  %v2483_v35 = vsel %vm2482_vm13, %v6937_v30, 0.0 }
 0x25e   :  { %v6943_v15 = vpop.f32.mrb[3].mxu0  ;;  %v2524_v3 = vmul.f32 %v6941_v49, %v6941_v49  ;;  %v2540_v7 = vsel %vm2482_vm13, %v2523_v58, 0.0  ;;  %v2488_v14 = vsel %vm2482_vm13, %v6941_v49, 0.0 }
 0x25f   :  { %v2484_v9 = vsel %vm2482_vm13, %v6943_v15, 0.0  ;;  %v2522_v62 = vmul.f32 %v6943_v15, %v6943_v15  ;;  %v2537_v1 = vsel %vm2482_vm13, %v2521_v13, 0.0 }
 0x260   :  { %v2485_v10 = vadd.f32 %v2484_v9, %v2483_v35  ;;  %v2542_v17 = vsel %vm2482_vm13, %v2524_v3, 0.0 }
 0x261   :  { %v2538_v40 = vsel %vm2482_vm13, %v2522_v62, 0.0 }
 0x262   :  { %v2487_v44 = vadd.f32 %v2486_v57, %v2485_v10  ;;  %v2539_v43 = vadd.f32 %v2538_v40, %v2537_v1 }
 0x264   :  { %v2541_v29 = vadd.f32 %v2540_v7, %v2539_v43  ;;  %v2489_v6 = vadd.f32 %v2488_v14, %v2487_v44 }
 0x266   :  { %v2543_v16 = vadd.f32 %v2542_v17, %v2541_v29 }
 0x26f   :  { %v6963_v36 = vpop.f32.mrb[4].mxu0 }
 0x270   :  { %v6965_v41 = vpop.f32.mrb[5].mxu0  ;;  %v2527_v45 = vmul.f32 %v6963_v36, %v6963_v36  ;;  %v2494_v38 = vsel %vm2482_vm13, %v6963_v36, 0.0 }
 0x271   :  { %v2490_v25 = vsel %vm2482_vm13, %v6965_v41, 0.0  ;;  %v2525_v5 = vmul.f32 %v6965_v41, %v6965_v41  ;;  %v6971_v51 = vpop.f32.mrb[6].mxu0 }
 0x272   :  { %v2491_v21 = vadd.f32 %v2490_v25, %v2489_v6  ;;  %v6973_v52 = vpop.f32.mrb[7].mxu0  ;;  %v2528_v60 = vmul.f32 %v6971_v51, %v6971_v51  ;;  %v2548_v8 = vsel %vm2482_vm13, %v2527_v45, 0.0  ;;  %v2496_v48 = vsel %vm2482_vm13, %v6971_v51, 0.0 }
 0x273   :  { %v2544_v42 = vsel %vm2482_vm13, %v2525_v5, 0.0  ;;  %v2492_v22 = vsel %vm2482_vm13, %v6973_v52, 0.0  ;;  %v2526_v63 = vmul.f32 %v6973_v52, %v6973_v52 }
 0x274   :  { %v2545_v50 = vadd.f32 %v2544_v42, %v2543_v16  ;;  %v2493_v54 = vadd.f32 %v2492_v22, %v2491_v21  ;;  %v2550_v18 = vsel %vm2482_vm13, %v2528_v60, 0.0 }
 0x275   :  { %v2546_v23 = vsel %vm2482_vm13, %v2526_v63, 0.0 }
 0x276   :  { %v2495_v53 = vadd.f32 %v2494_v38, %v2493_v54  ;;  %v2547_v11 = vadd.f32 %v2546_v23, %v2545_v50 }
 0x278   :  { %v2549_v33 = vadd.f32 %v2548_v8, %v2547_v11  ;;  %v2497_v37 = vadd.f32 %v2496_v48, %v2495_v53 }
 0x27a   :  { %v2551_v31 = vadd.f32 %v2550_v18, %v2549_v33 }
 0x282   :  { %v6991_v0 = vpop.f32.mrb[8].mxu0 }
 0x283   :  { %v6993_v19 = vpop.f32.mrb[9].mxu0  ;;  %v2531_v24 = vmul.f32 %v6991_v0, %v6991_v0  ;;  %v2502_v28 = vsel %vm2482_vm13, %v6991_v0, 0.0 }
 0x284   :  { %v2498_v46 = vsel %vm2482_vm13, %v6993_v19, 0.0  ;;  %v2529_v2 = vmul.f32 %v6993_v19, %v6993_v19  ;;  %v6999_v12 = vpop.f32.mrb[10].mxu0 }
 0x285   :  { %v2499_v61 = vadd.f32 %v2498_v46, %v2497_v37  ;;  %v7001_v56 = vpop.f32.mrb[11].mxu0  ;;  %v2532_v55 = vmul.f32 %v6999_v12, %v6999_v12  ;;  %v2556_v35 = vsel %vm2482_vm13, %v2531_v24, 0.0  ;;  %v2504_v9 = vsel %vm2482_vm13, %v6999_v12, 0.0 }
 0x286   :  { %v2552_v26 = vsel %vm2482_vm13, %v2529_v2, 0.0  ;;  %v2500_v27 = vsel %vm2482_vm13, %v7001_v56, 0.0  ;;  %v2530_v39 = vmul.f32 %v7001_v56, %v7001_v56 }
 0x287   :  { %v2553_v59 = vadd.f32 %v2552_v26, %v2551_v31  ;;  %v2501_v4 = vadd.f32 %v2500_v27, %v2499_v61  ;;  %v2558_v57 = vsel %vm2482_vm13, %v2532_v55, 0.0 }
 0x288   :  { %v2554_v47 = vsel %vm2482_vm13, %v2530_v39, 0.0 }
 0x289   :  { %v2503_v13 = vadd.f32 %v2502_v28, %v2501_v4  ;;  %v2555_v58 = vadd.f32 %v2554_v47, %v2553_v59  ;;  %v2583_v47 = vlaneseq }
 0x28b   :  { %v2557_v62 = vadd.f32 %v2556_v35, %v2555_v58  ;;  %v2505_v10 = vadd.f32 %v2504_v9, %v2503_v13  ;;  %v2584_v13 = vshrl.u32 %v2583_v47, 7  ;;  %v2480_v58 = vld [vmem:[%s8193_s2] sm:$0x1]  ;;  %v7050_v35 = vld [vmem:[#allocation3] sm:$0xe] }
 0x28c   :  { %v7052_v9 = vld [vmem:[#allocation3 + $0x4] sm:$0x1] }
 0x28d   :  { %v2559_v1 = vadd.f32 %v2558_v57, %v2557_v62  ;;  %v7054_v62 = vld [vmem:[#allocation3 + $0x48] sm:$0xe] }
 0x28e   :  { %v4279_v57 = vld [vmem:[#allocation3 + $0x48] sm:$0xf] }
 0x29b   :  { %v7019_v3 = vpop.f32.mrb[12].mxu0 }
 0x29c   :  { %v7021_v40 = vpop.f32.mrb[13].mxu0  ;;  %v2535_v6 = vmul.f32 %v7019_v3, %v7019_v3  ;;  %v2510_v45 = vsel %vm2482_vm13, %v7019_v3, 0.0 }
 0x29d   :  { %v2506_v44 = vsel %vm2482_vm13, %v7021_v40, 0.0  ;;  %v2533_v43 = vmul.f32 %v7021_v40, %v7021_v40  ;;  %v7027_v7 = vpop.f32.mrb[14].mxu0 }
 0x29e   :  { %v2507_v14 = vadd.f32 %v2506_v44, %v2505_v10  ;;  %v7029_v29 = vpop.f32.mrb[15].mxu0  ;;  %v2536_v42 = vmul.f32 %v7027_v7, %v7027_v7  ;;  %v2564_v54 = vsel %vm2482_vm13, %v2535_v6, 0.0  ;;  %v2512_v38 = vsel %vm2482_vm13, %v7027_v7, 0.0  ;;  %v7056_v10 = vld [vmem:[#allocation3 + $0x4c] sm:$0x1] }
 0x29f   :  { %v2560_v17 = vsel %vm2482_vm13, %v2533_v43, 0.0  ;;  %v2508_v16 = vsel %vm2482_vm13, %v7029_v29, 0.0  ;;  %v2534_v25 = vmul.f32 %v7029_v29, %v7029_v29  ;;  %v3106_v44 = vld [vmem:[#allocation3 + $0x50] sm:$0xf]  ;;  %v7058_v43 = vsub.s32 0, %v2584_v13 }
 0x2a0   :  { %v2561_v5 = vadd.f32 %v2560_v17, %v2559_v1  ;;  %v2509_v21 = vadd.f32 %v2508_v16, %v2507_v14  ;;  %v2566_v53 = vsel %vm2482_vm13, %v2536_v42, 0.0  ;;  %v3090_v1 = vld [vmem:[#allocation3] sm:$0xf]  ;;  %v4280_v14 = vld [vmem:[#allocation3 + $0x4c] sm:$0x1]  ;;  %v4396_v6 = vshrl.u32 %v4279_v57, 16 }
 0x2a1   :  { %v2562_v22 = vsel %vm2482_vm13, %v2534_v25, 0.0  ;;  %v4399_v17 = vshll.u32 %v4279_v57, 16  ;;  %v3123_v16 = vshrl.u32 %v3090_v1, 16  ;;  %v7060_v25 = vld [vmem:[#allocation3 + $0x50] sm:$0xe] }
 0x2a2   :  { %v2511_v63 = vadd.f32 %v2510_v45, %v2509_v21  ;;  %v2563_v50 = vadd.f32 %v2562_v22, %v2561_v5  ;;  %v7062_v5 = vld [vmem:[#allocation3 + $0x54] sm:$0x1]  ;;  %v3126_v21 = vshll.u32 %v3090_v1, 16  ;;  %v3235_v45 = vshrl.u32 %v3106_v44, 16 }
 0x2a3   :  { %v7064_v22 = vrot.slane %v4396_v6, 4 }
 0x2a4   :  { %v2513_v60 = vadd.f32 %v2512_v38, %v2511_v63  ;;  %v2565_v23 = vadd.f32 %v2564_v54, %v2563_v50  ;;  %v7066_v63 = vrot.slane %v4399_v17, 5  ;;  %v4405_v50 = vshll.u32 %v4280_v14, 16 }
 0x2a5   :  { %v3238_v54 = vshll.u32 %v3106_v44, 16 }
 0x2a6   :  { %v2514_v11 = vrot.slane %v2513_v60, 4  ;;  %v2567_v8 = vadd.f32 %v2566_v53, %v2565_v23  ;;  %v3469_v23 = vrot.slane %v7052_v9, 5  ;;  %v8212_v9 = vrot.slane %v7054_v62, 9 }
 0x2a8   :  { %v2515_v48 = vadd.f32 %v2514_v11, %v2513_v60  ;;  %v2568_v33 = vrot.slane %v2567_v8, 4  ;;  %v5447_v60 = vrot.slane %v7050_v35, 9  ;;  %v7071_v11 = vld [vmem:[#allocation3 + $0x4] sm:$0x1] }
 0x2aa   :  { %v2516_v37 = vrot.slane %v2515_v48, 2  ;;  %v2569_v18 = vadd.f32 %v2568_v33, %v2567_v8  ;;  %v2481_v8 = vld [vmem:[%s8194_s3] sm:$0x1]  ;;  %s5780_s3 = smov 48  }
 0x2ac   :  { %v2517_v31 = vadd.f32 %v2516_v37, %v2515_v48  ;;  %v2570_v46 = vrot.slane %v2569_v18, 2 }
 0x2ae   :  { %v2518_v2 = vrot.slane %v2517_v31, 1  ;;  %v2571_v61 = vadd.f32 %v2570_v46, %v2569_v18  ;;  %v7079_v18 = vrot.slane %v3123_v16, 4 }
 0x2b0   :  { %v2519_v24 = vadd.f32 %v2518_v2, %v2517_v31  ;;  %v2572_v26 = vrot.slane %v2571_v61, 1  ;;  %v7084_v2 = vrot.slane %v3126_v21, 5  ;;  %v7146_v21 = vld [vmem:[#allocation3 + $0x54] sm:$0x1] }
 0x2b2   :  { %v2520_v27 = vmul.f32 0.0078125, %v2519_v24  ;;  %v2573_v39 = vadd.f32 %v2572_v26, %v2571_v61  ;;  %v7086_v61 = vrot.slane %v3235_v45, 4  ;;  %v4402_v24 = vor.u32 %v7066_v63, %v7064_v22 }
 0x2b3   :  { %v7090_v26 = vrot.slane %v4405_v50, 5 }
 0x2b4   :  { %v2574_v59 = vmul.f32 0.0078125, %v2573_v39  ;;  %v2575_v4 = vmul.f32 %v2520_v27, %v2520_v27  ;;  %v3132_v39 = vshll.u32 %v7071_v11, 16 }
 0x2b6   :  { %v2576_v28 = vsub.f32 %v2574_v59, %v2575_v4  ;;  %v7093_v59 = vrot.slane %v3238_v54, 5 }
 0x2b8   :  { %v2577_v55 = vadd.f32 1e-05, %v2576_v28 }
 0x2ba   :  { %5742 = vrsqrt.f32 %v2577_v55 }
 0x2c4   :  { %v5743_v42 = vpop.eup %5742 }
 0x2c5   :  { %v2579_v38 = vmul.f32 %v5743_v42, %v2480_v58 }
 0x2c7   :  { %v2580_v31 = vmul.f32 %v2579_v38, %v2520_v27  ;;  %v7082_v46 = vrot.slane %v2579_v38, %v7058_v43 }
 0x2c9   :  { %v2581_v4 = vsub.f32 %v2481_v8, %v2580_v31  ;;  %v2601_v27 = vmul.f32 %v7082_v46, %v7029_v29  ;;  %v2590_v28 = vmul.f32 %v6935_v34, %v7082_v46  ;;  %v2591_v55 = vmul.f32 %v6941_v49, %v7082_v46 }
 0x2ca   :  { %v2588_v47 = vmul.f32 %v7082_v46, %v6937_v30  ;;  %v2589_v13 = vmul.f32 %v7082_v46, %v6943_v15  ;;  %v2592_v58 = vmul.f32 %v7082_v46, %v6965_v41  ;;  %v2594_v57 = vmul.f32 %v6963_v36, %v7082_v46 }
 0x2cb   :  { %v7110_v29 = vrot.slane %v2581_v4, %v7058_v43  ;;  %v2595_v34 = vmul.f32 %v6971_v51, %v7082_v46  ;;  %v7116_v49 = vmul.f32 %v7082_v46, %v6973_v52  ;;  %v7120_v30 = vmul.f32 %v6991_v0, %v7082_v46 }
 0x2cc   :  { %v7124_v15 = vmul.f32 %v6999_v12, %v7082_v46  ;;  %v7128_v36 = vmul.f32 %v7082_v46, %v6993_v19  ;;  %v7132_v41 = vmul.f32 %v7082_v46, %v7001_v56  ;;  %v7136_v51 = vmul.f32 %v7082_v46, %v7021_v40 }
 0x2cd   :  { %v2623_v52 = vadd.f32 %v7110_v29, %v2601_v27  ;;  %v2612_v0 = vadd.f32 %v7110_v29, %v2590_v28  ;;  %v2613_v1 = vadd.f32 %v7110_v29, %v2591_v55  ;;  %v2610_v12 = vadd.f32 %v7110_v29, %v2588_v47 }
 0x2ce   :  { %v2611_v44 = vadd.f32 %v7110_v29, %v2589_v13  ;;  %v2614_v19 = vadd.f32 %v7110_v29, %v2592_v58  ;;  %v2616_v14 = vadd.f32 %v7110_v29, %v2594_v57  ;;  %v2617_v56 = vadd.f32 %v7110_v29, %v2595_v34 }
 0x2cf   :  { %v2639_v6 = vmax.f32 %v2623_v52, 0.0  ;;  %v2628_v17 = vmax.f32 %v2612_v0, 0.0  ;;  %v2629_v40 = vmax.f32 %v2613_v1, 0.0  ;;  %v2626_v16 = vmax.f32 %v2610_v12, 0.0  ;;  %v2991_v52 = vld [vmem:[#allocation3 + $0x80] sm:$0xf] }
 0x2d0   :  { %v2627_v45 = vmax.f32 %v2611_v44, 0.0  ;;  %v2630_v42 = vmax.f32 %v2614_v19, 0.0  ;;  %v2632_v50 = vmax.f32 %v2616_v14, 0.0  ;;  %v2633_v54 = vmax.f32 %v2617_v56, 0.0  ;;  %v2994_v56 = vld [vmem:[#allocation3 + $0x84] sm:$0x1] }
 0x2d1   :  { %v5593_v38 = vpack.c.bf16 %v2639_v6, %v2639_v6  ;;  %v5582_v8 = vpack.c.bf16 %v2628_v17, %v2628_v17  ;;  %v5583_v31 = vpack.c.bf16 %v2629_v40, %v2629_v40  ;;  %v5580_v4 = vpack.c.bf16 %v2626_v16, %v2626_v16 }
 0x2d2   :  { %v5581_v27 = vpack.c.bf16 %v2627_v45, %v2627_v45  ;;  %v5584_v28 = vpack.c.bf16 %v2630_v42, %v2630_v42  ;;  %v7148_v55 = vpack.c.bf16 %v2632_v50, %v2632_v50  ;;  %v7151_v34 = vpack.c.bf16 %v2633_v54, %v2633_v54  ;;  %v2925_v42 = vld [vmem:[#allocation3 + $0x18] sm:$0xf] }
 0x2d3   :  { %v2853_v13 = vshrl.u32 %v5593_v38, 16  ;;  %v2856_v58 = vshll.u32 %v5593_v38, 16  ;;  %v2765_v57 = vshrl.u32 %v5582_v8, 16  ;;  %v2768_v0 = vshll.u32 %v5582_v8, 16 }
 0x2d4   :  { %v2773_v1 = vshrl.u32 %v5583_v31, 16  ;;  %v2776_v12 = vshll.u32 %v5583_v31, 16  ;;  %v2749_v44 = vshrl.u32 %v5580_v4, 16  ;;  %v2752_v17 = vshll.u32 %v5580_v4, 16  ;;  %v2911_v4 = vld [vmem:[#allocation3 + $0x8] sm:$0xf] }
 0x2d5   :  { %v2855_v19 = vrot.slane %v2853_v13, 7  ;;  %v7159_v6 = vrot.slane %v2765_v57, 7  ;;  %v2757_v40 = vshrl.u32 %v5581_v27, 16  ;;  %v2760_v54 = vshll.u32 %v5581_v27, 16  ;;  %v2931_v57 = vld [vmem:[#allocation3 + $0x20] sm:$0xf] }
 0x2d6   :  { %v7167_v45 = vrot.slane %v2773_v1, 7  ;;  %v7169_v50 = vrot.slane %v2749_v44, 7  ;;  %v2781_v38 = vshrl.u32 %v5584_v28, 16  ;;  %v2784_v47 = vshll.u32 %v5584_v28, 16 }
 0x2d7   :  { %v2858_v8 = vor.u32 %v2856_v58, %v2855_v19  ;;  %v2859_v31 = vrot.slane %v2855_v19, 4  ;;  %v2770_v13 = vor.u32 %v2768_v0, %v7159_v6  ;;  %v2771_v33 = vrot.slane %v7159_v6, 4  ;;  %v2919_v19 = vld [vmem:[#allocation3 + $0x10] sm:$0xf] }
 0x2d8   :  { %v2778_v37 = vor.u32 %v2776_v12, %v7167_v45  ;;  %v2779_v53 = vrot.slane %v7167_v45, 4  ;;  %v2754_v1 = vor.u32 %v2752_v17, %v7169_v50  ;;  %v2759_v0 = vrot.slane %v2757_v40, 7  ;;  %v2937_v40 = vld [vmem:[#allocation3 + $0x28] sm:$0xf] }
 0x2d9   :  { %v2992_v44 = vsel %vm7155_vm14, %v2858_v8, %v2991_v52  ;;  %v2995_v27 = vsel %vm7163_vm15, %v2859_v31, %v2994_v56  ;;  %v2926_v58 = vsel %vm7155_vm14, %v2770_v13, %v2925_v42  ;;  %v7186_v17 = vrot.slane %v2781_v38, 7 }
 0x2da   :  { %2993 = vst [vmem:[#allocation3 + $0x80] sm:$0xf] %v2992_v44  ;;  %2996 = vst [vmem:[#allocation3 + $0x84] sm:$0x1] %v2995_v27  ;;  %v2932_v28 = vsel %vm7155_vm14, %v2778_v37, %v2931_v57  ;;  %v2912_v12 = vsel %vm7155_vm14, %v2754_v1, %v2911_v4  ;;  %v2797_v52 = vshrl.u32 %v7148_v55, 16  ;;  %v2755_v56 = vrot.slane %v7169_v50, 4 }
 0x2db   :  { %2927 = vst [vmem:[#allocation3 + $0x18] sm:$0xf] %v2926_v58  ;;  %2933 = vst [vmem:[#allocation3 + $0x20] sm:$0xf] %v2932_v28  ;;  %v2762_v8 = vor.u32 %v2760_v54, %v2759_v0  ;;  %v2763_v42 = vrot.slane %v2759_v0, 4  ;;  %v2805_v31 = vshrl.u32 %v7151_v34, 16  ;;  %v2786_v13 = vor.u32 %v2784_v47, %v7186_v17 }
 0x2dc   :  { %2913 = vst [vmem:[#allocation3 + $0x8] sm:$0xf] %v2912_v12  ;;  %v7192_v37 = vrot.slane %v2797_v52, 7  ;;  %v2800_v57 = vshll.u32 %v7148_v55, 16  ;;  %v2808_v38 = vshll.u32 %v7151_v34, 16  ;;  %v2615_v54 = vadd.f32 %v7110_v29, %v7116_v49 }
 0x2dd   :  { %v2920_v4 = vsel %vm7155_vm14, %v2762_v8, %v2919_v19  ;;  %v7198_v1 = vrot.slane %v2805_v31, 7  ;;  %v2949_v44 = vld [vmem:[#allocation3 + $0x38] sm:$0xf]  ;;  %v2620_v27 = vadd.f32 %v7110_v29, %v7120_v30  ;;  %v2787_v47 = vrot.slane %v7186_v17, 4  ;;  %v2955_v58 = vld [vmem:[#allocation3 + $0x40] sm:$0xf] }
 0x2de   :  { %2921 = vst [vmem:[#allocation3 + $0x10] sm:$0xf] %v2920_v4  ;;  %v2938_v55 = vsel %vm7155_vm14, %v2786_v13, %v2937_v40  ;;  %v2802_v34 = vor.u32 %v2800_v57, %v7192_v37  ;;  %v2621_v0 = vadd.f32 %v7110_v29, %v7124_v15  ;;  %v2803_v28 = vrot.slane %v7192_v37, 4  ;;  %v2922_v30 = vld [vmem:[#allocation3 + $0x14] sm:$0x1] }
 0x2df   :  { %2939 = vst [vmem:[#allocation3 + $0x28] sm:$0xf] %v2938_v55  ;;  %v2810_v49 = vor.u32 %v2808_v38, %v7198_v1  ;;  %v2631_v12 = vmax.f32 %v2615_v54, 0.0  ;;  %v2636_v19 = vmax.f32 %v2620_v27, 0.0  ;;  %v2618_v40 = vadd.f32 %v7110_v29, %v7128_v36  ;;  %v2928_v13 = vld [vmem:[#allocation3 + $0x1c] sm:$0x1] }
 0x2e0   :  { %v2950_v52 = vsel %vm7155_vm14, %v2802_v34, %v2949_v44  ;;  %v2637_v8 = vmax.f32 %v2621_v0, 0.0  ;;  %v2619_v31 = vadd.f32 %v7110_v29, %v7132_v41  ;;  %v2916_v15 = vld [vmem:[#allocation3 + $0xc] sm:$0x1]  ;;  %v2622_v4 = vadd.f32 %v7110_v29, %v7136_v51  ;;  %v2934_v54 = vld [vmem:[#allocation3 + $0x24] sm:$0x1] }
 0x2e1   :  { %2951 = vst [vmem:[#allocation3 + $0x38] sm:$0xf] %v2950_v52  ;;  %v2956_v37 = vsel %vm7155_vm14, %v2810_v49, %v2955_v58  ;;  %v5585_v57 = vpack.c.bf16 %v2631_v12, %v2631_v12  ;;  %v5590_v38 = vpack.c.bf16 %v2636_v19, %v2636_v19  ;;  %v2952_v44 = vld [vmem:[#allocation3 + $0x3c] sm:$0x1]  ;;  %v2602_v36 = vmul.f32 %v7019_v3, %v7082_v46  ;;  %v2958_v51 = vld [vmem:[#allocation3 + $0x44] sm:$0x1] }
 0x2e2   :  { %v5713_v27 = vld [vmem:[#allocation3 + $0x18] ss:$8 sps:$4 sm:$0xff]   ;;  %2957 = vst [vmem:[#allocation3 + $0x40] sm:$0xf] %v2956_v37  ;;  %v5591_v55 = vpack.c.bf16 %v2637_v8, %v2637_v8  ;;  %v2603_v41 = vmul.f32 %v7027_v7, %v7082_v46  ;;  %v2923_v34 = vsel %vm7163_vm15, %v2763_v42, %v2922_v30  ;;  %v2811_v58 = vrot.slane %v7198_v1, 4 }
 0x2e3   :  { %v2789_v0 = vshrl.u32 %v5585_v57, 16  ;;  %v2792_v49 = vshll.u32 %v5585_v57, 16  ;;  %v2829_v12 = vshrl.u32 %v5590_v38, 16  ;;  %2924 = vst [vmem:[#allocation3 + $0x14] sm:$0x1] %v2923_v34  ;;  %3646 = vrot.lane.b32.xlu1 %v5713_v27, %s5773_s11  ;;  %v2832_v52 = vshll.u32 %v5590_v38, 16 }
 0x2e4   :  { %v2940_v19 = vld [vmem:[#allocation3 + $0x2c] sm:$0x1]  ;;  %v2837_v8 = vshrl.u32 %v5591_v55, 16  ;;  %v2634_v37 = vmax.f32 %v2618_v40, 0.0  ;;  %v2635_v3 = vmax.f32 %v2619_v31, 0.0  ;;  %v7231_v7 = vadd.f32 %v7110_v29, %v2602_v36 }
 0x2e5   :  { %v5714_v48 = vld [vmem:[#allocation3 + $0x8] ss:$8 sps:$4 sm:$0xff]   ;;  %v7234_v46 = vadd.f32 %v7110_v29, %v2603_v41  ;;  %v2929_v42 = vsel %vm7163_vm15, %v2771_v33, %v2928_v13  ;;  %v2917_v1 = vsel %vm7163_vm15, %v2755_v56, %v2916_v15  ;;  %v2935_v29 = vsel %vm7163_vm15, %v2779_v53, %v2934_v54  ;;  %v4582_v62 = vld [vmem:[#allocation3 + $0x20] sm:$0xe] }
 0x2e6   :  { %v5715_v30 = vld [vmem:[#allocation3 + $0x20] ss:$8 sps:$4 sm:$0xff]   ;;  %v2943_v40 = vld [vmem:[#allocation3 + $0x30] sm:$0xf]  ;;  %v5588_v57 = vpack.c.bf16 %v2634_v37, %v2634_v37  ;;  %v5589_v38 = vpack.c.bf16 %v2635_v3, %v2635_v3  ;;  %2930 = vst [vmem:[#allocation3 + $0x1c] sm:$0x1] %v2929_v42  ;;  %v2953_v33 = vsel %vm7163_vm15, %v2803_v28, %v2952_v44  ;;  %3644 = vrot.lane.b32.xlu0 %v5714_v48, %s5773_s11 }
 0x2e7   :  { %v2973_v31 = vld [vmem:[#allocation3 + $0x68] sm:$0xf]  ;;  %2918 = vst [vmem:[#allocation3 + $0xc] sm:$0x1] %v2917_v1  ;;  %v7251_v6 = vrot.slane %v2789_v0, 7  ;;  %v7253_v50 = vrot.slane %v2829_v12, 7  ;;  %4234 = vrot.lane.b32.xlu1 %v5715_v30, %s5780_s3  ;;  %v2959_v28 = vsel %vm7163_vm15, %v2811_v58, %v2958_v51  ;;  %v2941_v48 = vsel %vm7163_vm15, %v2787_v47, %v2940_v19 }
 0x2e8   :  { %v7255_v56 = vrot.slane %v2837_v8, 7  ;;  %v2979_v13 = vld [vmem:[#allocation3 + $0x70] sm:$0xf]  ;;  %v2638_v15 = vmax.f32 %v2622_v4, 0.0  ;;  %2936 = vst [vmem:[#allocation3 + $0x24] sm:$0x1] %v2935_v29 }
 0x2e9   :  { %2954 = vst [vmem:[#allocation3 + $0x3c] sm:$0x1] %v2953_v33  ;;  %v2840_v45 = vshll.u32 %v5591_v55, 16  ;;  %v2813_v53 = vshrl.u32 %v5588_v57, 16  ;;  %v5716_v54 = vld [vmem:[#allocation3 + $0x10] ss:$8 sps:$4 sm:$0xff]   ;;  %v2794_v44 = vor.u32 %v2792_v49, %v7251_v6  ;;  %v2834_v4 = vor.u32 %v2832_v52, %v7253_v50 }
 0x2ea   :  { %v2816_v27 = vshll.u32 %v5588_v57, 16  ;;  %2960 = vst [vmem:[#allocation3 + $0x44] sm:$0x1] %v2959_v28  ;;  %2942 = vst [vmem:[#allocation3 + $0x2c] sm:$0x1] %v2941_v48  ;;  %v7269_v55 = vrot.slane %v4402_v24, 4  ;;  %v5592_v47 = vpack.c.bf16 %v2638_v15, %v2638_v15  ;;  %4232 = vrot.lane.b32.xlu0 %v5716_v54, %s5780_s3 }
 0x2eb   :  { %v5717_v36 = vld [vmem:[#allocation3 + $0x38] ss:$8 sps:$4 sm:$0xff]   ;;  %v2795_v41 = vrot.slane %v7251_v6, 4  ;;  %v2842_v17 = vor.u32 %v2840_v45, %v7255_v56  ;;  %v7273_v34 = vrot.slane %v2813_v53, 7  ;;  %v2944_v58 = vsel %vm7155_vm14, %v2794_v44, %v2943_v40  ;;  %v7290_v29 = vld [vmem:[#allocation3 + $0x10] sm:$0xe] }
 0x2ec   :  { %v2835_v0 = vrot.slane %v7253_v50, 4  ;;  %v2974_v22 = vsel %vm7155_vm14, %v2834_v4, %v2973_v31  ;;  %v2821_v63 = vshrl.u32 %v5589_v38, 16  ;;  %v2961_v24 = vld [vmem:[#allocation3 + $0x58] sm:$0xf]  ;;  %3650 = vrot.lane.b32.xlu1 %v5717_v36, %s5773_s11  ;;  %2945 = vst [vmem:[#allocation3 + $0x30] sm:$0xf] %v2944_v58 }
 0x2ed   :  { %v2843_v49 = vrot.slane %v7255_v56, 4  ;;  %2975 = vst [vmem:[#allocation3 + $0x68] sm:$0xf] %v2974_v22  ;;  %v2980_v12 = vsel %vm7155_vm14, %v2842_v17, %v2979_v13  ;;  %v2818_v51 = vor.u32 %v2816_v27, %v7273_v34  ;;  %v2967_v19 = vld [vmem:[#allocation3 + $0x60] sm:$0xf]  ;;  %v2845_v52 = vshrl.u32 %v5592_v47, 16 }
 0x2ee   :  { %v5719_v8 = vld [vmem:[#allocation3 + $0x40] ss:$8 sps:$4 sm:$0xff]   ;;  %2981 = vst [vmem:[#allocation3 + $0x70] sm:$0xf] %v2980_v12  ;;  %v2823_v37 = vrot.slane %v2821_v63, 7  ;;  %v2824_v3 = vshll.u32 %v5589_v38, 16 }
 0x2ef   :  { %v2985_v42 = vld [vmem:[#allocation3 + $0x78] sm:$0xf]  ;;  %v2640_v1 = vmax.f32 %v7231_v7, 0.0  ;;  %v2641_v30 = vmax.f32 %v7234_v46, 0.0  ;;  %v2962_v40 = vsel %vm7155_vm14, %v2818_v51, %v2961_v24  ;;  %v2847_v31 = vrot.slane %v2845_v52, 7 }
 0x2f0   :  { %v2848_v57 = vshll.u32 %v5592_v47, 16  ;;  %v7292_v33 = vld [vmem:[#allocation3 + $0x14] sm:$0x1]  ;;  %v2970_v56 = vld [vmem:[#allocation3 + $0x64] sm:$0x1]  ;;  %v2826_v45 = vor.u32 %v2824_v3, %v2823_v37  ;;  %v2827_v38 = vrot.slane %v2823_v37, 4  ;;  %4238 = vrot.lane.b32.xlu1 %v5719_v8, %s5780_s3 }
 0x2f1   :  { %v2946_v50 = vld [vmem:[#allocation3 + $0x34] sm:$0x1]  ;;  %v2976_v13 = vld [vmem:[#allocation3 + $0x6c] sm:$0x1]  ;;  %2963 = vst [vmem:[#allocation3 + $0x58] sm:$0xf] %v2962_v40  ;;  %v5594_v53 = vpack.c.bf16 %v2640_v1, %v2640_v1  ;;  %v5595_v7 = vpack.c.bf16 %v2641_v30, %v2641_v30 }
 0x2f2   :  { %v2982_v15 = vld [vmem:[#allocation3 + $0x74] sm:$0x1]  ;;  %v7294_v28 = vld [vmem:[#allocation3 + $0x18] sm:$0xe]  ;;  %v2964_v46 = vld [vmem:[#allocation3 + $0x5c] sm:$0x1]  ;;  %v2850_v54 = vor.u32 %v2848_v57, %v2847_v31  ;;  %v2968_v36 = vsel %vm7155_vm14, %v2826_v45, %v2967_v19  ;;  %v2947_v8 = vsel %vm7163_vm15, %v2795_v41, %v2946_v50  ;;  %v2971_v37 = vsel %vm7163_vm15, %v2827_v38, %v2970_v56 }
 0x2f3   :  { %v2819_v48 = vrot.slane %v7273_v34, 4  ;;  %v2851_v44 = vrot.slane %v2847_v31, 4  ;;  %v2988_v4 = vld [vmem:[#allocation3 + $0x7c] sm:$0x1]  ;;  %v7300_v27 = vrot.slane %v3132_v39, 5  ;;  %v5449_v47 = vrot.slane %v7290_v29, 9 }
 0x2f4   :  { %v7304_v17 = vld [vmem:[#allocation3 + $0x1c] sm:$0x1]  ;;  %v3477_v58 = vrot.slane %v7292_v33, 5  ;;  %v7308_v22 = vld [vmem:[#allocation3 + $0x8] sm:$0xe]  ;;  %v2986_v34 = vsel %vm7155_vm14, %v2850_v54, %v2985_v42  ;;  %v2861_v63 = vshrl.u32 %v5594_v53, 16  ;;  %v2977_v3 = vsel %vm7163_vm15, %v2835_v0, %v2976_v13 }
 0x2f5   :  { %2969 = vst [vmem:[#allocation3 + $0x60] sm:$0xf] %v2968_v36  ;;  %v2869_v24 = vshrl.u32 %v5595_v7, 16  ;;  %v5450_v11 = vrot.slane %v7294_v28, 9  ;;  %v7313_v39 = vld [vmem:[#allocation3 + $0xc] sm:$0x1]  ;;  %v2983_v42 = vsel %vm7163_vm15, %v2843_v49, %v2982_v15  ;;  %v2965_v6 = vsel %vm7163_vm15, %v2819_v48, %v2964_v46 }
 0x2f6   :  { %v7315_v12 = vld [vmem:[#allocation3 + $0x18] sm:$0xe]  ;;  %v7317_v51 = vld [vmem:[#allocation3 + $0x1c] sm:$0x1]  ;;  %v7319_v19 = vld [vmem:[#allocation3 + $0x20] sm:$0xe]  ;;  %v2989_v41 = vsel %vm7163_vm15, %v2851_v44, %v2988_v4 }
 0x2f7   :  { %v5718_v52 = vld [vmem:[#allocation3 + $0x28] ss:$8 sps:$4 sm:$0xff]   ;;  %2987 = vst [vmem:[#allocation3 + $0x78] sm:$0xf] %v2986_v34  ;;  %v2864_v1 = vshll.u32 %v5594_v53, 16  ;;  %v2872_v30 = vshll.u32 %v5595_v7, 16 }
 0x2f8   :  { %2948 = vst [vmem:[#allocation3 + $0x34] sm:$0x1] %v2947_v8  ;;  %2972 = vst [vmem:[#allocation3 + $0x64] sm:$0x1] %v2971_v37  ;;  %3648 = vrot.lane.b32.xlu0 %v5718_v52, %s5773_s11  ;;  %v5721_v40 = vld [vmem:[#allocation3 + $0x68] ss:$8 sps:$4 sm:$0xff]  }
 0x2f9   :  { %2978 = vst [vmem:[#allocation3 + $0x6c] sm:$0x1] %v2977_v3  ;;  %2984 = vst [vmem:[#allocation3 + $0x74] sm:$0x1] %v2983_v42  ;;  %v2997_v31 = vld [vmem:[#allocation3 + $0x88] sm:$0xf]  ;;  %3654 = vrot.lane.b32.xlu1 %v5721_v40, %s5773_s11 }
 0x2fa   :  { %v3003_v0 = vld [vmem:[#allocation3 + $0x90] sm:$0xf]  ;;  %2966 = vst [vmem:[#allocation3 + $0x5c] sm:$0x1] %v2965_v6  ;;  %2990 = vst [vmem:[#allocation3 + $0x7c] sm:$0x1] %v2989_v41 }
 0x2fb   :  { %v2863_v49 = vrot.slane %v2861_v63, 7  ;;  %v2871_v57 = vrot.slane %v2869_v24, 7  ;;  %v3481_v50 = vrot.slane %v7304_v17, 5  ;;  %v5448_v56 = vrot.slane %v7308_v22, 9  ;;  %v7338_v13 = vld [vmem:[#allocation3 + $0x24] sm:$0x1] }
 0x2fc   :  { %v7340_v15 = vld [vmem:[#allocation3 + $0x8] sm:$0xe]  ;;  %v3000_v45 = vld [vmem:[#allocation3 + $0x8c] sm:$0x1]  ;;  %v3006_v38 = vld [vmem:[#allocation3 + $0x94] sm:$0x1] }
 0x2fd   :  { %v5720_v53 = vld [vmem:[#allocation3 + $0x30] ss:$8 sps:$4 sm:$0xff]   ;;  %v3473_v7 = vrot.slane %v7313_v39, 5  ;;  %v5489_v46 = vrot.slane %v7315_v12, 9  ;;  %v4064_v48 = vrot.slane %v7317_v51, 5  ;;  %v5490_v54 = vrot.slane %v7319_v19, 9 }
 0x2fe   :  { %v2866_v44 = vor.u32 %v2864_v1, %v2863_v49  ;;  %v2867_v4 = vrot.slane %v2863_v49, 4  ;;  %v2874_v36 = vor.u32 %v2872_v30, %v2871_v57  ;;  %v2875_v34 = vrot.slane %v2871_v57, 4  ;;  %v7347_v63 = vld [vmem:[#allocation3 + $0xc] sm:$0x1]  ;;  %v7349_v24 = vld [vmem:[#allocation3 + $0x10] sm:$0xe]  ;;  %4236 = vrot.lane.b32.xlu0 %v5720_v53, %s5780_s3 }
 0x2ff   :  { %v3993_v52 = vld [vmem:[#allocation3 + $0x14] sm:$0x1]  ;;  %v5723_v8 = vld [vmem:[#allocation3 + $0x70] ss:$8 sps:$4 sm:$0xff]   ;;  %v4068_v30 = vrot.slane %v7338_v13, 5  ;;  %v5487_v6 = vrot.slane %v7340_v15, 9  ;;  %v7435_v29 = vsel %vm6208_vm10, %v5489_v46, %v4064_v48 }
 0x300   :  { %v2998_v37 = vsel %vm7155_vm14, %v2866_v44, %v2997_v31  ;;  %v3004_v3 = vsel %vm7155_vm14, %v2874_v36, %v3003_v0  ;;  %v7356_v42 = vld [vmem:[#allocation3 + $0x30] sm:$0xe]  ;;  %v5722_v1 = vld [vmem:[#allocation3 + $0x58] ss:$8 sps:$4 sm:$0xff]   ;;  %v3001_v41 = vsel %vm7163_vm15, %v2867_v4, %v3000_v45  ;;  %v3007_v40 = vsel %vm7163_vm15, %v2875_v34, %v3006_v38  ;;  %4242 = vrot.lane.b32.xlu1 %v5723_v8, %s5780_s3  ;;  %v3416_v0 = vld [vmem:[#allocation3 + $0x34] sm:$0x1] }
 0x301   :  { %2999 = vst [vmem:[#allocation3 + $0x88] sm:$0xf] %v2998_v37  ;;  %3005 = vst [vmem:[#allocation3 + $0x90] sm:$0xf] %v3004_v3  ;;  %v4056_v14 = vrot.slane %v7347_v63, 5  ;;  %v5488_v31 = vrot.slane %v7349_v24, 9  ;;  %v7375_v36 = vsel %vm6208_vm10, %v5447_v60, %v3469_v23  ;;  %v7441_v33 = vsel %vm6208_vm10, %v5490_v54, %v4068_v30 }
 0x302   :  { %v3417_v49 = vld [vmem:[#allocation3 + $0x38] sm:$0xe]  ;;  %3002 = vst [vmem:[#allocation3 + $0x8c] sm:$0x1] %v3001_v41  ;;  %3008 = vst [vmem:[#allocation3 + $0x94] sm:$0x1] %v3007_v40  ;;  %3652 = vrot.lane.b32.xlu0 %v5722_v1, %s5773_s11 }
 0x303   :  { %v5724_v57 = vld [vmem:[#allocation3 + $0x60] ss:$8 sps:$4 sm:$0xff]   ;;  %v4060_v13 = vrot.slane %v3993_v52, 5  ;;  %v3418_v15 = vld [vmem:[#allocation3 + $0x3c] sm:$0x1]  ;;  %v5453_v45 = vrot.slane %v7356_v42, 9 }
 0x304   :  { %v4578_v53 = vld [vmem:[#allocation3 + $0x10] sm:$0xe]  ;;  %v3493_v16 = vrot.slane %v3416_v0, 5  ;;  %v5454_v38 = vrot.slane %v3417_v49, 9  ;;  %v4579_v44 = vld [vmem:[#allocation3 + $0x14] sm:$0x1] }
 0x305   :  { %v4580_v4 = vld [vmem:[#allocation3 + $0x18] sm:$0xe]  ;;  %v3497_v34 = vrot.slane %v3418_v15, 5  ;;  %v4581_v63 = vld [vmem:[#allocation3 + $0x1c] sm:$0x1]  ;;  %v5527_v24 = vrot.slane %v4578_v53, 9  ;;  %v3129_v15 = vor.u32 %v7084_v2, %v7079_v18  ;;  %v7423_v18 = vsel %vm6208_vm10, %v5448_v56, %v3473_v7 }
 0x306   :  { %v7377_v52 = vld [vmem:[#allocation3 + $0x38] sm:$0xe]  ;;  %v4644_v8 = vrot.slane %v4579_v44, 5  ;;  %v5528_v37 = vrot.slane %v4580_v4, 9  ;;  %v7379_v3 = vld [vmem:[#allocation3 + $0x3c] sm:$0x1]  ;;  %4240 = vrot.lane.b32.xlu0 %v5724_v57, %s5780_s3  ;;  %v3482_v57 = vsel %vm6208_vm10, %v5450_v11, %v3481_v50  ;;  %v4408_v2 = vsel %vm6227_vm11, %v7269_v55, %v7090_v26 }
 0x307   :  { %v7381_v42 = vld [vmem:[#allocation3 + $0x40] sm:$0xe]  ;;  %v8211_v1 = vrot.slane %v7056_v10, 5  ;;  %v8213_v60 = vrot.slane %v7062_v5, 5  ;;  %v8214_v23 = vrot.slane %v7060_v25, 9  ;;  %v4648_v0 = vrot.slane %v4581_v63, 5 }
 0x308   :  { %v5726_v40 = vld [vmem:[#allocation3 + $0x78] ss:$8 sps:$4 sm:$0xff]   ;;  %v4005_v49 = vld [vmem:[#allocation3 + $0x44] sm:$0x1]  ;;  %v5493_v10 = vrot.slane %v7377_v52, 9  ;;  %v3241_v5 = vor.u32 %v7093_v59, %v7086_v61  ;;  %v3478_v25 = vsel %vm6208_vm10, %v5449_v47, %v3477_v58  ;;  %v4080_v28 = vrot.slane %v7379_v3, 5 }
 0x309   :  { %v7389_v35 = vsel %vm6208_vm10, %v8212_v9, %v8211_v1  ;;  %v7397_v41 = vsel %vm6208_vm10, %v8214_v23, %v8213_v60  ;;  %v5725_v53 = vld [vmem:[#allocation3 + $0x88] ss:$8 sps:$4 sm:$0xff]   ;;  %v5494_v17 = vrot.slane %v7381_v42, 9  ;;  %v7448_v58 = vsel %vm6208_vm10, %v5487_v6, %v4056_v14  ;;  %v4583_v39 = vld [vmem:[#allocation3 + $0x24] sm:$0x1] }
 0x30a   :  { %3658 = vrot.lane.b32.xlu1 %v5725_v53, %s5773_s11  ;;  %v5727_v47 = vld [vmem:[#allocation3 + $0x90] ss:$8 sps:$4 sm:$0xff]   ;;  %v7452_v22 = vsel %vm6208_vm10, %v5488_v31, %v4060_v13  ;;  %v4084_v11 = vrot.slane %v4005_v49, 5  ;;  %v5529_v12 = vrot.slane %v4582_v62, 9  ;;  %3656 = vrot.lane.b32.xlu0 %v5726_v40, %s5773_s11  ;;  %v5728_v51 = vld [vmem:[#allocation3 + $0x80] ss:$8 sps:$4 sm:$0xff]   ;;  %v7457_v19 = vsel %vm6208_vm10, %v5453_v45, %v3493_v16 }
 0x30b   :  { %v7461_v50 = vsel %vm6208_vm10, %v5454_v38, %v3497_v34  ;;  %v4584_v56 = vld [vmem:[#allocation3 + $0x28] sm:$0xe]  ;;  %v4585_v7 = vld [vmem:[#allocation3 + $0x2c] sm:$0x1]  ;;  %v4652_v46 = vrot.slane %v4583_v39, 5  ;;  %v7463_v48 = vrot.slane %v3129_v15, 4  ;;  %v7467_v54 = vsel %vm6208_vm10, %v5527_v24, %v4644_v8 }
 0x30c   :  { %v7471_v30 = vsel %vm6208_vm10, %v5528_v37, %v4648_v0  ;;  %v5530_v6 = vrot.slane %v4584_v56, 9  ;;  %v4656_v14 = vrot.slane %v4585_v7, 5  ;;  %v3423_v31 = vld [vmem:[#allocation3 + $0x60] sm:$0xe]  ;;  %v3424_v13 = vld [vmem:[#allocation3 + $0x64] sm:$0x1]  ;;  %v5464_v45 = vcombine.low %v3478_v25, %v3482_v57 }
 0x30d   :  { %v5463_v16 = vcombine.low %v7375_v36, %v7423_v18  ;;  %v3425_v38 = vld [vmem:[#allocation3 + $0x68] sm:$0xe]  ;;  %v3426_v44 = vld [vmem:[#allocation3 + $0x6c] sm:$0x1]  ;;  %v5457_v4 = vrot.slane %v3423_v31, 9  ;;  %v3509_v34 = vrot.slane %v3424_v13, 5  ;;  %v5504_v63 = vcombine.low %v7435_v29, %v7441_v33 }
 0x30e   :  { %4246 = vrot.lane.b32.xlu1 %v5727_v47, %s5780_s3  ;;  %v5503_v24 = vcombine.low %v7448_v58, %v7452_v22  ;;  %v5458_v52 = vrot.slane %v3425_v38, 9  ;;  %v3513_v8 = vrot.slane %v3426_v44, 5  ;;  %v3411_v37 = vld [vmem:[#allocation3 + $0x20] sm:$0xe]  ;;  %v3412_v3 = vld [vmem:[#allocation3 + $0x24] sm:$0x1]  ;;  %4244 = vrot.lane.b32.xlu0 %v5728_v51, %s5780_s3  ;;  %v5466_v36 = vcombine.low %v7457_v19, %v7461_v50 }
 0x30f   :  { %v5543_v42 = vcombine.low %v7467_v54, %v7471_v30  ;;  %v3413_v1 = vld [vmem:[#allocation3 + $0x28] sm:$0xe]  ;;  %v3414_v9 = vld [vmem:[#allocation3 + $0x2c] sm:$0x1]  ;;  %v5451_v60 = vrot.slane %v3411_v37, 9  ;;  %v3485_v23 = vrot.slane %v3412_v3, 5  ;;  %v7487_v40 = vsel %vm6208_vm10, %v5493_v10, %v4080_v28 }
 0x310   :  { %v7491_v0 = vsel %vm6208_vm10, %v5494_v17, %v4084_v11  ;;  %v5452_v49 = vrot.slane %v3413_v1, 9  ;;  %v3489_v62 = vrot.slane %v3414_v9, 5  ;;  %v4010_v15 = vld [vmem:[#allocation3 + $0x68] sm:$0xe]  ;;  %v4011_v53 = vld [vmem:[#allocation3 + $0x6c] sm:$0x1]  ;;  %v7495_v25 = vsel %vm6208_vm10, %v5529_v12, %v4652_v46 }
 0x311   :  { %v7499_v57 = vsel %vm6208_vm10, %v5530_v6, %v4656_v14  ;;  %v4012_v18 = vld [vmem:[#allocation3 + $0x70] sm:$0xe]  ;;  %v4013_v29 = vld [vmem:[#allocation3 + $0x74] sm:$0x1]  ;;  %v5497_v10 = vrot.slane %v4010_v15, 9  ;;  %v4096_v33 = vrot.slane %v4011_v53, 5  ;;  %v7504_v28 = vsel %vm6208_vm10, %v5457_v4, %v3509_v34 }
 0x312   :  { %3557 = vrot.lane.b32.xlu1 %v5464_v45, %s5778_s16  ;;  %v7508_v17 = vsel %vm6208_vm10, %v5458_v52, %v3513_v8  ;;  %v5498_v47 = vrot.slane %v4012_v18, 9  ;;  %v4100_v58 = vrot.slane %v4013_v29, 5  ;;  %v3998_v22 = vld [vmem:[#allocation3 + $0x28] sm:$0xe]  ;;  %v3999_v11 = vld [vmem:[#allocation3 + $0x2c] sm:$0x1]  ;;  %3555 = vrot.lane.b32.xlu0 %v5463_v16, %s5778_s16  ;;  %v7513_v39 = vsel %vm6208_vm10, %v5451_v60, %v3485_v23 }
 0x313   :  { %v7517_v12 = vsel %vm6208_vm10, %v5452_v49, %v3489_v62  ;;  %v4000_v51 = vld [vmem:[#allocation3 + $0x30] sm:$0xe]  ;;  %v4001_v56 = vld [vmem:[#allocation3 + $0x34] sm:$0x1]  ;;  %v5491_v7 = vrot.slane %v3998_v22, 9  ;;  %v4072_v46 = vrot.slane %v3999_v11, 5  ;;  %v7521_v6 = vsel %vm6208_vm10, %v5497_v10, %v4096_v33 }
 0x314   :  { %v7525_v14 = vsel %vm6208_vm10, %v5498_v47, %v4100_v58  ;;  %v5492_v31 = vrot.slane %v4000_v51, 9  ;;  %v4076_v13 = vrot.slane %v4001_v56, 5  ;;  %v3431_v45 = vld [vmem:[#allocation3 + $0x80] sm:$0xe]  ;;  %v3432_v16 = vld [vmem:[#allocation3 + $0x84] sm:$0x1]  ;;  %v5506_v38 = vcombine.low %v7487_v40, %v7491_v0 }
 0x315   :  { %v3433_v44 = vld [vmem:[#allocation3 + $0x88] sm:$0xe]  ;;  %v3434_v4 = vld [vmem:[#allocation3 + $0x8c] sm:$0x1]  ;;  %v5461_v34 = vrot.slane %v3431_v45, 9  ;;  %v3525_v52 = vrot.slane %v3432_v16, 5  ;;  %v3135_v8 = vsel %vm6227_vm11, %v7463_v48, %v7300_v27  ;;  %v5544_v37 = vcombine.low %v7495_v25, %v7499_v57 }
 0x316   :  { %4144 = vrot.lane.b32.xlu1 %v5504_v63, %s5781_s26  ;;  %v5468_v3 = vcombine.low %v7504_v28, %v7508_v17  ;;  %v5462_v1 = vrot.slane %v3433_v44, 9  ;;  %v3529_v9 = vrot.slane %v3434_v4, 5  ;;  %v4586_v60 = vld [vmem:[#allocation3 + $0x30] sm:$0xe]  ;;  %v4587_v23 = vld [vmem:[#allocation3 + $0x34] sm:$0x1]  ;;  %4142 = vrot.lane.b32.xlu0 %v5503_v24, %s5781_s26  ;;  %v5465_v40 = vcombine.low %v7513_v39, %v7517_v12 }
 0x317   :  { %v5508_v0 = vcombine.low %v7521_v6, %v7525_v14  ;;  %v4588_v49 = vld [vmem:[#allocation3 + $0x38] sm:$0xe]  ;;  %v4589_v63 = vld [vmem:[#allocation3 + $0x3c] sm:$0x1]  ;;  %v5531_v62 = vrot.slane %v4586_v60, 9  ;;  %v4660_v15 = vrot.slane %v4587_v23, 5  ;;  %v7545_v53 = vsel %vm6208_vm10, %v5491_v7, %v4072_v46 }
 0x318   :  { %v7549_v25 = vsel %vm6208_vm10, %v5492_v31, %v4076_v13  ;;  %v5532_v57 = vrot.slane %v4588_v49, 9  ;;  %v4664_v24 = vrot.slane %v4589_v63, 5  ;;  %v4018_v18 = vld [vmem:[#allocation3 + $0x88] sm:$0xe]  ;;  %v4019_v29 = vld [vmem:[#allocation3 + $0x8c] sm:$0x1]  ;;  %v7553_v10 = vsel %vm6208_vm10, %v5461_v34, %v3525_v52 }
 0x319   :  { %v7557_v33 = vsel %vm6208_vm10, %v5462_v1, %v3529_v9  ;;  %v4020_v47 = vld [vmem:[#allocation3 + $0x90] sm:$0xe]  ;;  %v4021_v58 = vld [vmem:[#allocation3 + $0x94] sm:$0x1]  ;;  %v5501_v22 = vrot.slane %v4018_v18, 9  ;;  %v4112_v11 = vrot.slane %v4019_v29, 5  ;;  %v7565_v51 = vsel %vm6208_vm10, %v5531_v62, %v4660_v15 }
 0x31a   :  { %3561 = vrot.lane.b32.xlu1 %v5466_v36, %s5778_s16  ;;  %v7569_v56 = vsel %vm6208_vm10, %v5532_v57, %v4664_v24  ;;  %v5502_v7 = vrot.slane %v4020_v47, 9  ;;  %v4116_v46 = vrot.slane %v4021_v58, 5  ;;  %v4590_v31 = vld [vmem:[#allocation3 + $0x40] sm:$0xe]  ;;  %v4591_v13 = vld [vmem:[#allocation3 + $0x44] sm:$0x1]  ;;  %4730 = vrot.lane.b32.xlu0 %v5543_v42, %s5782_s27  ;;  %v5505_v19 = vcombine.low %v7545_v53, %v7549_v25 }
 0x31b   :  { %v7579_v50 = vsel %vm6208_vm10, %v5501_v22, %v4112_v11  ;;  %v5533_v36 = vrot.slane %v4590_v31, 9  ;;  %v4668_v45 = vrot.slane %v4591_v13, 5  ;;  %v3094_v16 = vld [vmem:[#allocation3 + $0x10] sm:$0xf]  ;;  %v3095_v44 = vld [vmem:[#allocation3 + $0x14] sm:$0x1]  ;;  %v5470_v4 = vcombine.low %v7553_v10, %v7557_v33 }
 0x31c   :  { %v7585_v34 = vsel %vm6208_vm10, %v5502_v7, %v4116_v46  ;;  %v3096_v54 = vld [vmem:[#allocation3 + $0x18] sm:$0xf]  ;;  %v3097_v30 = vld [vmem:[#allocation3 + $0x1c] sm:$0x1]  ;;  %v3151_v42 = vshrl.u32 %v3094_v16, 16  ;;  %v3154_v52 = vshll.u32 %v3094_v16, 16  ;;  %v5545_v1 = vcombine.low %v7565_v51, %v7569_v56 }
 0x31d   :  { %v7591_v9 = vsel %vm6208_vm10, %v5533_v36, %v4668_v45  ;;  %v3160_v60 = vshll.u32 %v3095_v44, 16  ;;  %v3165_v23 = vshrl.u32 %v3096_v54, 16  ;;  %v3421_v49 = vld [vmem:[#allocation3 + $0x58] sm:$0xe]  ;;  %v3422_v63 = vld [vmem:[#allocation3 + $0x5c] sm:$0x1]  ;;  %v5510_v62 = vcombine.low %v7579_v50, %v7585_v34 }
 0x31e   :  { %4148 = vrot.lane.b32.xlu1 %v5506_v38, %s5781_s26  ;;  %v3153_v15 = vrot.slane %v3151_v42, 4  ;;  %v3156_v57 = vrot.slane %v3154_v52, 5  ;;  %v3168_v24 = vshll.u32 %v3096_v54, 16  ;;  %v3681_v18 = vld [vmem:[#allocation3 + $0x18] sm:$0xf]  ;;  %4732 = vrot.lane.b32.xlu0 %v5544_v37, %s5782_s27  ;;  %v3174_v58 = vshll.u32 %v3097_v30, 16 }
 0x31f   :  { %v3162_v29 = vrot.slane %v3160_v60, 5  ;;  %v3167_v47 = vrot.slane %v3165_v23, 4  ;;  %v5456_v22 = vrot.slane %v3421_v49, 9  ;;  %v3682_v11 = vld [vmem:[#allocation3 + $0x1c] sm:$0x1]  ;;  %v5546_v7 = vcombine.low %v7591_v9, %v7389_v35 }
 0x320   :  { %v3157_v46 = vor.u32 %v3156_v57, %v3153_v15  ;;  %v3170_v31 = vrot.slane %v3168_v24, 5  ;;  %v3505_v38 = vrot.slane %v3422_v63, 5  ;;  %v3683_v13 = vld [vmem:[#allocation3 + $0x20] sm:$0xf]  ;;  %v3684_v36 = vld [vmem:[#allocation3 + $0x24] sm:$0x1] }
 0x321   :  { %v3176_v45 = vrot.slane %v3174_v58, 5  ;;  %v3738_v16 = vshrl.u32 %v3681_v18, 16  ;;  %v3741_v44 = vshll.u32 %v3681_v18, 16  ;;  %v3747_v54 = vshll.u32 %v3682_v11, 16  ;;  %v4006_v42 = vld [vmem:[#allocation3 + $0x58] sm:$0xe] }
 0x322   :  { %3565 = vrot.lane.b32.xlu1 %v5468_v3, %s5778_s16  ;;  %v3158_v37 = vrot.slane %v3157_v46, 4  ;;  %v3171_v30 = vor.u32 %v3170_v31, %v3167_v47  ;;  %v7605_v52 = vsel %vm6208_vm10, %v5456_v22, %v3505_v38  ;;  %v3752_v60 = vshrl.u32 %v3683_v13, 16  ;;  %v4007_v23 = vld [vmem:[#allocation3 + $0x5c] sm:$0x1]  ;;  %v4008_v49 = vld [vmem:[#allocation3 + $0x60] sm:$0xe]  ;;  %3559 = vrot.lane.b32.xlu0 %v5465_v40, %s5778_s16 }
 0x323   :  { %v5467_v63 = vcombine.low %v7397_v41, %v7605_v52  ;;  %v3740_v15 = vrot.slane %v3738_v16, 4  ;;  %v3743_v28 = vrot.slane %v3741_v44, 5  ;;  %v3749_v17 = vrot.slane %v3747_v54, 5  ;;  %v4009_v3 = vld [vmem:[#allocation3 + $0x64] sm:$0x1] }
 0x324   :  { %v3163_v57 = vsel %vm6227_vm11, %v3158_v37, %v3162_v29  ;;  %v3172_v24 = vrot.slane %v3171_v30, 4  ;;  %v3754_v18 = vrot.slane %v3752_v60, 4  ;;  %v3755_v47 = vshll.u32 %v3683_v13, 16  ;;  %v4269_v58 = vld [vmem:[#allocation3 + $0x20] sm:$0xf] }
 0x325   :  { %v3744_v22 = vor.u32 %v3743_v28, %v3740_v15  ;;  %v3761_v11 = vshll.u32 %v3684_v36, 16  ;;  %v5495_v46 = vrot.slane %v4006_v42, 9  ;;  %v4088_v31 = vrot.slane %v4007_v23, 5  ;;  %v4270_v39 = vld [vmem:[#allocation3 + $0x24] sm:$0x1] }
 0x326   :  { %4152 = vrot.lane.b32.xlu1 %v5508_v0, %s5781_s26  ;;  %v3177_v12 = vsel %vm6227_vm11, %v3172_v24, %v3176_v45  ;;  %v3757_v40 = vrot.slane %v3755_v47, 5  ;;  %v5496_v38 = vrot.slane %v4008_v49, 9  ;;  %v4092_v29 = vrot.slane %v4009_v3, 5  ;;  %v4271_v16 = vld [vmem:[#allocation3 + $0x28] sm:$0xf]  ;;  %4146 = vrot.lane.b32.xlu0 %v5505_v19, %s5781_s26 }
 0x327   :  { %v5440_v13 = vcombine.low %v3163_v57, %v3177_v12  ;;  %v3745_v36 = vrot.slane %v3744_v22, 4  ;;  %v3763_v44 = vrot.slane %v3761_v11, 5  ;;  %v7627_v54 = vsel %vm6208_vm10, %v5495_v46, %v4088_v31  ;;  %v4272_v0 = vld [vmem:[#allocation3 + $0x2c] sm:$0x1]  ;;  %v4594_v37 = vld [vmem:[#allocation3 + $0x60] sm:$0xe] }
 0x328   :  { %v3758_v6 = vor.u32 %v3757_v40, %v3754_v18  ;;  %v7631_v14 = vsel %vm6208_vm10, %v5496_v38, %v4092_v29  ;;  %v4326_v45 = vshrl.u32 %v4269_v58, 16  ;;  %v4329_v42 = vshll.u32 %v4269_v58, 16  ;;  %v4595_v60 = vld [vmem:[#allocation3 + $0x64] sm:$0x1]  ;;  %v4596_v23 = vld [vmem:[#allocation3 + $0x68] sm:$0xe] }
 0x329   :  { %v3750_v53 = vsel %vm6227_vm11, %v3745_v36, %v3749_v17  ;;  %v5507_v25 = vcombine.low %v7627_v54, %v7631_v14  ;;  %v4335_v19 = vshll.u32 %v4270_v39, 16  ;;  %v4340_v30 = vshrl.u32 %v4271_v16, 16  ;;  %v4597_v57 = vld [vmem:[#allocation3 + $0x6c] sm:$0x1]  ;;  %v3098_v58 = vld [vmem:[#allocation3 + $0x20] sm:$0xf] }
 0x32a   :  { %3569 = vrot.lane.b32.xlu1 %v5470_v4, %s5778_s16  ;;  %v3759_v49 = vrot.slane %v3758_v6, 4  ;;  %v4328_v15 = vrot.slane %v4326_v45, 4  ;;  %v4331_v28 = vrot.slane %v4329_v42, 5  ;;  %v4343_v3 = vshll.u32 %v4271_v16, 16  ;;  %4734 = vrot.lane.b32.xlu0 %v5545_v1, %s5782_s27  ;;  %v3099_v11 = vld [vmem:[#allocation3 + $0x24] sm:$0x1] }
 0x32b   :  { %v4337_v17 = vrot.slane %v4335_v19, 5  ;;  %v4342_v24 = vrot.slane %v4340_v30, 4  ;;  %v4349_v18 = vshll.u32 %v4272_v0, 16  ;;  %v5535_v47 = vrot.slane %v4594_v37, 9  ;;  %v3100_v46 = vld [vmem:[#allocation3 + $0x28] sm:$0xf] }
 0x32c   :  { %v3764_v22 = vsel %vm6227_vm11, %v3759_v49, %v3763_v44  ;;  %v4332_v10 = vor.u32 %v4331_v28, %v4328_v15  ;;  %v4345_v33 = vrot.slane %v4343_v3, 5  ;;  %v4676_v4 = vrot.slane %v4595_v60, 5  ;;  %v3101_v38 = vld [vmem:[#allocation3 + $0x2c] sm:$0x1]  ;;  %v4598_v16 = vld [vmem:[#allocation3 + $0x70] sm:$0xe] }
 0x32d   :  { %v5480_v31 = vcombine.low %v3750_v53, %v3764_v22  ;;  %v4351_v39 = vrot.slane %v4349_v18, 5  ;;  %v5536_v12 = vrot.slane %v4596_v23, 9  ;;  %v4680_v40 = vrot.slane %v4597_v57, 5  ;;  %v4599_v44 = vld [vmem:[#allocation3 + $0x74] sm:$0x1] }
 0x32e   :  { %4156 = vrot.lane.b32.xlu1 %v5510_v62, %s5781_s26  ;;  %v4333_v51 = vrot.slane %v4332_v10, 4  ;;  %v4346_v56 = vor.u32 %v4345_v33, %v4342_v24  ;;  %v7653_v1 = vsel %vm6208_vm10, %v5535_v47, %v4676_v4  ;;  %v3179_v29 = vshrl.u32 %v3098_v58, 16  ;;  %4736 = vrot.lane.b32.xlu0 %v5546_v7, %s5782_s27  ;;  %v4600_v37 = vld [vmem:[#allocation3 + $0x78] sm:$0xe]  ;;  %v4601_v53 = vld [vmem:[#allocation3 + $0x7c] sm:$0x1] }
 0x32f   :  { %v7661_v36 = vsel %vm6208_vm10, %v5536_v12, %v4680_v40  ;;  %v3182_v50 = vshll.u32 %v3098_v58, 16  ;;  %v3188_v34 = vshll.u32 %v3099_v11, 16  ;;  %v3193_v62 = vshrl.u32 %v3100_v46, 16  ;;  %v3102_v30 = vld [vmem:[#allocation3 + $0x30] sm:$0xf] }
 0x330   :  { %v4338_v6 = vsel %vm6227_vm11, %v4333_v51, %v4337_v17  ;;  %v4347_v0 = vrot.slane %v4346_v56, 4  ;;  %v5547_v45 = vcombine.low %v7653_v1, %v7661_v36  ;;  %v3181_v42 = vrot.slane %v3179_v29, 4  ;;  %v3103_v28 = vld [vmem:[#allocation3 + $0x34] sm:$0x1]  ;;  %v3104_v18 = vld [vmem:[#allocation3 + $0x38] sm:$0xf] }
 0x331   :  { %v3184_v35 = vrot.slane %v3182_v50, 5  ;;  %v3190_v9 = vrot.slane %v3188_v34, 5  ;;  %v3195_v7 = vrot.slane %v3193_v62, 4  ;;  %v3196_v19 = vshll.u32 %v3100_v46, 16  ;;  %v3105_v22 = vld [vmem:[#allocation3 + $0x3c] sm:$0x1] }
 0x332   :  { %3372 = vrot.lane.b32.xlu1 %v5440_v13, %s5774_s12  ;;  %v4352_v60 = vsel %vm6227_vm11, %v4347_v0, %v4351_v39  ;;  %v3202_v23 = vshll.u32 %v3101_v38, 16  ;;  %v5537_v49 = vrot.slane %v4598_v16, 9  ;;  %v4684_v15 = vrot.slane %v4599_v44, 5  ;;  %3563 = vrot.lane.b32.xlu0 %v5467_v63, %s5778_s16  ;;  %v3427_v39 = vld [vmem:[#allocation3 + $0x70] sm:$0xe] }
 0x333   :  { %v5520_v3 = vcombine.low %v4338_v6, %v4352_v60  ;;  %v3185_v57 = vor.u32 %v3184_v35, %v3181_v42  ;;  %v3198_v17 = vrot.slane %v3196_v19, 5  ;;  %v5538_v24 = vrot.slane %v4600_v37, 9  ;;  %v3428_v40 = vld [vmem:[#allocation3 + $0x74] sm:$0x1]  ;;  %v3430_v29 = vld [vmem:[#allocation3 + $0x7c] sm:$0x1] }
 0x334   :  { %v3204_v47 = vrot.slane %v3202_v23, 5  ;;  %v7676_v13 = vsel %vm6208_vm10, %v5537_v49, %v4684_v15  ;;  %v4688_v58 = vrot.slane %v4601_v53, 5  ;;  %v3207_v10 = vshrl.u32 %v3102_v30, 16  ;;  %v3689_v62 = vld [vmem:[#allocation3 + $0x38] sm:$0xf] }
 0x335   :  { %v3186_v33 = vrot.slane %v3185_v57, 4  ;;  %v3199_v4 = vor.u32 %v3198_v17, %v3195_v7  ;;  %v3210_v11 = vshll.u32 %v3102_v30, 16  ;;  %v3216_v46 = vshll.u32 %v3103_v28, 16  ;;  %v3691_v0 = vld [vmem:[#allocation3 + $0x40] sm:$0xf] }
 0x336   :  { %3959 = vrot.lane.b32.xlu1 %v5480_v31, %s5776_s14  ;;  %v4689_v41 = vsel %vm6208_vm10, %v5538_v24, %v4688_v58  ;;  %v3209_v52 = vrot.slane %v3207_v10, 4  ;;  %v3221_v63 = vshrl.u32 %v3104_v18, 16  ;;  %v3224_v12 = vshll.u32 %v3104_v18, 16  ;;  %4150 = vrot.lane.b32.xlu0 %v5507_v25, %s5781_s26  ;;  %v3429_v31 = vld [vmem:[#allocation3 + $0x78] sm:$0xe] }
 0x337   :  { %v3191_v51 = vsel %vm6227_vm11, %v3186_v33, %v3190_v9  ;;  %v3200_v56 = vrot.slane %v3199_v4, 4  ;;  %v5548_v1 = vcombine.low %v7676_v13, %v4689_v41  ;;  %v3212_v38 = vrot.slane %v3210_v11, 5  ;;  %v3690_v25 = vld [vmem:[#allocation3 + $0x3c] sm:$0x1]  ;;  %v3692_v30 = vld [vmem:[#allocation3 + $0x44] sm:$0x1] }
 0x338   :  { %v3218_v16 = vrot.slane %v3216_v46, 5  ;;  %v3223_v36 = vrot.slane %v3221_v63, 4  ;;  %v3226_v50 = vrot.slane %v3224_v12, 5  ;;  %v3230_v34 = vshll.u32 %v3105_v22, 16  ;;  %v4014_v57 = vld [vmem:[#allocation3 + $0x78] sm:$0xe] }
 0x339   :  { %v3205_v44 = vsel %vm6227_vm11, %v3200_v56, %v3204_v47  ;;  %v3213_v6 = vor.u32 %v3212_v38, %v3209_v52  ;;  %v5459_v54 = vrot.slane %v3427_v39, 9  ;;  %v3517_v14 = vrot.slane %v3428_v40, 5  ;;  %v4015_v18 = vld [vmem:[#allocation3 + $0x7c] sm:$0x1]  ;;  %v4016_v47 = vld [vmem:[#allocation3 + $0x80] sm:$0xe] }
 0x33a   :  { %4547 = vrot.lane.b32.xlu1 %v5520_v3, %s5783_s28  ;;  %v5441_v42 = vcombine.low %v3191_v51, %v3205_v44  ;;  %v3227_v37 = vor.u32 %v3226_v50, %v3223_v36  ;;  %v3232_v53 = vrot.slane %v3230_v34, 5  ;;  %v5460_v35 = vrot.slane %v3429_v31, 9  ;;  %4738 = vrot.lane.b32.xlu0 %v5547_v45, %s5782_s27  ;;  %v4017_v33 = vld [vmem:[#allocation3 + $0x84] sm:$0x1]  ;;  %v4277_v4 = vld [vmem:[#allocation3 + $0x40] sm:$0xf] }
 0x33b   :  { %v3214_v9 = vrot.slane %v3213_v6, 4  ;;  %v3518_v7 = vsel %vm6208_vm10, %v5459_v54, %v3517_v14  ;;  %v3521_v19 = vrot.slane %v3430_v29, 5  ;;  %v3794_v60 = vshrl.u32 %v3689_v62, 16  ;;  %v4278_v52 = vld [vmem:[#allocation3 + $0x44] sm:$0x1] }
 0x33c   :  { %v3228_v23 = vrot.slane %v3227_v37, 4  ;;  %v3797_v49 = vshll.u32 %v3689_v62, 16  ;;  %v3803_v15 = vshll.u32 %v3690_v25, 16  ;;  %v3808_v28 = vshrl.u32 %v3691_v0, 16  ;;  %v5732_v63 = vld [vmem:[%s8195_s4] sm:$0xff]  }
 0x33d   :  { %v3219_v3 = vsel %vm6227_vm11, %v3214_v9, %v3218_v16  ;;  %v3522_v17 = vsel %vm6208_vm10, %v5460_v35, %v3521_v19  ;;  %v3796_v24 = vrot.slane %v3794_v60, 4  ;;  %v3811_v45 = vshll.u32 %v3691_v0, 16  ;;  %v3092_v38 = vld [vmem:[#allocation3 + $0x8] sm:$0xf]  ;;  %5642 = vmatprep.subr.bf16.mxu1 %v5732_v63  ;;  %v3093_v44 = vld [vmem:[#allocation3 + $0xc] sm:$0x1] }
 0x33e   :  { %3374 = vrot.lane.b32.xlu1 %v5441_v42, %s5774_s12  ;;  %v3233_v13 = vsel %vm6227_vm11, %v3228_v23, %v3232_v53  ;;  %v5469_v58 = vcombine.low %v3518_v7, %v3522_v17  ;;  %v3799_v22 = vrot.slane %v3797_v49, 5  ;;  %v3805_v10 = vrot.slane %v3803_v15, 5  ;;  %4740 = vrot.lane.b32.xlu0 %v5548_v1, %s5782_s27  ;;  %v3108_v35 = vld [vmem:[#allocation3 + $0x58] sm:$0xf]  ;;  %v3109_v9 = vld [vmem:[#allocation3 + $0x5c] sm:$0x1] }
 0x33f   :  { %v5442_v11 = vcombine.low %v3219_v3, %v3233_v13  ;;  %v3810_v46 = vrot.slane %v3808_v28, 4  ;;  %v3813_v39 = vrot.slane %v3811_v45, 5  ;;  %v3817_v41 = vshll.u32 %v3692_v30, 16  ;;  %5643 = vmatpush3.bf16.msra.mxu1 %v5732_v63  ;;  %v3677_v23 = vld [vmem:[#allocation3 + $0x8] sm:$0xf] }
 0x340   :  { %v3800_v12 = vor.u32 %v3799_v22, %v3796_v24  ;;  %v5499_v40 = vrot.slane %v4014_v57, 9  ;;  %v4104_v51 = vrot.slane %v4015_v18, 5  ;;  %v5500_v56 = vrot.slane %v4016_v47, 9  ;;  %v5734_v49 = vld [vmem:[%s8195_s4 + $0x8] sm:$0xff]   ;;  %v3679_v61 = vld [vmem:[#allocation3 + $0x10] sm:$0xf] }
 0x341   :  { %v3814_v31 = vor.u32 %v3813_v39, %v3810_v46  ;;  %v3819_v29 = vrot.slane %v3817_v41, 5  ;;  %v4108_v16 = vrot.slane %v4017_v33, 5  ;;  %v4382_v36 = vshrl.u32 %v4277_v4, 16  ;;  %v3678_v13 = vld [vmem:[#allocation3 + $0xc] sm:$0x1]  ;;  %5644 = vmatprep.subr.bf16.mxu1 %v5734_v49 }
 0x342   :  { %3376 = vrot.lane.b32.xlu1 %v5442_v11, %s5774_s12  ;;  %v3801_v1 = vrot.slane %v3800_v12, 4  ;;  %v4105_v50 = vsel %vm6208_vm10, %v5499_v40, %v4104_v51  ;;  %v4385_v34 = vshll.u32 %v4277_v4, 16  ;;  %v4391_v62 = vshll.u32 %v4278_v52, 16  ;;  %3567 = vrot.lane.b32.xlu0 %v5469_v58, %s5778_s16  ;;  %v3680_v4 = vld [vmem:[#allocation3 + $0x14] sm:$0x1] }
 0x343   :  { %v3815_v6 = vrot.slane %v3814_v31, 4  ;;  %v4109_v54 = vsel %vm6208_vm10, %v5500_v56, %v4108_v16  ;;  %v4384_v14 = vrot.slane %v4382_v36, 4  ;;  %v3137_v25 = vshrl.u32 %v3092_v38, 16  ;;  %5645 = vmatpush3.bf16.msra.mxu1 %v5734_v49  ;;  %v3110_v63 = vld [vmem:[#allocation3 + $0x60] sm:$0xf] }
 0x344   :  { %v3806_v0 = vsel %vm6227_vm11, %v3801_v1, %v3805_v10  ;;  %v5509_v42 = vcombine.low %v4105_v50, %v4109_v54  ;;  %v4387_v37 = vrot.slane %v4385_v34, 5  ;;  %v4393_v53 = vrot.slane %v4391_v62, 5  ;;  %v3111_v34 = vld [vmem:[#allocation3 + $0x64] sm:$0x1]  ;;  %v3112_v62 = vld [vmem:[#allocation3 + $0x68] sm:$0xf] }
 0x345   :  { %v3820_v7 = vsel %vm6227_vm11, %v3815_v6, %v3819_v29  ;;  %v3139_v19 = vrot.slane %v3137_v25, 4  ;;  %v3140_v30 = vshll.u32 %v3092_v38, 16  ;;  %v3146_v60 = vshll.u32 %v3093_v44, 16  ;;  %v3113_v54 = vld [vmem:[#allocation3 + $0x6c] sm:$0x1] }
 0x346   :  { %v5482_v15 = vcombine.low %v3806_v0, %v3820_v7  ;;  %v4388_v28 = vor.u32 %v4387_v37, %v4384_v14  ;;  %v3242_v57 = vrot.slane %v3241_v5, 4  ;;  %v8215_v3 = vshll.u32 %v7146_v21, 16  ;;  %4154 = vrot.lane.b32.xlu0 %v5509_v42, %s5781_s26  ;;  %v5736_v14 = vld [vmem:[%s8195_s4 + $0x10] sm:$0xff]  }
 0x347   :  { %v3142_v24 = vrot.slane %v3140_v30, 5  ;;  %v3148_v45 = vrot.slane %v3146_v60, 5  ;;  %v3249_v18 = vshrl.u32 %v3108_v35, 16  ;;  %v3252_v47 = vshll.u32 %v3108_v35, 16  ;;  %5646 = vmatprep.subr.bf16.mxu1 %v5736_v14 }
 0x348   :  { %v3246_v17 = vrot.slane %v8215_v3, 5  ;;  %3963 = vrot.lane.b32.xlu1 %v5482_v15, %s5776_s14  ;;  %v4389_v58 = vrot.slane %v4388_v28, 4  ;;  %v3258_v10 = vshll.u32 %v3109_v9, 16  ;;  %v3710_v59 = vshrl.u32 %v3677_v23, 16  ;;  %v4266_v9 = vld [vmem:[#allocation3 + $0x14] sm:$0x1]  ;;  %5647 = vmatpush3.bf16.msra.mxu1 %v5736_v14 }
 0x349   :  { %v3143_v21 = vor.u32 %v3142_v24, %v3139_v19  ;;  %v3251_v5 = vrot.slane %v3249_v18, 4  ;;  %v3254_v33 = vrot.slane %v3252_v47, 5  ;;  %v3713_v11 = vshll.u32 %v3677_v23, 16  ;;  %v4267_v23 = vld [vmem:[#allocation3 + $0x18] sm:$0xf] }
 0x34a   :  { %v3247_v22 = vsel %vm6227_vm11, %v3242_v57, %v3246_v17  ;;  %v4394_v46 = vsel %vm6227_vm11, %v4389_v58, %v4393_v53  ;;  %v3260_v39 = vrot.slane %v3258_v10, 5  ;;  %v3712_v41 = vrot.slane %v3710_v59, 4  ;;  %v4265_v53 = vld [vmem:[#allocation3 + $0x10] sm:$0xf]  ;;  %v3697_v10 = vld [vmem:[#allocation3 + $0x68] sm:$0xf] }
 0x34b   :  { %v3719_v52 = vshll.u32 %v3678_v13, 16  ;;  %v5522_v12 = vcombine.low %v4394_v46, %v4408_v2  ;;  %v3144_v40 = vrot.slane %v3143_v21, 4  ;;  %v3255_v51 = vor.u32 %v3254_v33, %v3251_v5  ;;  %v3698_v33 = vld [vmem:[#allocation3 + $0x6c] sm:$0x1] }
 0x34c   :  { %v3715_v56 = vrot.slane %v3713_v11, 5  ;;  %v3724_v31 = vshrl.u32 %v3679_v61, 16  ;;  %v3727_v29 = vshll.u32 %v3679_v61, 16  ;;  %v3733_v16 = vshll.u32 %v3680_v4, 16 }
 0x34d   :  { %v3721_v38 = vrot.slane %v3719_v52, 5  ;;  %4551 = vrot.lane.b32.xlu1 %v5522_v12, %s5783_s28  ;;  %v3149_v36 = vsel %vm6227_vm11, %v3144_v40, %v3148_v45  ;;  %v3256_v1 = vrot.slane %v3255_v51, 4  ;;  %v3263_v44 = vshrl.u32 %v3110_v63, 16  ;;  %v4268_v45 = vld [vmem:[#allocation3 + $0x1c] sm:$0x1] }
 0x34e   :  { %v3716_v50 = vor.u32 %v3715_v56, %v3712_v41  ;;  %v5439_v26 = vcombine.low %v3135_v8, %v3149_v36  ;;  %v3726_v55 = vrot.slane %v3724_v31, 4  ;;  %v3729_v2 = vrot.slane %v3727_v29, 5  ;;  %v3699_v41 = vld [vmem:[#allocation3 + $0x70] sm:$0xf] }
 0x34f   :  { %v3735_v6 = vrot.slane %v3733_v16, 5  ;;  %v3261_v25 = vsel %vm6227_vm11, %v3256_v1, %v3260_v39  ;;  %v3265_v42 = vrot.slane %v3263_v44, 4  ;;  %v3266_v37 = vshll.u32 %v3110_v63, 16 }
 0x350   :  { %v3717_v0 = vrot.slane %v3716_v50, 4  ;;  %3370 = vrot.lane.b32.xlu0 %v5439_v26, %s5774_s12  ;;  %v5443_v35 = vcombine.low %v3247_v22, %v3261_v25  ;;  %v3730_v27 = vor.u32 %v3729_v2, %v3726_v55  ;;  %v3272_v48 = vshll.u32 %v3111_v34, 16  ;;  %v3685_v34 = vld [vmem:[#allocation3 + $0x28] sm:$0xf] }
 0x351   :  { %v3277_v8 = vshrl.u32 %v3112_v62, 16  ;;  %v3268_v19 = vrot.slane %v3266_v37, 5  ;;  %v3280_v30 = vshll.u32 %v3112_v62, 16  ;;  %v3286_v60 = vshll.u32 %v3113_v54, 16  ;;  %v5738_v62 = vld [vmem:[%s8195_s4 + $0x18] sm:$0xff]  }
 0x352   :  { %v3722_v7 = vsel %vm6227_vm11, %v3717_v0, %v3721_v38  ;;  %3378 = vrot.lane.b32.xlu1 %v5443_v35, %s5774_s12  ;;  %v3731_v49 = vrot.slane %v3730_v27, 4  ;;  %v3274_v15 = vrot.slane %v3272_v48, 5  ;;  %v4298_v57 = vshrl.u32 %v4265_v53, 16  ;;  %v3700_v38 = vld [vmem:[#allocation3 + $0x74] sm:$0x1]  ;;  %5648 = vmatprep.subr.bf16.mxu1 %v5738_v62 }
 0x353   :  { %v3279_v28 = vrot.slane %v3277_v8, 4  ;;  %v3269_v3 = vor.u32 %v3268_v19, %v3265_v42  ;;  %v3282_v17 = vrot.slane %v3280_v30, 5  ;;  %v3288_v24 = vrot.slane %v3286_v60, 5  ;;  %v3687_v54 = vld [vmem:[#allocation3 + $0x30] sm:$0xf]  ;;  %5649 = vmatpush3.bf16.msra.mxu1 %v5738_v62 }
 0x354   :  { %v4301_v18 = vshll.u32 %v4265_v53, 16  ;;  %v3736_v47 = vsel %vm6227_vm11, %v3731_v49, %v3735_v6  ;;  %v4300_v13 = vrot.slane %v4298_v57, 4  ;;  %v4307_v58 = vshll.u32 %v4266_v9, 16  ;;  %v3686_v6 = vld [vmem:[#allocation3 + $0x2c] sm:$0x1] }
 0x355   :  { %v4312_v22 = vshrl.u32 %v4267_v23, 16  ;;  %v5479_v61 = vcombine.low %v3722_v7, %v3736_v47  ;;  %v3270_v59 = vrot.slane %v3269_v3, 4  ;;  %v3283_v21 = vor.u32 %v3282_v17, %v3279_v28  ;;  %v3688_v35 = vld [vmem:[#allocation3 + $0x34] sm:$0x1]  ;;  %v7764_v8 = vpop.permute.xlu1 %3646  ;;  %v4285_v60 = vld [vmem:[#allocation3 + $0x70] sm:$0xf] }
 0x356   :  { %v4303_v5 = vrot.slane %v4301_v18, 5  ;;  %v4309_v4 = vrot.slane %v4307_v58, 5  ;;  %v4315_v46 = vshll.u32 %v4267_v23, 16  ;;  %v4321_v39 = vshll.u32 %v4268_v45, 16  ;;  %v4286_v57 = vld [vmem:[#allocation3 + $0x74] sm:$0x1] }
 0x357   :  { %v4314_v11 = vrot.slane %v4312_v22, 4  ;;  %3957 = vrot.lane.b32.xlu0 %v5479_v61, %s5776_s14  ;;  %v3275_v52 = vsel %vm6227_vm11, %v3270_v59, %v3274_v15  ;;  %v3284_v63 = vrot.slane %v3283_v21, 4  ;;  %v3850_v40 = vshrl.u32 %v3697_v10, 16  ;;  %v4287_v18 = vld [vmem:[#allocation3 + $0x78] sm:$0xf] }
 0x358   :  { %v4304_v12 = vor.u32 %v4303_v5, %v4300_v13  ;;  %v4317_v51 = vrot.slane %v4315_v46, 5  ;;  %v4323_v56 = vrot.slane %v4321_v39, 5  ;;  %v3853_v31 = vshll.u32 %v3697_v10, 16  ;;  %v4288_v10 = vld [vmem:[#allocation3 + $0x7c] sm:$0x1] }
 0x359   :  { %v3859_v29 = vshll.u32 %v3698_v33, 16  ;;  %v3289_v16 = vsel %vm6227_vm11, %v3284_v63, %v3288_v24  ;;  %v3852_v1 = vrot.slane %v3850_v40, 4  ;;  %v3864_v50 = vshrl.u32 %v3699_v41, 16  ;;  %v7770_v61 = vpop.permute.xlu1 %4234  ;;  %v4274_v63 = vld [vmem:[#allocation3 + $0x34] sm:$0x1] }
 0x35a   :  { %v4305_v36 = vrot.slane %v4304_v12, 4  ;;  %v5444_v44 = vcombine.low %v3275_v52, %v3289_v16  ;;  %v4318_v26 = vor.u32 %v4317_v51, %v4314_v11  ;;  %v3855_v55 = vrot.slane %v3853_v31, 5  ;;  %v7773_v11 = vpop.permute.xlu0 %3644 }
 0x35b   :  { %v3861_v2 = vrot.slane %v3859_v29, 5  ;;  %v3866_v25 = vrot.slane %v3864_v50, 4  ;;  %v3867_v0 = vshll.u32 %v3699_v41, 16  ;;  %v3873_v42 = vshll.u32 %v3700_v38, 16  ;;  %v4275_v38 = vld [vmem:[#allocation3 + $0x38] sm:$0xf] }
 0x35c   :  { %v4310_v14 = vsel %vm6227_vm11, %v4305_v36, %v4309_v4  ;;  %3380 = vrot.lane.b32.xlu1 %v5444_v44, %s5774_s12  ;;  %v4319_v37 = vrot.slane %v4318_v26, 4  ;;  %v3856_v53 = vor.u32 %v3855_v55, %v3852_v1  ;;  %v3766_v27 = vshrl.u32 %v3685_v34, 16  ;;  %v4273_v4 = vld [vmem:[#allocation3 + $0x30] sm:$0xf]  ;;  %v4276_v44 = vld [vmem:[#allocation3 + $0x3c] sm:$0x1] }
 0x35d   :  { %v3769_v48 = vshll.u32 %v3685_v34, 16  ;;  %v3869_v9 = vrot.slane %v3867_v0, 5  ;;  %v3875_v7 = vrot.slane %v3873_v42, 5  ;;  %v3775_v19 = vshll.u32 %v3686_v6, 16 }
 0x35e   :  { %v3780_v30 = vshrl.u32 %v3687_v54, 16  ;;  %v4324_v23 = vsel %vm6227_vm11, %v4319_v37, %v4323_v56  ;;  %v3857_v49 = vrot.slane %v3856_v53, 4  ;;  %v3768_v15 = vrot.slane %v3766_v27, 4  ;;  %v7779_v1 = vpop.permute.xlu1 %3650  ;;  %v3115_v53 = vld [vmem:[#allocation3 + $0x74] sm:$0x1] }
 0x35f   :  { %v3771_v28 = vrot.slane %v3769_v48, 5  ;;  %v5519_v3 = vcombine.low %v4310_v14, %v4324_v23  ;;  %v3870_v17 = vor.u32 %v3869_v9, %v3866_v25  ;;  %v3777_v24 = vrot.slane %v3775_v19, 5  ;;  %v3114_v14 = vld [vmem:[#allocation3 + $0x70] sm:$0xf]  ;;  %v3116_v19 = vld [vmem:[#allocation3 + $0x78] sm:$0xf] }
 0x360   :  { %v3782_v45 = vrot.slane %v3780_v30, 4  ;;  %v3862_v47 = vsel %vm6227_vm11, %v3857_v49, %v3861_v2  ;;  %v3783_v58 = vshll.u32 %v3687_v54, 16  ;;  %v3789_v22 = vshll.u32 %v3688_v35, 16  ;;  %v7782_v35 = vpop.permute.xlu0 %4232 }
 0x361   :  { %v3772_v13 = vor.u32 %v3771_v28, %v3768_v15  ;;  %4545 = vrot.lane.b32.xlu0 %v5519_v3, %s5783_s28  ;;  %v3871_v59 = vrot.slane %v3870_v17, 4  ;;  %v4438_v21 = vshrl.u32 %v4285_v60, 16  ;;  %v4441_v5 = vshll.u32 %v4285_v60, 16 }
 0x362   :  { %v4447_v33 = vshll.u32 %v4286_v57, 16  ;;  %v3785_v39 = vrot.slane %v3783_v58, 5  ;;  %v3791_v41 = vrot.slane %v3789_v22, 5  ;;  %v4452_v52 = vshrl.u32 %v4287_v18, 16  ;;  %v7788_v17 = vpop.permute.xlu1 %4238 }
 0x363   :  { %v3773_v46 = vrot.slane %v3772_v13, 4  ;;  %v3876_v12 = vsel %vm6227_vm11, %v3871_v59, %v3875_v7  ;;  %v4440_v40 = vrot.slane %v4438_v21, 4  ;;  %v4443_v51 = vrot.slane %v4441_v5, 5  ;;  %v3693_v21 = vld [vmem:[#allocation3 + $0x58] sm:$0xf] }
 0x364   :  { %v4449_v56 = vrot.slane %v4447_v33, 5  ;;  %v5484_v31 = vcombine.low %v3862_v47, %v3876_v12  ;;  %v3786_v16 = vor.u32 %v3785_v39, %v3782_v45  ;;  %v4454_v36 = vrot.slane %v4452_v52, 4  ;;  %v3694_v39 = vld [vmem:[#allocation3 + $0x5c] sm:$0x1] }
 0x365   :  { %v3778_v29 = vsel %vm6227_vm11, %v3773_v46, %v3777_v24  ;;  %v4444_v50 = vor.u32 %v4443_v51, %v4440_v40  ;;  %v4455_v34 = vshll.u32 %v4287_v18, 16  ;;  %v4461_v62 = vshll.u32 %v4288_v10, 16  ;;  %v3117_v18 = vld [vmem:[#allocation3 + $0x7c] sm:$0x1] }
 0x366   :  { %v4354_v26 = vshrl.u32 %v4273_v4, 16  ;;  %3967 = vrot.lane.b32.xlu1 %v5484_v31, %s5776_s14  ;;  %v3787_v55 = vrot.slane %v3786_v16, 4  ;;  %v4357_v2 = vshll.u32 %v4273_v4, 16  ;;  %v4363_v6 = vshll.u32 %v4274_v63, 16 }
 0x367   :  { %v4368_v54 = vshrl.u32 %v4275_v38, 16  ;;  %v4445_v25 = vrot.slane %v4444_v50, 4  ;;  %v4457_v0 = vrot.slane %v4455_v34, 5  ;;  %v4463_v42 = vrot.slane %v4461_v62, 5  ;;  %v3696_v50 = vld [vmem:[#allocation3 + $0x64] sm:$0x1] }
 0x368   :  { %v4356_v37 = vrot.slane %v4354_v26, 4  ;;  %v3792_v27 = vsel %vm6227_vm11, %v3787_v55, %v3791_v41  ;;  %v4359_v48 = vrot.slane %v4357_v2, 5  ;;  %v4365_v9 = vrot.slane %v4363_v6, 5  ;;  %v3695_v41 = vld [vmem:[#allocation3 + $0x60] sm:$0xf] }
 0x369   :  { %v4370_v7 = vrot.slane %v4368_v54, 4  ;;  %v5481_v30 = vcombine.low %v3778_v29, %v3792_v27  ;;  %v4450_v60 = vsel %vm6227_vm11, %v4445_v25, %v4449_v56  ;;  %v4458_v23 = vor.u32 %v4457_v0, %v4454_v36  ;;  %v3118_v6 = vld [vmem:[#allocation3 + $0x80] sm:$0xf] }
 0x36a   :  { %v4371_v49 = vshll.u32 %v4275_v38, 16  ;;  %v4360_v15 = vor.u32 %v4359_v48, %v4356_v37  ;;  %v4377_v28 = vshll.u32 %v4276_v44, 16  ;;  %v3291_v57 = vshrl.u32 %v3114_v14, 16  ;;  %v7793_v52 = vpop.permute.xlu0 %3648  ;;  %v3119_v37 = vld [vmem:[#allocation3 + $0x84] sm:$0x1] }
 0x36b   :  { %v3294_v3 = vshll.u32 %v3114_v14, 16  ;;  %3961 = vrot.lane.b32.xlu0 %v5481_v30, %s5776_s14  ;;  %v4459_v24 = vrot.slane %v4458_v23, 4  ;;  %v3300_v47 = vshll.u32 %v3115_v53, 16  ;;  %v3305_v13 = vshrl.u32 %v3116_v19, 16  ;;  %v7798_v44 = vpop.permute.xlu1 %3654  ;;  %v3120_v53 = vld [vmem:[#allocation3 + $0x88] sm:$0xf] }
 0x36c   :  { %v4373_v45 = vrot.slane %v4371_v49, 5  ;;  %v4361_v58 = vrot.slane %v4360_v15, 4  ;;  %v4379_v22 = vrot.slane %v4377_v28, 5  ;;  %v3293_v10 = vrot.slane %v3291_v57, 4  ;;  %v4281_v30 = vld [vmem:[#allocation3 + $0x60] sm:$0xf] }
 0x36d   :  { %v3296_v59 = vrot.slane %v3294_v3, 5  ;;  %v4464_v5 = vsel %vm6227_vm11, %v4459_v24, %v4463_v42  ;;  %v3302_v4 = vrot.slane %v3300_v47, 5  ;;  %v3307_v46 = vrot.slane %v3305_v13, 4  ;;  %v4282_v28 = vld [vmem:[#allocation3 + $0x64] sm:$0x1] }
 0x36e   :  { %v4374_v33 = vor.u32 %v4373_v45, %v4370_v7  ;;  %v5524_v63 = vcombine.low %v4450_v60, %v4464_v5  ;;  %v4366_v12 = vsel %vm6227_vm11, %v4361_v58, %v4365_v9  ;;  %v3308_v51 = vshll.u32 %v3116_v19, 16  ;;  %v3121_v19 = vld [vmem:[#allocation3 + $0x8c] sm:$0x1]  ;;  %v4283_v57 = vld [vmem:[#allocation3 + $0x68] sm:$0xf] }
 0x36f   :  { %v3297_v40 = vor.u32 %v3296_v59, %v3293_v10  ;;  %v3314_v38 = vshll.u32 %v3117_v18, 16  ;;  %v3822_v31 = vshrl.u32 %v3693_v21, 16  ;;  %v3825_v29 = vshll.u32 %v3693_v21, 16  ;;  %v5729_v13 = vld [vmem:[#allocation3 + $0x10] ss:$8 sps:$4 sm:$0xff]  }
 0x370   :  { %v4375_v56 = vrot.slane %v4374_v33, 4  ;;  %4555 = vrot.lane.b32.xlu1 %v5524_v63, %s5783_s28  ;;  %v3310_v36 = vrot.slane %v3308_v51, 5  ;;  %v3831_v34 = vshll.u32 %v3694_v39, 16  ;;  %v3836_v62 = vshrl.u32 %v3695_v41, 16  ;;  %v7802_v54 = vpop.permute.xlu0 %4236  ;;  %3083 = vst.msk [vmem:[#allocation4 + $0x8] sm:$0xff] %vm2482_vm13, %v5729_v13 }
 0x371   :  { %v3298_v16 = vrot.slane %v3297_v40, 4  ;;  %v3824_v55 = vrot.slane %v3822_v31, 4  ;;  %v3827_v2 = vrot.slane %v3825_v29, 5  ;;  %v3316_v42 = vrot.slane %v3314_v38, 5  ;;  %v5730_v39 = vld [vmem:[#allocation3 + $0x20] ss:$8 sps:$4 sm:$0xff]  }
 0x372   :  { %v4380_v26 = vsel %vm6227_vm11, %v4375_v56, %v4379_v22  ;;  %v3311_v0 = vor.u32 %v3310_v36, %v3307_v46  ;;  %v3838_v48 = vrot.slane %v3836_v62, 4  ;;  %v3839_v9 = vshll.u32 %v3695_v41, 16  ;;  %v7811_v21 = vpop.permute.xlu1 %4242  ;;  %v4284_v40 = vld [vmem:[#allocation3 + $0x6c] sm:$0x1]  ;;  %v3705_v56 = vld [vmem:[#allocation3 + $0x88] sm:$0xf] }
 0x373   :  { %v5521_v14 = vcombine.low %v4366_v12, %v4380_v26  ;;  %v3303_v25 = vsel %vm6227_vm11, %v3298_v16, %v3302_v4  ;;  %v3828_v27 = vor.u32 %v3827_v2, %v3824_v55  ;;  %v3845_v7 = vshll.u32 %v3696_v50, 16  ;;  %v7817_v36 = vld [vmem:[#allocation3 + $0x90] sm:$0xf]  ;;  %3084 = vst.msk [vmem:[#allocation4 + $0x10] sm:$0xff] %vm2482_vm13, %v5730_v39  ;;  %v3706_v2 = vld [vmem:[#allocation3 + $0x8c] sm:$0x1] }
 0x374   :  { %v3312_v60 = vrot.slane %v3311_v0, 4  ;;  %v3833_v23 = vrot.slane %v3831_v34, 5  ;;  %v3319_v49 = vshrl.u32 %v3118_v6, 16  ;;  %v3322_v15 = vshll.u32 %v3118_v6, 16  ;;  %v7807_v47 = vpop.permute.xlu0 %3652  ;;  %v5731_v6 = vld [vmem:[#allocation3 + $0x30] ss:$8 sps:$4 sm:$0xff]  }
 0x375   :  { %4549 = vrot.lane.b32.xlu0 %v5521_v14, %s5783_s28  ;;  %v3829_v3 = vrot.slane %v3828_v27, 4  ;;  %v3841_v24 = vrot.slane %v3839_v9, 5  ;;  %v3328_v45 = vshll.u32 %v3119_v37, 16  ;;  %v3333_v18 = vshrl.u32 %v3120_v53, 16  ;;  %3085 = vst.msk [vmem:[#allocation4 + $0x18] sm:$0xff] %vm2482_vm13, %v5731_v6 }
 0x376   :  { %v3317_v58 = vsel %vm6227_vm11, %v3312_v60, %v3316_v42  ;;  %v3847_v22 = vrot.slane %v3845_v7, 5  ;;  %v3321_v10 = vrot.slane %v3319_v49, 4  ;;  %v3324_v59 = vrot.slane %v3322_v15, 5  ;;  %v5733_v7 = vld [vmem:[#allocation3] ss:$8 sps:$4 sm:$0xff]  }
 0x377   :  { %v5445_v5 = vcombine.low %v3303_v25, %v3317_v58  ;;  %v3834_v33 = vsel %vm6227_vm11, %v3829_v3, %v3833_v23  ;;  %v3842_v4 = vor.u32 %v3841_v24, %v3838_v48  ;;  %v3335_v46 = vrot.slane %v3333_v18, 4  ;;  %v3708_v60 = vld [vmem:[#allocation3 + $0x94] sm:$0x1]  ;;  %v3701_v15 = vld [vmem:[#allocation3 + $0x78] sm:$0xf]  ;;  %3082 = vst.msk [vmem:[#allocation4] sm:$0xff] %vm2482_vm13, %v5733_v7 }
 0x378   :  { %v3325_v41 = vor.u32 %v3324_v59, %v3321_v10  ;;  %v3336_v63 = vshll.u32 %v3120_v53, 16  ;;  %v3342_v12 = vshll.u32 %v3121_v19, 16  ;;  %v4410_v51 = vshrl.u32 %v4281_v30, 16  ;;  %v7819_v50 = vpop.permute.xlu0 %4240  ;;  %v5735_v3 = vld [vmem:[#allocation3 + $0x50] ss:$8 sps:$4 sm:$0xff]  }
 0x379   :  { %3382 = vrot.lane.b32.xlu1 %v5445_v5, %s5774_s12  ;;  %v3843_v38 = vrot.slane %v3842_v4, 4  ;;  %v4413_v31 = vshll.u32 %v4281_v30, 16  ;;  %v4419_v29 = vshll.u32 %v4282_v28, 16  ;;  %v4424_v16 = vshrl.u32 %v4283_v57, 16  ;;  %v3702_v59 = vld [vmem:[#allocation3 + $0x7c] sm:$0x1] }
 0x37a   :  { %v3326_v34 = vrot.slane %v3325_v41, 4  ;;  %v3330_v62 = vrot.slane %v3328_v45, 5  ;;  %v3338_v26 = vrot.slane %v3336_v63, 5  ;;  %v4412_v55 = vrot.slane %v4410_v51, 4  ;;  %3086 = vst.msk [vmem:[#allocation4 + $0x20] sm:$0xff] %vm2482_vm13, %v5735_v3 }
 0x37b   :  { %v3848_v14 = vsel %vm6227_vm11, %v3843_v38, %v3847_v22  ;;  %v3344_v25 = vrot.slane %v3342_v12, 5  ;;  %v4415_v0 = vrot.slane %v4413_v31, 5  ;;  %v4421_v42 = vrot.slane %v4419_v29, 5  ;;  %v3703_v39 = vld [vmem:[#allocation3 + $0x80] sm:$0xf] }
 0x37c   :  { %v5483_v37 = vcombine.low %v3834_v33, %v3848_v14  ;;  %v3339_v53 = vor.u32 %v3338_v26, %v3335_v46  ;;  %v4426_v27 = vrot.slane %v4424_v16, 4  ;;  %v4427_v48 = vshll.u32 %v4283_v57, 16  ;;  %v7824_v9 = vpop.permute.xlu1 %3658  ;;  %v7827_v28 = vpop.permute.xlu0 %3656  ;;  %v5737_v63 = vld [vmem:[#allocation3 + $0x60] ss:$8 sps:$4 sm:$0xff]   ;;  %v3704_v38 = vld [vmem:[#allocation3 + $0x84] sm:$0x1] }
 0x37d   :  { %v4416_v19 = vor.u32 %v4415_v0, %v4412_v55  ;;  %v4433_v30 = vshll.u32 %v4284_v40, 16  ;;  %v3906_v23 = vshrl.u32 %v3705_v56, 16  ;;  %v3909_v49 = vshll.u32 %v3705_v56, 16  ;;  %v4293_v26 = vld [vmem:[#allocation3 + $0x90] sm:$0xf]  ;;  %3087 = vst.msk [vmem:[#allocation4 + $0x28] sm:$0xff] %vm2482_vm13, %v5737_v63 }
 0x37e   :  { %3965 = vrot.lane.b32.xlu0 %v5483_v37, %s5776_s14  ;;  %v3331_v24 = vsel %vm6227_vm11, %v3326_v34, %v3330_v62  ;;  %v3340_v57 = vrot.slane %v3339_v53, 4  ;;  %v4429_v45 = vrot.slane %v4427_v48, 5  ;;  %v3920_v18 = vshrl.u32 %v7817_v36, 16  ;;  %v4294_v55 = vld [vmem:[#allocation3 + $0x94] sm:$0x1] }
 0x37f   :  { %v4417_v13 = vrot.slane %v4416_v19, 4  ;;  %v3908_v58 = vrot.slane %v3906_v23, 4  ;;  %v3911_v22 = vrot.slane %v3909_v49, 5  ;;  %v3915_v10 = vshll.u32 %v3706_v2, 16  ;;  %v5740_v2 = vld [vmem:[#allocation3 + $0x70] ss:$8 sps:$4 sm:$0xff]  }
 0x380   :  { %v3345_v5 = vsel %vm6227_vm11, %v3340_v57, %v3344_v25  ;;  %v4430_v33 = vor.u32 %v4429_v45, %v4426_v27  ;;  %v4435_v4 = vrot.slane %v4433_v30, 5  ;;  %v3922_v46 = vrot.slane %v3920_v18, 4  ;;  %v7837_v41 = vpop.permute.xlu1 %4246  ;;  %v7842_v31 = vpop.permute.xlu0 %4244  ;;  %3088 = vst.msk [vmem:[#allocation4 + $0x30] sm:$0xff] %vm2482_vm13, %v5740_v2  ;;  %v5741_v49 = vld [vmem:[#allocation3 + $0x80] ss:$8 sps:$4 sm:$0xff]  }
 0x381   :  { %v5446_v12 = vcombine.low %v3331_v24, %v3345_v5  ;;  %v4422_v40 = vsel %vm6227_vm11, %v4417_v13, %v4421_v42  ;;  %v3912_v51 = vor.u32 %v3911_v22, %v3908_v58  ;;  %v3923_v56 = vshll.u32 %v7817_v36, 16  ;;  %v4296_v18 = vld [vmem:[#allocation3 + $0x9c] sm:$0x1]  ;;  %3089 = vst.msk [vmem:[#allocation4 + $0x38] sm:$0xff] %vm2482_vm13, %v5741_v49 }
 0x382   :  { %v4431_v29 = vrot.slane %v4430_v33, 4  ;;  %v3929_v16 = vshll.u32 %v3708_v60, 16  ;;  %v3878_v34 = vshrl.u32 %v3701_v15, 16  ;;  %v3881_v62 = vshll.u32 %v3701_v15, 16  ;;  %v4295_v60 = vld [vmem:[#allocation3 + $0x98] sm:$0xf] }
 0x383   :  { %3384 = vrot.lane.b32.xlu1 %v5446_v12, %s5774_s12  ;;  %v3913_v6 = vrot.slane %v3912_v51, 4  ;;  %v3917_v14 = vrot.slane %v3915_v10, 5  ;;  %v3925_v25 = vrot.slane %v3923_v56, 5  ;;  %v3892_v0 = vshrl.u32 %v3703_v39, 16  ;;  %v4291_v51 = vld [vmem:[#allocation3 + $0x88] sm:$0xf] }
 0x384   :  { %v4436_v36 = vsel %vm6227_vm11, %v4431_v29, %v4435_v4  ;;  %v3880_v42 = vrot.slane %v3878_v34, 4  ;;  %v3883_v37 = vrot.slane %v3881_v62, 5  ;;  %v3887_v53 = vshll.u32 %v3702_v59, 16  ;;  %v7848_v27 = vpop.permute.xlu1 %3557  ;;  %v7853_v23 = vpop.permute.xlu0 %3555  ;;  %v4289_v4 = vld [vmem:[#allocation3 + $0x80] sm:$0xf] }
 0x385   :  { %v5523_v48 = vcombine.low %v4422_v40, %v4436_v36  ;;  %v3918_v7 = vsel %vm6227_vm11, %v3913_v6, %v3917_v14  ;;  %v3926_v19 = vor.u32 %v3925_v25, %v3922_v46  ;;  %v3931_v30 = vrot.slane %v3929_v16, 5  ;;  %v4290_v62 = vld [vmem:[#allocation3 + $0x84] sm:$0x1]  ;;  %v4292_v6 = vld [vmem:[#allocation3 + $0x8c] sm:$0x1] }
 0x386   :  { %v3884_v15 = vor.u32 %v3883_v37, %v3880_v42  ;;  %v3894_v3 = vrot.slane %v3892_v0, 4  ;;  %v3895_v24 = vshll.u32 %v3703_v39, 16  ;;  %v3901_v57 = vshll.u32 %v3704_v38, 16  ;;  %v4606_v25 = vld [vmem:[#allocation3 + $0x90] sm:$0xe] }
 0x387   :  { %4553 = vrot.lane.b32.xlu0 %v5523_v48, %s5783_s28  ;;  %v3927_v45 = vrot.slane %v3926_v19, 4  ;;  %v4494_v13 = vshrl.u32 %v4293_v26, 16  ;;  %v4497_v58 = vshll.u32 %v4293_v26, 16  ;;  %v4503_v22 = vshll.u32 %v4294_v55, 16 }
 0x388   :  { %v3885_v10 = vrot.slane %v3884_v15, 4  ;;  %v3889_v59 = vrot.slane %v3887_v53, 5  ;;  %v3897_v5 = vrot.slane %v3895_v24, 5  ;;  %v4508_v33 = vshrl.u32 %v4295_v60, 16  ;;  %v7857_v46 = vpop.permute.xlu1 %4144  ;;  %v7861_v56 = vpop.permute.xlu0 %4142  ;;  %v4607_v53 = vld [vmem:[#allocation3 + $0x94] sm:$0x1] }
 0x389   :  { %v3932_v39 = vsel %vm6227_vm11, %v3927_v45, %v3931_v30  ;;  %v3903_v63 = vrot.slane %v3901_v57, 5  ;;  %v4496_v12 = vrot.slane %v4494_v13, 4  ;;  %v4499_v40 = vrot.slane %v4497_v58, 5 }
 0x38a   :  { %v5486_v38 = vcombine.low %v3918_v7, %v3932_v39  ;;  %v3898_v29 = vor.u32 %v3897_v5, %v3894_v3  ;;  %v4505_v16 = vrot.slane %v4503_v22, 5  ;;  %v4510_v34 = vrot.slane %v4508_v33, 4  ;;  %v4602_v39 = vld [vmem:[#allocation3 + $0x80] sm:$0xe] }
 0x38b   :  { %v4500_v26 = vor.u32 %v4499_v40, %v4496_v12  ;;  %v4511_v55 = vshll.u32 %v4295_v60, 16  ;;  %v4517_v2 = vshll.u32 %v4296_v18, 16  ;;  %v4466_v14 = vshrl.u32 %v4289_v4, 16  ;;  %v4608_v60 = vld [vmem:[#allocation3 + $0x98] sm:$0xe] }
 0x38c   :  { %3971 = vrot.lane.b32.xlu1 %v5486_v38, %s5776_s14  ;;  %v3890_v0 = vsel %vm6227_vm11, %v3885_v10, %v3889_v59  ;;  %v3899_v36 = vrot.slane %v3898_v29, 4  ;;  %v4469_v42 = vshll.u32 %v4289_v4, 16  ;;  %v4480_v37 = vshrl.u32 %v4291_v51, 16  ;;  %v7866_v48 = vpop.permute.xlu1 %3561  ;;  %v7868_v15 = vpop.permute.xlu0 %4730  ;;  %v4609_v18 = vld [vmem:[#allocation3 + $0x9c] sm:$0x1] }
 0x38d   :  { %v4501_v7 = vrot.slane %v4500_v26, 4  ;;  %v4513_v19 = vrot.slane %v4511_v55, 5  ;;  %v4468_v30 = vrot.slane %v4466_v14, 4  ;;  %v4475_v49 = vshll.u32 %v4290_v62, 16  ;;  %v4603_v62 = vld [vmem:[#allocation3 + $0x84] sm:$0x1] }
 0x38e   :  { %v3904_v3 = vsel %vm6227_vm11, %v3899_v36, %v3903_v63  ;;  %v4519_v24 = vrot.slane %v4517_v2, 5  ;;  %v4471_v57 = vrot.slane %v4469_v42, 5  ;;  %v4482_v45 = vrot.slane %v4480_v37, 4 }
 0x38f   :  { %v5485_v13 = vcombine.low %v3890_v0, %v3904_v3  ;;  %v4506_v58 = vsel %vm6227_vm11, %v4501_v7, %v4505_v16  ;;  %v4514_v22 = vor.u32 %v4513_v19, %v4510_v34  ;;  %v4483_v10 = vshll.u32 %v4291_v51, 16  ;;  %v4604_v16 = vld [vmem:[#allocation3 + $0x88] sm:$0xe]  ;;  %v4605_v34 = vld [vmem:[#allocation3 + $0x8c] sm:$0x1] }
 0x390   :  { %v4472_v59 = vor.u32 %v4471_v57, %v4468_v30  ;;  %v4489_v5 = vshll.u32 %v4292_v6, 16  ;;  %v5541_v33 = vrot.slane %v4606_v25, 9  ;;  %v4700_v4 = vrot.slane %v4607_v53, 5  ;;  %v7874_v12 = vpop.permute.xlu1 %4148  ;;  %v4733_v26 = vpop.permute.xlu0 %4732  ;;  %v5739_v3 = vld [vmem:[%s8195_s4 + $0x20] ss:$0 sps:$4 sm:$0xff]  }
 0x391   :  { %3969 = vrot.lane.b32.xlu0 %v5485_v13, %s5776_s14  ;;  %v4515_v63 = vrot.slane %v4514_v22, 4  ;;  %v4485_v40 = vrot.slane %v4483_v10, 5  ;;  %v5542_v38 = vrot.slane %v4608_v60, 9  ;;  %v4704_v29 = vrot.slane %v4609_v18, 5  ;;  %5669 = vmatprep.subr.msk.bf16.mxu1 %vm4823_vm2, %v5739_v3 }
 0x392   :  { %v4473_v55 = vrot.slane %v4472_v59, 4  ;;  %v4477_v2 = vrot.slane %v4475_v49, 5  ;;  %v4491_v14 = vrot.slane %v4489_v5, 5  ;;  %v4701_v25 = vsel %vm6208_vm10, %v5541_v33, %v4700_v4 }
 0x393   :  { %v4520_v51 = vsel %vm6227_vm11, %v4515_v63, %v4519_v24  ;;  %v4486_v6 = vor.u32 %v4485_v40, %v4482_v45  ;;  %v4705_v36 = vsel %vm6208_vm10, %v5542_v38, %v4704_v29  ;;  %v5539_v42 = vrot.slane %v4602_v39, 9 }
 0x394   :  { %v5526_v0 = vcombine.low %v4506_v58, %v4520_v51  ;;  %v4692_v37 = vrot.slane %v4603_v62, 5  ;;  %v7883_v53 = vpop.permute.xlu1 %3565  ;;  %v4478_v7 = vsel %vm6227_vm11, %v4473_v55, %v4477_v2  ;;  %v5540_v30 = vrot.slane %v4604_v16, 9  ;;  %v3560_v60 = vpop.permute.xlu0 %3559 }
 0x395   :  { %v4487_v19 = vrot.slane %v4486_v6, 4  ;;  %v4696_v49 = vrot.slane %v4605_v34, 5  ;;  %v5550_v45 = vcombine.low %v4701_v25, %v4705_v36  ;;  %v4825_v10 = vsel %vm4823_vm2, %v5739_v3, 0 }
 0x396   :  { %4559 = vrot.lane.b32.xlu1 %v5526_v0, %s5783_s28  ;;  %v4693_v13 = vsel %vm6208_vm10, %v5539_v42, %v4692_v37  ;;  %5651 = vmatpush3.bf16.msra.mxu1 %v4825_v10 }
 0x397   :  { %v4492_v24 = vsel %vm6227_vm11, %v4487_v19, %v4491_v14  ;;  %v4697_v58 = vsel %vm6208_vm10, %v5540_v30, %v4696_v49  ;;  %vm3579_vm10 = vcmask 195712   ;;  %vm3668_vm11 = vcmask 261312  }
 0x398   :  { %v5525_v57 = vcombine.low %v4478_v7, %v4492_v24  ;;  %v7893_v18 = vpop.permute.xlu1 %4152  ;;  %v7899_v22 = vpop.permute.xlu0 %4146  ;;  %v5549_v32 = vcombine.low %v4693_v13, %v4697_v58 }
 0x39a   :  { %4557 = vrot.lane.b32.xlu0 %v5525_v57, %s5783_s28  ;;  %4744 = vrot.lane.b32.xlu1 %v5550_v45, %s5782_s27 }
 0x39c   :  { %v7903_v59 = vpop.permute.xlu1 %3569  ;;  %v7905_v5 = vpop.permute.xlu0 %4734 }
 0x39e   :  { %4742 = vrot.lane.b32.xlu0 %v5549_v32, %s5782_s27 }
 0x3a0   :  { %v7908_v33 = vpop.permute.xlu1 %4156  ;;  %v4737_v20 = vpop.permute.xlu0 %4736 }
 0x3a4   :  { %v3373_v4 = vpop.permute.xlu1 %3372  ;;  %v3564_v39 = vpop.permute.xlu0 %3563 }
 0x3a5   :  { %3396 = vst.msk [vmem:[#allocation4 + $0x8] sm:$0xff] %vm3394_vm3, %v3373_v4 }
 0x3a6   :  { %3581 = vst.msk [vmem:[#allocation4 + $0x8] sm:$0xff] %vm3579_vm10, %v7848_v27 }
 0x3a7   :  { %3670 = vst.msk [vmem:[#allocation4 + $0x8] sm:$0xff] %vm3668_vm11, %v7764_v8 }
 0x3a8   :  { %v3960_v63 = vpop.permute.xlu1 %3959  ;;  %v7916_v40 = vpop.permute.xlu0 %4150 }
 0x3a9   :  { %3983 = vst.msk [vmem:[#allocation4 + $0x8] sm:$0xff] %vm3981_vm0, %v3960_v63 }
 0x3aa   :  { %4168 = vst.msk [vmem:[#allocation4 + $0x8] sm:$0xff] %vm4166_vm1, %v7857_v46 }
 0x3ab   :  { %4258 = vst.msk [vmem:[#allocation4 + $0x8] sm:$0xff] %vm4256_vm4, %v7770_v61 }
 0x3ac   :  { %v4548_v27 = vpop.permute.xlu1 %4547  ;;  %v7923_v38 = vpop.permute.xlu0 %4738 }
 0x3ad   :  { %4571 = vst.msk [vmem:[#allocation4 + $0x8] sm:$0xff] %vm4569_vm5, %v4548_v27 }
 0x3ae   :  { %4756 = vst.msk [vmem:[#allocation4 + $0x8] sm:$0xff] %vm4754_vm6, %v4733_v26 }
 0x3b0   :  { %v3375_v8 = vpop.permute.xlu1 %3374  ;;  %v4741_v29 = vpop.permute.xlu0 %4740 }
 0x3b1   :  { %3397 = vst.msk [vmem:[#allocation4 + $0x10] sm:$0xff] %vm3394_vm3, %v3375_v8 }
 0x3b2   :  { %3582 = vst.msk [vmem:[#allocation4 + $0x10] sm:$0xff] %vm3579_vm10, %v3560_v60 }
 0x3b3   :  { %3671 = vst.msk [vmem:[#allocation4 + $0x10] sm:$0xff] %vm3668_vm11, %v7793_v52 }
 0x3b4   :  { %v3377_v46 = vpop.permute.xlu1 %3376  ;;  %v3568_v61 = vpop.permute.xlu0 %3567 }
 0x3b5   :  { %3398 = vst.msk [vmem:[#allocation4 + $0x18] sm:$0xff] %vm3394_vm3, %v3377_v46 }
 0x3b6   :  { %3583 = vst.msk [vmem:[#allocation4 + $0x18] sm:$0xff] %vm3579_vm10, %v7866_v48 }
 0x3b7   :  { %3672 = vst.msk [vmem:[#allocation4 + $0x18] sm:$0xff] %vm3668_vm11, %v7779_v1 }
 0x3b8   :  { %v7938_v26 = vpop.permute.xlu0 %4154 }
 0x3ba   :  { %v3964_v62 = vpop.permute.xlu1 %3963 }
 0x3bb   :  { %3985 = vst.msk [vmem:[#allocation4 + $0x18] sm:$0xff] %vm3981_vm0, %v3964_v62 }
 0x3bc   :  { %4170 = vst.msk [vmem:[#allocation4 + $0x18] sm:$0xff] %vm4166_vm1, %v7874_v12 }
 0x3bd   :  { %4260 = vst.msk [vmem:[#allocation4 + $0x18] sm:$0xff] %vm4256_vm4, %v7788_v17 }
 0x3bf   :  { %v4552_v52 = vpop.permute.xlu1 %4551 }
 0x3c0   :  { %4573 = vst.msk [vmem:[#allocation4 + $0x18] sm:$0xff] %vm4569_vm5, %v4552_v52 }
 0x3c1   :  { %4758 = vst.msk [vmem:[#allocation4 + $0x18] sm:$0xff] %vm4754_vm6, %v4737_v20 }
 0x3c2   :  { %v3371_v48 = vpop.permute.xlu0 %3370 }
 0x3c3   :  { %3395 = vst.msk [vmem:[#allocation4] sm:$0xff] %vm3394_vm3, %v3371_v48 }
 0x3c4   :  { %3580 = vst.msk [vmem:[#allocation4] sm:$0xff] %vm3579_vm10, %v7853_v23  ;;  %v3379_v1 = vpop.permute.xlu1 %3378 }
 0x3c5   :  { %3669 = vst.msk [vmem:[#allocation4] sm:$0xff] %vm3668_vm11, %v7773_v11 }
 0x3c6   :  { %3399 = vst.msk [vmem:[#allocation4 + $0x20] sm:$0xff] %vm3394_vm3, %v3379_v1 }
 0x3c7   :  { %3584 = vst.msk [vmem:[#allocation4 + $0x20] sm:$0xff] %vm3579_vm10, %v3564_v39 }
 0x3c8   :  { %3673 = vst.msk [vmem:[#allocation4 + $0x20] sm:$0xff] %vm3668_vm11, %v7807_v47  ;;  %v4766_v2 = vld [vmem:[#allocation4 + $0x18] sm:$0xff] }
 0x3c9   :  { %v3958_v17 = vpop.permute.xlu0 %3957 }
 0x3ca   :  { %3982 = vst.msk [vmem:[#allocation4] sm:$0xff] %vm3981_vm0, %v3958_v17 }
 0x3cb   :  { %4167 = vst.msk [vmem:[#allocation4] sm:$0xff] %vm4166_vm1, %v7861_v56 }
 0x3cc   :  { %4257 = vst.msk [vmem:[#allocation4] sm:$0xff] %vm4256_vm4, %v7782_v35 }
 0x3ce   :  { %v3381_v23 = vpop.permute.xlu1 %3380 }
 0x3cf   :  { %3400 = vst.msk [vmem:[#allocation4 + $0x28] sm:$0xff] %vm3394_vm3, %v3381_v23 }
 0x3d0   :  { %3585 = vst.msk [vmem:[#allocation4 + $0x28] sm:$0xff] %vm3579_vm10, %v7883_v53 }
 0x3d1   :  { %3674 = vst.msk [vmem:[#allocation4 + $0x28] sm:$0xff] %vm3668_vm11, %v7798_v44  ;;  %v4764_v44 = vld [vmem:[#allocation4 + $0x8] sm:$0xff] }
 0x3d3   :  { %v4546_v11 = vpop.permute.xlu0 %4545 }
 0x3d4   :  { %4570 = vst.msk [vmem:[#allocation4] sm:$0xff] %vm4569_vm5, %v4546_v11 }
 0x3d5   :  { %4755 = vst.msk [vmem:[#allocation4] sm:$0xff] %vm4754_vm6, %v7868_v15 }
 0x3d8   :  { %v3968_v47 = vpop.permute.xlu1 %3967 }
 0x3d9   :  { %3987 = vst.msk [vmem:[#allocation4 + $0x28] sm:$0xff] %vm3981_vm0, %v3968_v47 }
 0x3da   :  { %4172 = vst.msk [vmem:[#allocation4 + $0x28] sm:$0xff] %vm4166_vm1, %v7893_v18 }
 0x3db   :  { %4262 = vst.msk [vmem:[#allocation4 + $0x28] sm:$0xff] %vm4256_vm4, %v7811_v21 }
 0x3dc   :  { %v4763_v35 = vld [vmem:[#allocation4] sm:$0xff] }
 0x3dd   :  { %v3962_v56 = vpop.permute.xlu0 %3961  ;;  %5652 = vmatprep.mubr.msk.bf16.mxu1 %vm4798_vm7, %v4763_v35 }
 0x3de   :  { %3984 = vst.msk [vmem:[#allocation4 + $0x10] sm:$0xff] %vm3981_vm0, %v3962_v56  ;;  %5653 = vmatmul.mubr.msk.bf16.vlgmr.msra.gmra.mrb[0].mxu1 %vm4798_vm7, %v4764_v44 }
 0x3df   :  { %4169 = vst.msk [vmem:[#allocation4 + $0x10] sm:$0xff] %vm4166_vm1, %v7899_v22 }
 0x3e0   :  { %4259 = vst.msk [vmem:[#allocation4 + $0x10] sm:$0xff] %vm4256_vm4, %v7802_v54 }
 0x3e2   :  { %v4556_v15 = vpop.permute.xlu1 %4555 }
 0x3e3   :  { %4575 = vst.msk [vmem:[#allocation4 + $0x28] sm:$0xff] %vm4569_vm5, %v4556_v15 }
 0x3e4   :  { %4760 = vst.msk [vmem:[#allocation4 + $0x28] sm:$0xff] %vm4754_vm6, %v4741_v29 }
 0x3e7   :  { %v4550_v21 = vpop.permute.xlu0 %4549 }
 0x3e8   :  { %4572 = vst.msk [vmem:[#allocation4 + $0x10] sm:$0xff] %vm4569_vm5, %v4550_v21 }
 0x3e9   :  { %4757 = vst.msk [vmem:[#allocation4 + $0x10] sm:$0xff] %vm4754_vm6, %v7905_v5 }
 0x3eb   :  { %v3383_v12 = vpop.permute.xlu1 %3382 }
 0x3ec   :  { %3401 = vst.msk [vmem:[#allocation4 + $0x30] sm:$0xff] %vm3394_vm3, %v3383_v12 }
 0x3ed   :  { %3586 = vst.msk [vmem:[#allocation4 + $0x30] sm:$0xff] %vm3579_vm10, %v3568_v61 }
 0x3ee   :  { %3675 = vst.msk [vmem:[#allocation4 + $0x30] sm:$0xff] %vm3668_vm11, %v7827_v28 }
 0x3f0   :  { %v4765_v54 = vld [vmem:[#allocation4 + $0x10] sm:$0xff]  ;;  %v3966_v55 = vpop.permute.xlu0 %3965 }
 0x3f1   :  { %5656 = vmatprep.mubr.msk.bf16.mxu1 %vm4798_vm7, %v4765_v54  ;;  %3986 = vst.msk [vmem:[#allocation4 + $0x20] sm:$0xff] %vm3981_vm0, %v3966_v55 }
 0x3f2   :  { %5657 = vmatmul.mubr.msk.bf16.gmra.mrb[4].mxu1 %vm4798_vm7, %v4766_v2  ;;  %4171 = vst.msk [vmem:[#allocation4 + $0x20] sm:$0xff] %vm4166_vm1, %v7916_v40 }
 0x3f3   :  { %4261 = vst.msk [vmem:[#allocation4 + $0x20] sm:$0xff] %vm4256_vm4, %v7819_v50 }
 0x3f5   :  { %v3385_v16 = vpop.permute.xlu1 %3384 }
 0x3f6   :  { %3402 = vst.msk [vmem:[#allocation4 + $0x38] sm:$0xff] %vm3394_vm3, %v3385_v16 }
 0x3f7   :  { %3587 = vst.msk [vmem:[#allocation4 + $0x38] sm:$0xff] %vm3579_vm10, %v7903_v59 }
 0x3f8   :  { %3676 = vst.msk [vmem:[#allocation4 + $0x38] sm:$0xff] %vm3668_vm11, %v7824_v9  ;;  %v4768_v9 = vld [vmem:[#allocation4 + $0x28] sm:$0xff] }
 0x3f9   :  { %v4554_v28 = vpop.permute.xlu0 %4553 }
 0x3fa   :  { %4574 = vst.msk [vmem:[#allocation4 + $0x20] sm:$0xff] %vm4569_vm5, %v4554_v28 }
 0x3fb   :  { %4759 = vst.msk [vmem:[#allocation4 + $0x20] sm:$0xff] %vm4754_vm6, %v7923_v38 }
 0x3fe   :  { %v3972_v34 = vpop.permute.xlu1 %3971 }
 0x3ff   :  { %3989 = vst.msk [vmem:[#allocation4 + $0x38] sm:$0xff] %vm3981_vm0, %v3972_v34 }
 0x400   :  { %4174 = vst.msk [vmem:[#allocation4 + $0x38] sm:$0xff] %vm4166_vm1, %v7908_v33 }
 0x401   :  { %4264 = vst.msk [vmem:[#allocation4 + $0x38] sm:$0xff] %vm4256_vm4, %v7837_v41 }
 0x402   :  { %v4767_v50 = vld [vmem:[#allocation4 + $0x20] sm:$0xff] }
 0x403   :  { %v3970_v51 = vpop.permute.xlu0 %3969  ;;  %5660 = vmatprep.mubr.msk.bf16.mxu1 %vm4798_vm7, %v4767_v50 }
 0x404   :  { %3988 = vst.msk [vmem:[#allocation4 + $0x30] sm:$0xff] %vm3981_vm0, %v3970_v51  ;;  %5661 = vmatmul.mubr.msk.bf16.gmra.mrb[8].mxu1 %vm4798_vm7, %v4768_v9 }
 0x405   :  { %4173 = vst.msk [vmem:[#allocation4 + $0x30] sm:$0xff] %vm4166_vm1, %v7938_v26 }
 0x406   :  { %4263 = vst.msk [vmem:[#allocation4 + $0x30] sm:$0xff] %vm4256_vm4, %v7842_v31 }
 0x408   :  { %v4560_v6 = vpop.permute.xlu1 %4559 }
 0x409   :  { %4577 = vst.msk [vmem:[#allocation4 + $0x38] sm:$0xff] %vm4569_vm5, %v4560_v6 }
 0x40c   :  { %v4558_v14 = vpop.permute.xlu0 %4557  ;;  %v4745_v41 = vpop.permute.xlu1 %4744 }
 0x40d   :  { %4576 = vst.msk [vmem:[#allocation4 + $0x30] sm:$0xff] %vm4569_vm5, %v4558_v14 }
 0x40e   :  { %4762 = vst.msk [vmem:[#allocation4 + $0x38] sm:$0xff] %vm4754_vm6, %v4745_v41 }
 0x410   :  { %v4743_v25 = vpop.permute.xlu0 %4742 }
 0x411   :  { %4761 = vst.msk [vmem:[#allocation4 + $0x30] sm:$0xff] %vm4754_vm6, %v4743_v25 }
 0x415   :  { %v4770_v0 = vld [vmem:[#allocation4 + $0x38] sm:$0xff] }
 0x418   :  { %v4769_v36 = vld [vmem:[#allocation4 + $0x30] sm:$0xff] }
 0x419   :  { %5664 = vmatprep.mubr.msk.bf16.mxu1 %vm4798_vm7, %v4769_v36 }
 0x41a   :  { %5665 = vmatmul.mubr.msk.bf16.gmra.mrb[12].mxu1 %vm4798_vm7, %v4770_v0 }
 0x4b1   :  { %v8020_v42 = vpop.f32.mrb[0].mxu1 }
 0x4b2   :  { %v8022_v31 = vpop.f32.mrb[1].mxu1  ;;  %v4966_v19 = vmul.f32 %v8020_v42, %v8020_v42  ;;  %v4929_v24 = vsel %vm2482_vm13, %v8020_v42, 0.0 }
 0x4b3   :  { %v4964_v37 = vmul.f32 %v8022_v31, %v8022_v31  ;;  %v8026_v53 = vpop.f32.mrb[2].mxu1  ;;  %v4926_v30 = vsel %vm2482_vm13, %v8022_v31, 0.0 }
 0x4b4   :  { %v8028_v7 = vpop.f32.mrb[3].mxu1  ;;  %v4967_v45 = vmul.f32 %v8026_v53, %v8026_v53  ;;  %v4983_v22 = vsel %vm2482_vm13, %v4966_v19, 0.0  ;;  %v4931_v10 = vsel %vm2482_vm13, %v8026_v53, 0.0 }
 0x4b5   :  { %v4927_v49 = vsel %vm2482_vm13, %v8028_v7, 0.0  ;;  %v4965_v60 = vmul.f32 %v8028_v7, %v8028_v7  ;;  %v4980_v57 = vsel %vm2482_vm13, %v4964_v37, 0.0 }
 0x4b6   :  { %v4928_v3 = vadd.f32 %v4927_v49, %v4926_v30  ;;  %v4985_v5 = vsel %vm2482_vm13, %v4967_v45, 0.0 }
 0x4b7   :  { %v4981_v18 = vsel %vm2482_vm13, %v4965_v60, 0.0 }
 0x4b8   :  { %v4930_v13 = vadd.f32 %v4929_v24, %v4928_v3  ;;  %v4982_v58 = vadd.f32 %v4981_v18, %v4980_v57 }
 0x4ba   :  { %v4984_v32 = vadd.f32 %v4983_v22, %v4982_v58  ;;  %v4932_v59 = vadd.f32 %v4931_v10, %v4930_v13 }
 0x4bc   :  { %v4986_v33 = vadd.f32 %v4985_v5, %v4984_v32 }
 0x4c5   :  { %v8048_v20 = vpop.f32.mrb[4].mxu1 }
 0x4c6   :  { %v8050_v4 = vpop.f32.mrb[5].mxu1  ;;  %v4970_v8 = vmul.f32 %v8048_v20, %v8048_v20  ;;  %v4937_v52 = vsel %vm2482_vm13, %v8048_v20, 0.0 }
 0x4c7   :  { %v4933_v39 = vsel %vm2482_vm13, %v8050_v4, 0.0  ;;  %v4968_v63 = vmul.f32 %v8050_v4, %v8050_v4  ;;  %v8056_v40 = vpop.f32.mrb[6].mxu1 }
 0x4c8   :  { %v4934_v27 = vadd.f32 %v4933_v39, %v4932_v59  ;;  %v8058_v38 = vpop.f32.mrb[7].mxu1  ;;  %v4971_v48 = vmul.f32 %v8056_v40, %v8056_v40  ;;  %v4991_v11 = vsel %vm2482_vm13, %v4970_v8, 0.0  ;;  %v4939_v47 = vsel %vm2482_vm13, %v8056_v40, 0.0 }
 0x4c9   :  { %v4987_v29 = vsel %vm2482_vm13, %v4968_v63, 0.0  ;;  %v4935_v46 = vsel %vm2482_vm13, %v8058_v38, 0.0  ;;  %v4969_v61 = vmul.f32 %v8058_v38, %v8058_v38 }
 0x4ca   :  { %v4988_v62 = vadd.f32 %v4987_v29, %v4986_v33  ;;  %v4936_v26 = vadd.f32 %v4935_v46, %v4934_v27  ;;  %v4993_v44 = vsel %vm2482_vm13, %v4971_v48, 0.0 }
 0x4cb   :  { %v4989_v1 = vsel %vm2482_vm13, %v4969_v61, 0.0 }
 0x4cc   :  { %v4938_v17 = vadd.f32 %v4937_v52, %v4936_v26  ;;  %v4990_v23 = vadd.f32 %v4989_v1, %v4988_v62 }
 0x4ce   :  { %v4992_v35 = vadd.f32 %v4991_v11, %v4990_v23  ;;  %v4940_v56 = vadd.f32 %v4939_v47, %v4938_v17 }
 0x4d0   :  { %v4994_v15 = vadd.f32 %v4993_v44, %v4992_v35 }
 0x4d7   :  { %v8076_v21 = vpop.f32.mrb[8].mxu1 }
 0x4d8   :  { %v8078_v12 = vpop.f32.mrb[9].mxu1  ;;  %v4974_v34 = vmul.f32 %v8076_v21, %v8076_v21  ;;  %v4945_v41 = vsel %vm2482_vm13, %v8076_v21, 0.0 }
 0x4d9   :  { %v4941_v54 = vsel %vm2482_vm13, %v8078_v12, 0.0  ;;  %v4972_v55 = vmul.f32 %v8078_v12, %v8078_v12  ;;  %v8084_v2 = vpop.f32.mrb[10].mxu1 }
 0x4da   :  { %v4942_v16 = vadd.f32 %v4941_v54, %v4940_v56  ;;  %v8086_v28 = vpop.f32.mrb[11].mxu1  ;;  %v4975_v25 = vmul.f32 %v8084_v2, %v8084_v2  ;;  %v4999_v19 = vsel %vm2482_vm13, %v4974_v34, 0.0  ;;  %v4947_v30 = vsel %vm2482_vm13, %v8084_v2, 0.0 }
 0x4db   :  { %v4995_v50 = vsel %vm2482_vm13, %v4972_v55, 0.0  ;;  %v4943_v51 = vsel %vm2482_vm13, %v8086_v28, 0.0  ;;  %v4973_v9 = vmul.f32 %v8086_v28, %v8086_v28 }
 0x4dc   :  { %v4996_v6 = vadd.f32 %v4995_v50, %v4994_v15  ;;  %v4944_v14 = vadd.f32 %v4943_v51, %v4942_v16  ;;  %v5001_v3 = vsel %vm2482_vm13, %v4975_v25, 0.0  ;;  %v4924_v25 = vld [vmem:[%s8196_s5] sm:$0x1]  ;;  %s5784_s5 = smov [#allocation6]  }
 0x4dd   :  { %v4997_v0 = vsel %vm2482_vm13, %v4973_v9, 0.0 }
 0x4de   :  { %v4946_v36 = vadd.f32 %v4945_v41, %v4944_v14  ;;  %v4998_v37 = vadd.f32 %v4997_v0, %v4996_v6 }
 0x4e0   :  { %v5000_v49 = vadd.f32 %v4999_v19, %v4998_v37  ;;  %v4948_v60 = vadd.f32 %v4947_v30, %v4946_v36  ;;  %v4925_v37 = vld [vmem:[%s8197_s6] sm:$0x1]  ;;  %s5241_s6 = sshll.u32 %s5784_s5, 4  ;;  %s5242_s6 = int_to_ptr.vmem [resolvable:$true] %s5241_s6 }
 0x4e1   :  { %p5751_p1 = scmp.lt.s32.totalorder %s5242_s6, %s5242_s6 }
 0x4e2   :  { %v5002_v24 = vadd.f32 %v5001_v3, %v5000_v49 }
 0x4ed   :  { %v5666_v57 = vpop.f32.mrb[12].mxu1 }
 0x4ee   :  { %v4909_v45 = vpop.f32.mrb[13].mxu1  ;;  %v4978_v32 = vmul.f32 %v5666_v57, %v5666_v57  ;;  %v4953_v27 = vsel %vm2482_vm13, %v5666_v57, 0.0 }
 0x4ef   :  { %v4949_v18 = vsel %vm2482_vm13, %v4909_v45, 0.0  ;;  %v4976_v13 = vmul.f32 %v4909_v45, %v4909_v45  ;;  %v5667_v58 = vpop.f32.mrb[14].mxu1 }
 0x4f0   :  { %v4950_v22 = vadd.f32 %v4949_v18, %v4948_v60  ;;  %v4912_v10 = vpop.f32.mrb[15].mxu1  ;;  %v4979_v8 = vmul.f32 %v5667_v58, %v5667_v58  ;;  %v5007_v62 = vsel %vm2482_vm13, %v4978_v32, 0.0  ;;  %v4955_v26 = vsel %vm2482_vm13, %v5667_v58, 0.0 }
 0x4f1   :  { %v5003_v59 = vsel %vm2482_vm13, %v4976_v13, 0.0  ;;  %v4951_v5 = vsel %vm2482_vm13, %v4912_v10, 0.0  ;;  %v4977_v33 = vmul.f32 %v4912_v10, %v4912_v10 }
 0x4f2   :  { %v5004_v39 = vadd.f32 %v5003_v59, %v5002_v24  ;;  %v4952_v63 = vadd.f32 %v4951_v5, %v4950_v22  ;;  %v5009_v1 = vsel %vm2482_vm13, %v4979_v8, 0.0 }
 0x4f3   :  { %v5005_v29 = vsel %vm2482_vm13, %v4977_v33, 0.0 }
 0x4f4   :  { %v4954_v46 = vadd.f32 %v4953_v27, %v4952_v63  ;;  %v5006_v61 = vadd.f32 %v5005_v29, %v5004_v39 }
 0x4f6   :  { %v4956_v52 = vadd.f32 %v4955_v26, %v4954_v46  ;;  %v5008_v48 = vadd.f32 %v5007_v62, %v5006_v61 }
 0x4f8   :  { %v4957_v17 = vrot.slane %v4956_v52, 4  ;;  %v5010_v23 = vadd.f32 %v5009_v1, %v5008_v48 }
 0x4fa   :  { %v4958_v11 = vadd.f32 %v4957_v17, %v4956_v52  ;;  %v5011_v47 = vrot.slane %v5010_v23, 4 }
 0x4fc   :  { %v4959_v35 = vrot.slane %v4958_v11, 2  ;;  %v5012_v56 = vadd.f32 %v5011_v47, %v5010_v23 }
 0x4fe   :  { %v4960_v44 = vadd.f32 %v4959_v35, %v4958_v11  ;;  %v5013_v15 = vrot.slane %v5012_v56, 2 }
 0x500   :  { %v4961_v54 = vrot.slane %v4960_v44, 1  ;;  %v5014_v55 = vadd.f32 %v5013_v15, %v5012_v56 }
 0x502   :  { %v4962_v16 = vadd.f32 %v4961_v54, %v4960_v44  ;;  %v5015_v34 = vrot.slane %v5014_v55, 1 }
 0x504   :  { %v4963_v50 = vmul.f32 0.0078125, %v4962_v16  ;;  %v5016_v51 = vadd.f32 %v5015_v34, %v5014_v55 }
 0x506   :  { %v5017_v9 = vmul.f32 0.0078125, %v5016_v51  ;;  %v5018_v6 = vmul.f32 %v4963_v50, %v4963_v50 }
 0x508   :  { %v5019_v14 = vsub.f32 %v5017_v9, %v5018_v6 }
 0x50a   :  { %v5020_v41 = vadd.f32 1e-05, %v5019_v14 }
 0x50c   :  { %5744 = vrsqrt.f32 %v5020_v41 }
 0x516   :  { %v5745_v0 = vpop.eup %5744 }
 0x517   :  { %v5022_v36 = vmul.f32 %v5745_v0, %v4924_v25 }
 0x519   :  { %v5023_v19 = vmul.f32 %v5022_v36, %v4963_v50  ;;  %v5029_v30 = vrot.slane %v5022_v36, %v7058_v43 }
 0x51b   :  { %v5024_v49 = vsub.f32 %v4925_v37, %v5023_v19  ;;  %v5044_v60 = vmul.f32 %v5029_v30, %v4912_v10  ;;  %v5039_v3 = vmul.f32 %v5029_v30, %v8078_v12  ;;  %v5040_v24 = vmul.f32 %v5029_v30, %v8086_v28 }
 0x51c   :  { %v5041_v18 = vmul.f32 %v8076_v21, %v5029_v30  ;;  %v5042_v13 = vmul.f32 %v8084_v2, %v5029_v30  ;;  %v5043_v22 = vmul.f32 %v5029_v30, %v4909_v45  ;;  %v5045_v32 = vmul.f32 %v5666_v57, %v5029_v30 }
 0x51d   :  { %v5051_v59 = vrot.slane %v5024_v49, %v7058_v43  ;;  %v5046_v5 = vmul.f32 %v5667_v58, %v5029_v30  ;;  %v5031_v33 = vmul.f32 %v5029_v30, %v8022_v31  ;;  %v5032_v39 = vmul.f32 %v5029_v30, %v8028_v7 }
 0x51e   :  { %v5033_v63 = vmul.f32 %v8020_v42, %v5029_v30  ;;  %v5034_v10 = vmul.f32 %v8026_v53, %v5029_v30  ;;  %v5035_v12 = vmul.f32 %v5029_v30, %v8050_v4  ;;  %v5036_v28 = vmul.f32 %v5029_v30, %v8058_v38 }
 0x51f   :  { %v5066_v21 = vadd.f32 %v5051_v59, %v5044_v60  ;;  %v5061_v27 = vadd.f32 %v5051_v59, %v5039_v3  ;;  %v5062_v2 = vadd.f32 %v5051_v59, %v5040_v24  ;;  %v5063_v45 = vadd.f32 %v5051_v59, %v5041_v18 }
 0x520   :  { %v5064_v57 = vadd.f32 %v5051_v59, %v5042_v13  ;;  %v5065_v8 = vadd.f32 %v5051_v59, %v5043_v22  ;;  %v5067_v43 = vadd.f32 %v5051_v59, %v5045_v32  ;;  %v5068_v58 = vadd.f32 %v5051_v59, %v5046_v5 }
 0x521   :  { %v5082_v29 = vmax.f32 %v5066_v21, 0.0  ;;  %v5077_v31 = vmax.f32 %v5061_v27, 0.0  ;;  %v5078_v46 = vmax.f32 %v5062_v2, 0.0  ;;  %v5079_v7 = vmax.f32 %v5063_v45, 0.0 }
 0x522   :  { %v5080_v61 = vmax.f32 %v5064_v57, 0.0  ;;  %v5081_v42 = vmax.f32 %v5065_v8, 0.0  ;;  %v5083_v62 = vmax.f32 %v5067_v43, 0.0  ;;  %v5084_v53 = vmax.f32 %v5068_v58, 0.0 }
 0x523   :  { %5098 = vst.msk [vmem:[#allocation5 + $0x68] sm:$0xff] %vm2482_vm13, %v5082_v29  ;;  %5093 = vst.msk [vmem:[#allocation5 + $0x40] sm:$0xff] %vm2482_vm13, %v5077_v31  ;;  %v5037_v4 = vmul.f32 %v8048_v20, %v5029_v30  ;;  %v5038_v38 = vmul.f32 %v8056_v40, %v5029_v30  ;;  %v5053_v26 = vadd.f32 %v5051_v59, %v5031_v33 }
 0x524   :  { %5094 = vst.msk [vmem:[#allocation5 + $0x48] sm:$0xff] %vm2482_vm13, %v5078_v46  ;;  %5095 = vst.msk [vmem:[#allocation5 + $0x50] sm:$0xff] %vm2482_vm13, %v5079_v7  ;;  %v5054_v52 = vadd.f32 %v5051_v59, %v5032_v39  ;;  %v5055_v48 = vadd.f32 %v5051_v59, %v5033_v63  ;;  %v5056_v1 = vadd.f32 %v5051_v59, %v5034_v10 }
 0x525   :  { %5096 = vst.msk [vmem:[#allocation5 + $0x58] sm:$0xff] %vm2482_vm13, %v5080_v61  ;;  %5097 = vst.msk [vmem:[#allocation5 + $0x60] sm:$0xff] %vm2482_vm13, %v5081_v42  ;;  %v5057_v17 = vadd.f32 %v5051_v59, %v5035_v12  ;;  %v5058_v23 = vadd.f32 %v5051_v59, %v5036_v28  ;;  %v5059_v11 = vadd.f32 %v5051_v59, %v5037_v4  ;;  %v5069_v35 = vmax.f32 %v5053_v26, 0.0 }
 0x526   :  { %5099 = vst.msk [vmem:[#allocation5 + $0x70] sm:$0xff] %vm2482_vm13, %v5083_v62  ;;  %5100 = vst.msk [vmem:[#allocation5 + $0x78] sm:$0xff] %vm2482_vm13, %v5084_v53  ;;  %v5060_v47 = vadd.f32 %v5051_v59, %v5038_v38  ;;  %v5070_v20 = vmax.f32 %v5054_v52, 0.0  ;;  %v5071_v56 = vmax.f32 %v5055_v48, 0.0  ;;  %v5072_v40 = vmax.f32 %v5056_v1, 0.0 }
 0x527   :  { %v5073_v44 = vmax.f32 %v5057_v17, 0.0  ;;  %v5074_v15 = vmax.f32 %v5058_v23, 0.0  ;;  %v5075_v54 = vmax.f32 %v5059_v11, 0.0  ;;  %5085 = vst.msk [vmem:[#allocation5] sm:$0xff] %vm2482_vm13, %v5069_v35 }
 0x528   :  { %v5076_v55 = vmax.f32 %v5060_v47, 0.0  ;;  %5086 = vst.msk [vmem:[#allocation5 + $0x8] sm:$0xff] %vm2482_vm13, %v5070_v20  ;;  %5087 = vst.msk [vmem:[#allocation5 + $0x10] sm:$0xff] %vm2482_vm13, %v5071_v56 }
 0x529   :  { %5088 = vst.msk [vmem:[#allocation5 + $0x18] sm:$0xff] %vm2482_vm13, %v5072_v40  ;;  %5089 = vst.msk [vmem:[#allocation5 + $0x20] sm:$0xff] %vm2482_vm13, %v5073_v44 }
 0x52a   :  { %5090 = vst.msk [vmem:[#allocation5 + $0x28] sm:$0xff] %vm2482_vm13, %v5074_v15  ;;  %5091 = vst.msk [vmem:[#allocation5 + $0x30] sm:$0xff] %vm2482_vm13, %v5075_v54 }
 0x52b   :  { %5092 = vst.msk [vmem:[#allocation5 + $0x38] sm:$0xff] %vm2482_vm13, %v5076_v55 }
 0x52c   :  { %v5115_v16 = vld [vmem:[#allocation5 + $0x41] ss:$8 sm:$0xf]  ;;  %v5133_v51 = vld [vmem:[#allocation5 + $0x42] ss:$8 sm:$0xf] }
 0x52d   :  { %v5116_v34 = vld [vmem:[#allocation5 + $0x41] ss:$8 sm:$0xf0]  ;;  %v5134_v9 = vld [vmem:[#allocation5 + $0x42] ss:$8 sm:$0xf0] }
 0x52e   :  { %v5117_v50 = vor.u32 %v5116_v34, %v5115_v16  ;;  %v5135_v41 = vor.u32 %v5134_v9, %v5133_v51  ;;  %v5151_v0 = vld [vmem:[#allocation5 + $0x43] ss:$8 sm:$0xf]  ;;  %v5169_v60 = vld [vmem:[#allocation5 + $0x44] ss:$8 sm:$0xf] }
 0x52f   :  { %v5152_v36 = vld [vmem:[#allocation5 + $0x43] ss:$8 sm:$0xf0]  ;;  %v5170_v3 = vld [vmem:[#allocation5 + $0x44] ss:$8 sm:$0xf0] }
 0x530   :  { %5122 = vrot.lane.b32.xlu1 %v5117_v50, %s5774_s12  ;;  %v5111_v6 = vld [vmem:[#allocation5 + $0x1] ss:$8 sm:$0xf]  ;;  %v5129_v37 = vld [vmem:[#allocation5 + $0x2] ss:$8 sm:$0xf]  ;;  %v5153_v30 = vor.u32 %v5152_v36, %v5151_v0  ;;  %v5171_v13 = vor.u32 %v5170_v3, %v5169_v60 }
 0x531   :  { %v5147_v24 = vld [vmem:[#allocation5 + $0x3] ss:$8 sm:$0xf]  ;;  %v5165_v22 = vld [vmem:[#allocation5 + $0x4] ss:$8 sm:$0xf] }
 0x532   :  { %v5112_v14 = vld [vmem:[#allocation5 + $0x1] ss:$8 sm:$0xf0]  ;;  %v5130_v19 = vld [vmem:[#allocation5 + $0x2] ss:$8 sm:$0xf0] }
 0x533   :  { %v5113_v25 = vor.u32 %v5112_v14, %v5111_v6  ;;  %v5131_v49 = vor.u32 %v5130_v19, %v5129_v37  ;;  %v5148_v18 = vld [vmem:[#allocation5 + $0x3] ss:$8 sm:$0xf0]  ;;  %v5166_v32 = vld [vmem:[#allocation5 + $0x4] ss:$8 sm:$0xf0] }
 0x534   :  { %5140 = vrot.lane.b32.xlu1 %v5135_v41, %s5778_s16  ;;  %v5187_v59 = vld [vmem:[#allocation5 + $0x45] ss:$8 sm:$0xf]  ;;  %v5149_v33 = vor.u32 %v5148_v18, %v5147_v24  ;;  %v5106_v39 = vld [vmem:[#allocation5 + $0x40] ss:$8 sm:$0xf0]  ;;  %v5167_v2 = vor.u32 %v5166_v32, %v5165_v22 }
 0x535   :  { %5120 = vrot.lane.b32.xlu0 %v5113_v25, %s5774_s12  ;;  %v5188_v5 = vld [vmem:[#allocation5 + $0x45] ss:$8 sm:$0xf0]  ;;  %v5105_v63 = vld [vmem:[#allocation5 + $0x40] ss:$8 sm:$0xf] }
 0x536   :  { %v5107_v10 = vor.u32 %v5106_v39, %v5105_v63  ;;  %v5102_v12 = vld [vmem:[#allocation5] ss:$8 sm:$0xf0]  ;;  %v5189_v27 = vor.u32 %v5188_v5, %v5187_v59  ;;  %v5205_v45 = vld [vmem:[#allocation5 + $0x46] ss:$8 sm:$0xf] }
 0x537   :  { %v5101_v28 = vld [vmem:[#allocation5] ss:$8 sm:$0xf]  ;;  %v5206_v57 = vld [vmem:[#allocation5 + $0x46] ss:$8 sm:$0xf0] }
 0x538   :  { %5158 = vrot.lane.b32.xlu1 %v5153_v30, %s5773_s11  ;;  %v5103_v21 = vor.u32 %v5102_v12, %v5101_v28  ;;  %5109 = vst.msk [vmem:[#allocation6 + $0x8] sm:$0xff] %vm2482_vm13, %v5107_v10  ;;  %v5183_v8 = vld [vmem:[#allocation5 + $0x5] ss:$8 sm:$0xf]  ;;  %v5207_v58 = vor.u32 %v5206_v57, %v5205_v45 }
 0x539   :  { %5138 = vrot.lane.b32.xlu0 %v5131_v49, %s5778_s16  ;;  %v5184_v43 = vld [vmem:[#allocation5 + $0x5] ss:$8 sm:$0xf0]  ;;  %v5223_v31 = vld [vmem:[#allocation5 + $0x47] ss:$8 sm:$0xf] }
 0x53a   :  { %5108 = vst.msk [vmem:[#allocation6] sm:$0xff] %vm2482_vm13, %v5103_v21  ;;  %v5185_v29 = vor.u32 %v5184_v43, %v5183_v8  ;;  %v5224_v46 = vld [vmem:[#allocation5 + $0x47] ss:$8 sm:$0xf0] }
 0x53b   :  { %v5201_v7 = vld [vmem:[#allocation5 + $0x6] ss:$8 sm:$0xf]  ;;  %v5225_v42 = vor.u32 %v5224_v46, %v5223_v31  ;;  %v5219_v53 = vld [vmem:[#allocation5 + $0x7] ss:$8 sm:$0xf] }
 0x53c   :  { %5176 = vrot.lane.b32.xlu1 %v5171_v13, %s5776_s14  ;;  %v5202_v61 = vld [vmem:[#allocation5 + $0x6] ss:$8 sm:$0xf0]  ;;  %v5220_v4 = vld [vmem:[#allocation5 + $0x7] ss:$8 sm:$0xf0] }
 0x53d   :  { %5156 = vrot.lane.b32.xlu0 %v5149_v33, %s5773_s11  ;;  %v5203_v62 = vor.u32 %v5202_v61, %v5201_v7  ;;  %v5221_v38 = vor.u32 %v5220_v4, %v5219_v53  ;;  %s5746_s11 = scalar_lea.vmem %s5242_s6, 256 }
 0x53e   :  { %p5747_p0 = scmp.ne.s32.totalorder %s5242_s6, %s5746_s11  ;;  %p5752_p2 = scmp.lt.s32.totalorder %s5746_s11, %s5746_s11 }
 0x540   :  { %5194 = vrot.lane.b32.xlu1 %v5189_v27, %s5781_s26  ;;  %p5753_p3 = por %p5752_p2, %p5751_p1 }
 0x541   :  { %5174 = vrot.lane.b32.xlu0 %v5167_v2, %s5776_s14 }
 0x542   :  { %p5754_p4 = pnand %p5753_p3, %p5747_p0 }
 0x544   :  { %5212 = vrot.lane.b32.xlu1 %v5207_v58, %s5780_s3 }
 0x545   :  { %5192 = vrot.lane.b32.xlu0 %v5185_v29, %s5781_s26 }
 0x548   :  { %5230 = vrot.lane.b32.xlu1 %v5225_v42, %s5783_s28 }
 0x549   :  { %5210 = vrot.lane.b32.xlu0 %v5203_v62, %s5780_s3 }
 0x54d   :  { %5228 = vrot.lane.b32.xlu0 %v5221_v38, %s5783_s28 }
 0x5a2   :  { %v5123_v26 = vpop.permute.xlu1 %5122 }
 0x5a3   :  { %5127 = vst.msk [vmem:[#allocation6 + $0x8] sm:$0xff] %vm3394_vm3, %v5123_v26 }
 0x5a6   :  { %v5141_v52 = vpop.permute.xlu1 %5140 }
 0x5a7   :  { %v5121_v48 = vpop.permute.xlu0 %5120  ;;  %5145 = vst.msk [vmem:[#allocation6 + $0x8] sm:$0xff] %vm3579_vm10, %v5141_v52 }
 0x5a8   :  { %5126 = vst.msk [vmem:[#allocation6] sm:$0xff] %vm3394_vm3, %v5121_v48 }
 0x5aa   :  { %v5159_v1 = vpop.permute.xlu1 %5158 }
 0x5ab   :  { %v5139_v17 = vpop.permute.xlu0 %5138  ;;  %5163 = vst.msk [vmem:[#allocation6 + $0x8] sm:$0xff] %vm3668_vm11, %v5159_v1 }
 0x5ac   :  { %5144 = vst.msk [vmem:[#allocation6] sm:$0xff] %vm3579_vm10, %v5139_v17 }
 0x5ae   :  { %v5177_v23 = vpop.permute.xlu1 %5176 }
 0x5af   :  { %v5157_v11 = vpop.permute.xlu0 %5156  ;;  %5181 = vst.msk [vmem:[#allocation6 + $0x8] sm:$0xff] %vm3981_vm0, %v5177_v23 }
 0x5b0   :  { %5162 = vst.msk [vmem:[#allocation6] sm:$0xff] %vm3668_vm11, %v5157_v11 }
 0x5b2   :  { %v5195_v47 = vpop.permute.xlu1 %5194 }
 0x5b3   :  { %v5175_v35 = vpop.permute.xlu0 %5174  ;;  %5199 = vst.msk [vmem:[#allocation6 + $0x8] sm:$0xff] %vm4166_vm1, %v5195_v47 }
 0x5b4   :  { %5180 = vst.msk [vmem:[#allocation6] sm:$0xff] %vm3981_vm0, %v5175_v35 }
 0x5b6   :  { %v5213_v20 = vpop.permute.xlu1 %5212 }
 0x5b7   :  { %v5193_v56 = vpop.permute.xlu0 %5192  ;;  %5217 = vst.msk [vmem:[#allocation6 + $0x8] sm:$0xff] %vm4256_vm4, %v5213_v20 }
 0x5b8   :  { %5198 = vst.msk [vmem:[#allocation6] sm:$0xff] %vm4166_vm1, %v5193_v56 }
 0x5ba   :  { %v5231_v40 = vpop.permute.xlu1 %5230 }
 0x5bb   :  { %v5211_v44 = vpop.permute.xlu0 %5210  ;;  %5235 = vst.msk [vmem:[#allocation6 + $0x8] sm:$0xff] %vm4569_vm5, %v5231_v40 }
 0x5bc   :  { %5216 = vst.msk [vmem:[#allocation6] sm:$0xff] %vm4256_vm4, %v5211_v44 }
 0x5bf   :  { %v5229_v15 = vpop.permute.xlu0 %5228 }
 0x5c0   :  { %5234 = vst.msk [vmem:[#allocation6] sm:$0xff] %vm4569_vm5, %v5229_v15 }
 0x5c1   :  { %5757 = shalt.err (!%p5754_p4)
}
 0x5c2   :  { %s5758_s22 = scalar_lea.hbm %s8198_s7, 256 }
 0x5c3   :  { %p5759_p5 = scmp.ne.s32.totalorder %s8198_s7, %s5758_s22  ;;  %p5762_p6 = scmp.lt.u32.totalorder %s5758_s22, %s8198_s7 }
 0x5c5   :  { %p5764_p7 = pnand %p5762_p6, %p5759_p5 }
 0x5c7   :  { %5767 = shalt.err (!%p5764_p7)
}
 0x5c8   :  { %s5785_s25 = smov 128  }
 0x5c9   :  { %5247 = dma.vmem_to_hbm [thread:$0]  %s5242_s6, 256, %s8198_s7, [#allocation7], %s5785_s25, %s5785_s25, %s5774_s12  }
 0x5ca   :  { %5768 = dma.done.wait [#allocation7], 256  }
 0x5cb   :  { %5769 = vsyncadd [#allocation7], 4294967040 }
 0x5cc   :  { %5251 = vsyncpa [#allocation7], 1 }

</bundles_post_ra>
